<compile_context>
chip_gen: v7x
topology: tpu7x:2x2x1
jax: 0.10.0
libtpu: 0.0.40
codegen_flags: <defaults>
</compile_context>

<pallas_src>
import functools

import jax
import jax.numpy as jnp
from jax.experimental import pallas as pl
from jax.experimental.pallas import tpu as pltpu


def _round_up(x, m):
    return (x + m - 1) // m * m


# -------------------- generation-aware tuning knobs -------------------------

def _default_vmem_limit():
    """~70% of physical VMEM, clipped to [32 MiB, 96 MiB] (v7x ~45 MiB)."""
    try:
        cap = int(pltpu.get_tpu_info().vmem_capacity_bytes)
    except Exception:
        cap = 64 * 1024 * 1024
    return min(96 * 1024 * 1024, max(32 * 1024 * 1024, int(cap * 0.7)))


_VMEM_LIMIT = _default_vmem_limit()
_ROW_TILE_CAP = 2048 if _VMEM_LIMIT >= 64 * 1024 * 1024 else 1024


def _probe_buffered():
    """Check that pipeline_mode=pl.Buffered(1) lowers/runs on this install."""
    try:
        def _k(x_ref, o_ref):
            o_ref[...] = x_ref[...] + 1.0

        out = pl.pallas_call(
            _k,
            out_shape=jax.ShapeDtypeStruct((8, 128), jnp.float32),
            grid_spec=pltpu.PrefetchScalarGridSpec(
                num_scalar_prefetch=0,
                grid=(2,),
                in_specs=[pl.BlockSpec((8, 128), lambda i: (0, 0),
                                       pipeline_mode=pl.Buffered(buffer_count=1))],
                out_specs=pl.BlockSpec((8, 128), lambda i: (0, 0)),
            ),
        )(jnp.zeros((8, 128), jnp.float32))
        jax.block_until_ready(out)
        return True
    except Exception:
        return False


_USE_BUFFERED = _probe_buffered()


def _const_spec(shape):
    """BlockSpec for a grid-invariant block; single-buffered when supported."""
    index_map = lambda *args: tuple(0 for _ in shape)
    if _USE_BUFFERED:
        return pl.BlockSpec(shape, index_map,
                            pipeline_mode=pl.Buffered(buffer_count=1))
    return pl.BlockSpec(shape, index_map)


def _vmem():
    return pl.BlockSpec(memory_space=pltpu.MemorySpace.VMEM)


def _pick_row_tile(m):
    """(tm, mp): row tile and padded row count for M = N*OH*OW.

    Aims for >= 2 grid tiles (so ("parallel",) can shard across both
    TensorCores on v7x) while capping the tile at _ROW_TILE_CAP rows.
    """
    mp8 = _round_up(m, 8)
    if mp8 <= 8:
        return mp8, mp8
    tm = min(_ROW_TILE_CAP, _round_up((mp8 + 1) // 2, 8))
    mp = _round_up(mp8, tm)
    return tm, mp


# ----------------------------- Pallas kernels ------------------------------

def _matmul_stats_kernel(x_ref, w_ref, y_ref, sum_ref, ssq_ref):
    """Pass 1: y = cols @ W (bf16 x bf16 -> f32 acc) + per-tile BN partials.

    Stats are taken from the f32 accumulator; y is written back as bf16.
    Zero-padded rows contribute exactly 0 to the partial stats.
    """
    y = jnp.dot(x_ref[...], w_ref[...], preferred_element_type=jnp.float32)
    s = jnp.sum(y, axis=0, keepdims=True)            # (1, OCp)
    q = jnp.sum(y * y, axis=0, keepdims=True)        # (1, OCp) one-pass stats
    y_ref[...] = y.astype(y_ref.dtype)
    ocp = y.shape[1]
    sum_ref[...] = jnp.broadcast_to(s, (8, ocp))
    ssq_ref[...] = jnp.broadcast_to(q, (8, ocp))


def _bn_act_kernel(y_ref, sc_ref, sh_ref, o_ref, *, apply_sigmoid):
    """Pass 2: BN affine (precomputed scale/shift) + LeakyReLU(0.2) [+sigmoid]."""
    y = y_ref[...].astype(jnp.float32) * sc_ref[...] + sh_ref[...]
    act = jnp.where(y >= 0.0, y, 0.2 * y)
    if apply_sigmoid:
        act = jax.nn.sigmoid(act)
    o_ref[...] = act.astype(o_ref.dtype)


def _enc_head_kernel(x_ref, w_ref, b_ref, *rest, lp, deterministic):
    """Fused fc_mu + fc_logvar (+ reparameterization) in one kernel."""
    y = jnp.dot(x_ref[...], w_ref[...], preferred_element_type=jnp.float32)
    y = y + b_ref[...]
    mu = y[:, :lp]
    lv = y[:, lp:]
    if deterministic:
        mu_ref, lv_ref, z_ref = rest
        z = mu
    else:
        eps_ref, mu_ref, lv_ref, z_ref = rest
        z = mu + eps_ref[...] * jnp.exp(0.5 * lv)
    mu_ref[...] = mu
    lv_ref[...] = lv
    z_ref[...] = z


def _linear_kernel(x_ref, w_ref, b_ref, o_ref):
    o_ref[...] = (
        jnp.dot(x_ref[...], w_ref[...], preferred_element_type=jnp.float32)
        + b_ref[...]
    )


# ----------------------------- kernel wrappers ------------------------------

def conv_bn_lrelu(cols, w_pad, gamma_pad, beta_pad, oc, *, apply_sigmoid=False,
                  out_dtype=jnp.bfloat16):
    """Conv-as-matmul + training-mode BatchNorm + LeakyReLU(0.2) [+ sigmoid].

    cols:       (M, K) im2col matrix (cast to bf16 here).
    w_pad:      (K_pad, OC_pad) bf16, zero padded to multiples of 128.
    gamma/beta: (OC_pad,) f32 (padding: gamma=1, beta=0).
    Returns (M, oc) in out_dtype.
    """
    m, k = cols.shape
    kp, ocp = w_pad.shape
    tm, mp = _pick_row_tile(m)
    nt = mp // tm
    cols_p = jnp.pad(cols.astype(jnp.bfloat16), ((0, mp - m), (0, kp - k)))

    # ---- pass 1: pipelined matmul + per-tile partial sum / sumsq (bf16 y) --
    y, s_part, q_part = pl.pallas_call(
        _matmul_stats_kernel,
        out_shape=(
            jax.ShapeDtypeStruct((mp, ocp), jnp.bfloat16),
            jax.ShapeDtypeStruct((nt * 8, ocp), jnp.float32),
            jax.ShapeDtypeStruct((nt * 8, ocp), jnp.float32),
        ),
        grid_spec=pltpu.PrefetchScalarGridSpec(
            num_scalar_prefetch=0,
            grid=(nt,),
            in_specs=[
                pl.BlockSpec((tm, kp), lambda i: (i, 0)),
                _const_spec((kp, ocp)),          # grid-invariant weight
            ],
            out_specs=[
                pl.BlockSpec((tm, ocp), lambda i: (i, 0)),
                pl.BlockSpec((8, ocp), lambda i: (i, 0)),
                pl.BlockSpec((8, ocp), lambda i: (i, 0)),
            ],
        ),
        compiler_params=pltpu.CompilerParams(
            dimension_semantics=("parallel",),
            vmem_limit_bytes=_VMEM_LIMIT),
    )(cols_p, w_pad)

    # ---- finalize BN batch statistics (tiny, fused by XLA under jit) -------
    # NOTE: one-pass E[x^2]-E[x]^2 variance in f32 (clamped at 0) — small
    # deviation from PyTorch's two-pass f32 path, within bf16 tolerance.
    ssum = s_part.reshape(nt, 8, ocp)[:, 0, :].sum(axis=0)
    ssq = q_part.reshape(nt, 8, ocp)[:, 0, :].sum(axis=0)
    mean = ssum / float(m)                      # true row count (ignores pad)
    var = jnp.maximum(ssq / float(m) - mean * mean, 0.0)
    scale = gamma_pad * jax.lax.rsqrt(var + 1e-5)
    shift = beta_pad - mean * scale
    scale2 = scale.reshape(1, ocp).astype(jnp.float32)
    shift2 = shift.reshape(1, ocp).astype(jnp.float32)

    # ---- pass 2: pipelined normalize + activation --------------------------
    out = pl.pallas_call(
        functools.partial(_bn_act_kernel, apply_sigmoid=apply_sigmoid),
        out_shape=jax.ShapeDtypeStruct((mp, ocp), out_dtype),
        grid_spec=pltpu.PrefetchScalarGridSpec(
            num_scalar_prefetch=0,
            grid=(nt,),
            in_specs=[
                pl.BlockSpec((tm, ocp), lambda i: (i, 0)),
                _const_spec((1, ocp)),           # grid-invariant scale
                _const_spec((1, ocp)),           # grid-invariant shift
            ],
            out_specs=pl.BlockSpec((tm, ocp), lambda i: (i, 0)),
        ),
        compiler_params=pltpu.CompilerParams(
            dimension_semantics=("parallel",),
            vmem_limit_bytes=_VMEM_LIMIT),
    )(y, scale2, shift2)

    return out[:m, :oc]


def enc_head(feat, w_pad, b_pad, eps, latent, *, deterministic=False):
    """Fused fc_mu / fc_logvar (/ reparameterization).  Returns (mu, lv, z)."""
    b_, k = feat.shape
    kp, two_lp = w_pad.shape
    lp = two_lp // 2
    bp = _round_up(b_, 8)
    x = jnp.pad(feat.astype(jnp.bfloat16), ((0, bp - b_), (0, kp - k)))
    args = [x, w_pad, b_pad]
    if not deterministic:
        eps_p = jnp.pad(eps.astype(jnp.float32),
                        ((0, bp - b_), (0, lp - eps.shape[1])))
        args.append(eps_p)
    mu, lv, z = pl.pallas_call(
        functools.partial(_enc_head_kernel, lp=lp, deterministic=deterministic),
        out_shape=(
            jax.ShapeDtypeStruct((bp, lp), jnp.float32),
            jax.ShapeDtypeStruct((bp, lp), jnp.float32),
            jax.ShapeDtypeStruct((bp, lp), jnp.float32),
        ),
        in_specs=[_vmem() for _ in range(len(args))],
        out_specs=[_vmem() for _ in range(3)],
        compiler_params=pltpu.CompilerParams(vmem_limit_bytes=_VMEM_LIMIT),
    )(*args)
    return mu[:b_, :latent], lv[:b_, :latent], z[:b_, :latent]


def linear(x, w_pad, b_pad, n_out):
    """Plain Linear (fc1). Lane-dense padded weights, bf16 MXU operands."""
    b_, k = x.shape
    kp, npad = w_pad.shape
    bp = _round_up(b_, 8)
    xp = jnp.pad(x.astype(jnp.bfloat16), ((0, bp - b_), (0, kp - k)))
    out = pl.pallas_call(
        _linear_kernel,
        out_shape=jax.ShapeDtypeStruct((bp, npad), jnp.float32),
        in_specs=[_vmem() for _ in range(3)],
        out_specs=_vmem(),
        compiler_params=pltpu.CompilerParams(vmem_limit_bytes=_VMEM_LIMIT),
    )(xp, w_pad, b_pad)
    return out[:b_, :n_out]


# ------------------------------- JAX glue ----------------------------------

def im2col(x_nhwc, ksize, stride, pad):
    """Encoder im2col (zero padding). (N,H,W,C) -> (N*OH*OW, K*K*C), OH, OW."""
    if pad > 0:
        x_nhwc = jnp.pad(
            x_nhwc, ((0, 0), (pad, pad), (pad, pad), (0, 0)), mode='constant')
    n, hp, wp, c = x_nhwc.shape
    oh = (hp - ksize) // stride + 1
    ow = (wp - ksize) // stride + 1
    patches = []
    for kh in range(ksize):
        for kw in range(ksize):
            patches.append(
                x_nhwc[:, kh:kh + stride * oh:stride,
                       kw:kw + stride * ow:stride, :])
    cols = jnp.stack(patches, axis=3)            # (N, OH, OW, K*K, C)
    cols = cols.reshape(n * oh * ow, ksize * ksize * c)
    return cols, oh, ow


def upsample_pad_im2col(x_nhwc, ksize=3):
    """Fused nearest-upsample x2 + ReplicationPad2d(1) + im2col(3x3, stride 1).

    Gathers directly from the low-res input — no materialized upsample / pad
    tensors.  Returns (cols, OH, OW) with OH=2H, OW=2W, columns (kh, kw, c).
    """
    n, h, w, c = x_nhwc.shape
    oh, ow = 2 * h, 2 * w
    base_h = jnp.arange(oh)
    base_w = jnp.arange(ow)
    patches = []
    for kh in range(ksize):
        ih = jnp.clip(base_h + kh - 1, 0, oh - 1) // 2      # source row index
        for kw in range(ksize):
            iw = jnp.clip(base_w + kw - 1, 0, ow - 1) // 2  # source col index
            patches.append(x_nhwc[:, ih[:, None], iw[None, :], :])  # (N,OH,OW,C)
    cols = jnp.stack(patches, axis=3)            # (N, OH, OW, K*K, C)
    cols = cols.reshape(n * oh * ow, ksize * ksize * c)
    return cols, oh, ow


def conv_weight_to_matrix(w_oihw):
    """(OC, IC, KH, KW) -> (KH*KW*IC, OC), matching im2col column order."""
    oc, ic, kh, kw = w_oihw.shape
    return jnp.transpose(w_oihw, (2, 3, 1, 0)).reshape(kh * kw * ic, oc)


class CVAEPallas:
    def __init__(self, key, num_labels=1, latent_size=32, img_size=32,
                 layer_sizes=(3, 32, 64, 128)):
        self.num_labels = num_labels
        self.latent_size = latent_size
        self.img_size = img_size
        self.layer_sizes = list(layer_sizes)
        self.final_im_size = img_size // (2 ** (len(layer_sizes) - 1))
        self.linear_size = self.final_im_size ** 2 * layer_sizes[-1]

        keys = iter(jax.random.split(key, 64))

        def nrm(shape, scale=0.05):
            return scale * jax.random.normal(next(keys), shape, jnp.float32)

        def make_conv_layer(cin, cout, ks):
            k = ks * ks * cin
            kp = _round_up(k, 128)
            ocp = _round_up(cout, 128)
            w = conv_weight_to_matrix(nrm((cout, cin, ks, ks)))       # (k, cout)
            w_pad = jnp.zeros((kp, ocp), jnp.bfloat16)
            w_pad = w_pad.at[:k, :cout].set(w.astype(jnp.bfloat16))
            gamma = jnp.ones((ocp,), jnp.float32)
            gamma = gamma.at[:cout].set(1.0 + nrm((cout,)))
            beta = jnp.zeros((ocp,), jnp.float32)
            beta = beta.at[:cout].set(nrm((cout,)))
            # NOTE: conv bias intentionally dropped — training-mode BN mean
            # subtraction cancels a per-channel bias exactly.
            return dict(w=w_pad, gamma=gamma, beta=beta, oc=cout)

        # Encoder: Conv(4, stride 2, pad 1) + BN + LeakyReLU(0.2)
        self.enc = [make_conv_layer(layer_sizes[i], layer_sizes[i + 1], 4)
                    for i in range(len(layer_sizes) - 1)]

        # Decoder: upsample x2 nearest + ReplicationPad(1) + Conv(3,1,0)
        # + BN + LeakyReLU(0.2), channels reversed; sigmoid after last block.
        rev = layer_sizes[::-1]
        self.dec = [make_conv_layer(rev[i], rev[i + 1], 3)
                    for i in range(len(rev) - 1)]

        # Fused encoder head: [fc_mu | fc_logvar] in one lane-dense weight.
        in_enc = self.linear_size + num_labels
        kp_enc = _round_up(in_enc, 128)
        lp = _round_up(latent_size, 128)
        w_mu = nrm((in_enc, latent_size))
        w_lv = nrm((in_enc, latent_size))
        head_w = jnp.zeros((kp_enc, 2 * lp), jnp.bfloat16)
        head_w = head_w.at[:in_enc, :latent_size].set(w_mu.astype(jnp.bfloat16))
        head_w = head_w.at[:in_enc, lp:lp + latent_size].set(
            w_lv.astype(jnp.bfloat16))
        head_b = jnp.zeros((1, 2 * lp), jnp.float32)
        head_b = head_b.at[0, :latent_size].set(nrm((latent_size,)))
        head_b = head_b.at[0, lp:lp + latent_size].set(nrm((latent_size,)))
        self.head_w, self.head_b = head_w, head_b

        # fc1 (decoder input projection), lane-dense padded.
        in_dec = latent_size + num_labels
        kp_dec = _round_up(in_dec, 128)
        np1 = _round_up(self.linear_size, 128)
        w1 = nrm((in_dec, self.linear_size))
        fc1_w = jnp.zeros((kp_dec, np1), jnp.bfloat16)
        fc1_w = fc1_w.at[:in_dec, :self.linear_size].set(w1.astype(jnp.bfloat16))
        fc1_b = jnp.zeros((1, np1), jnp.float32)
        fc1_b = fc1_b.at[0, :self.linear_size].set(nrm((self.linear_size,)))
        self.fc1_w, self.fc1_b = fc1_w, fc1_b

        # Whole forward pass jitted once (single dispatch, fused glue).
        self._forward_jit = jax.jit(self._forward_impl,
                                    static_argnames=("deterministic",))

    # ------------------------------ forward ---------------------------------

    def _forward_impl(self, x_nchw, c, key, deterministic=False):
        n = x_nchw.shape[0]
        one_hot = jax.nn.one_hot(c, self.num_labels, dtype=jnp.float32)

        # -------- encoder --------
        x = jnp.transpose(x_nchw, (0, 2, 3, 1))            # NHWC
        for layer in self.enc:
            cols, oh, ow = im2col(x.astype(jnp.bfloat16), ksize=4, stride=2,
                                  pad=1)
            y = conv_bn_lrelu(cols, layer['w'], layer['gamma'], layer['beta'],
                              layer['oc'], out_dtype=jnp.bfloat16)
            x = y.reshape(n, oh, ow, layer['oc'])
        # PyTorch flattens NCHW: (N, C, H, W) -> (N, C*H*W)
        feat = jnp.transpose(x, (0, 3, 1, 2)).reshape(n, -1)
        feat = jnp.concatenate([feat, one_hot.astype(feat.dtype)], axis=1)

        if deterministic:
            mu, logvar, z = enc_head(feat, self.head_w, self.head_b, None,
                                     self.latent_size, deterministic=True)
        else:
            eps = jax.random.normal(key, (n, self.latent_size), jnp.float32)
            mu, logvar, z = enc_head(feat, self.head_w, self.head_b, eps,
                                     self.latent_size, deterministic=False)

        # -------- decoder --------
        zc = jnp.concatenate([z, one_hot.astype(z.dtype)], axis=1)
        h = linear(zc, self.fc1_w, self.fc1_b, self.linear_size)
        x = h.reshape(n, self.layer_sizes[-1],
                      self.final_im_size, self.final_im_size)
        x = jnp.transpose(x, (0, 2, 3, 1))                  # NHWC
        for i, layer in enumerate(self.dec):
            last = (i == len(self.dec) - 1)
            # Fused upsample + replication-pad + im2col gather (no repeat).
            cols, oh, ow = upsample_pad_im2col(x.astype(jnp.bfloat16), ksize=3)
            y = conv_bn_lrelu(cols, layer['w'], layer['gamma'], layer['beta'],
                              layer['oc'], apply_sigmoid=last,
                              out_dtype=jnp.float32 if last else jnp.bfloat16)
            x = y.reshape(n, oh, ow, layer['oc'])
        recon = jnp.transpose(x, (0, 3, 1, 2))              # back to NCHW
        return recon, mu, logvar

    def forward(self, x, c, key, deterministic=False):
        return self._forward_jit(x, c, key, deterministic=deterministic)


# --------------------------------- main -------------------------------------

if __name__ == "__main__":
    key = jax.random.PRNGKey(0)
    k_params, k_x, k_c, k_eps = jax.random.split(key, 4)

    # Small config; batch=4 so every conv layer exercises the multi-tile
    # parallel grid path (nt >= 2).
    batch = 4
    num_labels = 4
    latent_size = 16
    img_size = 16
    layer_sizes = [3, 8, 16, 32]

    model = CVAEPallas(k_params, num_labels=num_labels,
                       latent_size=latent_size, img_size=img_size,
                       layer_sizes=layer_sizes)

    x = jax.random.normal(k_x, (batch, layer_sizes[0], img_size, img_size),
                          jnp.float32)
    c = jax.random.randint(k_c, (batch,), 0, num_labels)

    recon_x, mu, logvar = model.forward(x, c, k_eps, deterministic=False)
    jax.block_until_ready((recon_x, mu, logvar))

    assert recon_x.shape == (batch, layer_sizes[0], img_size, img_size)
    assert mu.shape == (batch, latent_size)
    assert logvar.shape == (batch, latent_size)
    assert bool(jnp.all(jnp.isfinite(recon_x)))
    assert bool(jnp.all((recon_x >= 0.0) & (recon_x <= 1.0)))
    print("KERNEL_OK")
</pallas_src>

<mosaic_0001>
module attributes {stable_mosaic.version = 11 : i64} {
  func.func @_k(%arg0: i32, %arg1: memref<8x128xf32, #tpu.memory_space<vmem>>, %arg2: memref<8x128xf32, #tpu.memory_space<vmem>>) attributes {dimension_semantics = [#tpu.dimension_semantics<arbitrary>], iteration_bounds = array<i64: 2>, scalar_prefetch = 0 : i64, scratch_operands = 0 : i64, tpu.core_type = #tpu.core_type<tc>, window_params = [{pipeline_mode = #tpu.pipeline_mode<synchronous>, transform_indices = @transform_0, window_bounds = array<i64: 8, 128>}, {pipeline_mode = #tpu.pipeline_mode<synchronous>, transform_indices = @transform_1, window_bounds = array<i64: 8, 128>}]} {
    %c0 = arith.constant 0 : index
    %c0_0 = arith.constant 0 : index
    %0 = vector.load %arg1[%c0, %c0_0] : memref<8x128xf32, #tpu.memory_space<vmem>>, vector<8x128xf32>
    %cst = arith.constant 1.000000e+00 : f32
    %1 = vector.broadcast %cst : f32 to vector<8x128xf32>
    %2 = arith.addf %0, %1 : vector<8x128xf32>
    %c0_1 = arith.constant 0 : index
    %c0_2 = arith.constant 0 : index
    %3 = vector.load %arg2[%c0_1, %c0_2] : memref<8x128xf32, #tpu.memory_space<vmem>>, vector<8x128xf32>
    tpu.vector_store %arg2[%c0_1, %c0_2], %2 {strides = array<i32>} : memref<8x128xf32, #tpu.memory_space<vmem>>, vector<8x128xf32>,
    return
  }
  func.func @transform_0(%arg0: i32) -> (i32, i32) {
    %c0_i32 = arith.constant 0 : i32
    %c0_i32_0 = arith.constant 0 : i32
    %c0_i32_1 = arith.constant 0 : i32
    return %c0_i32, %c0_i32_0 : i32, i32
  }
  func.func @transform_1(%arg0: i32) -> (i32, i32) {
    %c0_i32 = arith.constant 0 : i32
    %c0_i32_0 = arith.constant 0 : i32
    %c0_i32_1 = arith.constant 0 : i32
    return %c0_i32, %c0_i32_0 : i32, i32
  }
}

module attributes {stable_mosaic.version = 11 : i64} {
  func.func @_matmul_stats_kernel(%arg0: i32, %arg1: memref<128x128xbf16, #tpu.memory_space<vmem>>, %arg2: memref<128x128xbf16, #tpu.memory_space<vmem>>, %arg3: memref<128x128xbf16, #tpu.memory_space<vmem>>, %arg4: memref<8x128xf32, #tpu.memory_space<vmem>>, %arg5: memref<8x128xf32, #tpu.memory_space<vmem>>) attributes {dimension_semantics = [#tpu.dimension_semantics<parallel>], iteration_bounds = array<i64: 2>, scalar_prefetch = 0 : i64, scratch_operands = 0 : i64, tpu.core_type = #tpu.core_type<tc>, window_params = [{transform_indices = @transform_0, window_bounds = array<i64: 128, 128>}, {pipeline_mode = #tpu.pipeline_mode<synchronous>, transform_indices = @transform_1, window_bounds = array<i64: 128, 128>}, {transform_indices = @transform_2, window_bounds = array<i64: 128, 128>}, {transform_indices = @transform_3, window_bounds = array<i64: 8, 128>}, {transform_indices = @transform_4, window_bounds = array<i64: 8, 128>}]} {
    %c0 = arith.constant 0 : index
    %c0_0 = arith.constant 0 : index
    %0 = vector.load %arg1[%c0, %c0_0] : memref<128x128xbf16, #tpu.memory_space<vmem>>, vector<128x128xbf16>
    %c0_1 = arith.constant 0 : index
    %c0_2 = arith.constant 0 : index
    %1 = vector.load %arg2[%c0_1, %c0_2] : memref<128x128xbf16, #tpu.memory_space<vmem>>, vector<128x128xbf16>
    %cst = arith.constant dense<0.000000e+00> : vector<128x128xf32>
    %2 = tpu.matmul %0, %1, %cst {dimension_numbers = #tpu.dot_dimension_numbers<[1], [0], [0], [1], [0, 0, 1, 1], [], []>} : vector<128x128xbf16>, vector<128x128xbf16>, vector<128x128xf32> -> vector<128x128xf32>
    %cst_3 = arith.constant dense<0.000000e+00> : vector<128xf32>
    %3 = vector.multi_reduction <add>, %2, %cst_3 [0] : vector<128x128xf32> to vector<128xf32>
    %4 = vector.shape_cast %3 : vector<128xf32> to vector<1x128xf32>
    %5 = arith.mulf %2, %2 : vector<128x128xf32>
    %cst_4 = arith.constant dense<0.000000e+00> : vector<128xf32>
    %6 = vector.multi_reduction <add>, %5, %cst_4 [0] : vector<128x128xf32> to vector<128xf32>
    %7 = vector.shape_cast %6 : vector<128xf32> to vector<1x128xf32>
    %8 = arith.truncf %2 : vector<128x128xf32> to vector<128x128xbf16>
    %c0_5 = arith.constant 0 : index
    %c0_6 = arith.constant 0 : index
    %9 = vector.load %arg3[%c0_5, %c0_6] : memref<128x128xbf16, #tpu.memory_space<vmem>>, vector<128x128xbf16>
    tpu.vector_store %arg3[%c0_5, %c0_6], %8 {strides = array<i32>} : memref<128x128xbf16, #tpu.memory_space<vmem>>, vector<128x128xbf16>,
    %10 = vector.shape_cast %4 : vector<1x128xf32> to vector<1x128xf32>
    %11 = vector.broadcast %10 : vector<1x128xf32> to vector<8x128xf32>
    %c0_7 = arith.constant 0 : index
    %c0_8 = arith.constant 0 : index
    %12 = vector.load %arg4[%c0_7, %c0_8] : memref<8x128xf32, #tpu.memory_space<vmem>>, vector<8x128xf32>
    tpu.vector_store %arg4[%c0_7, %c0_8], %11 {strides = array<i32>} : memref<8x128xf32, #tpu.memory_space<vmem>>, vector<8x128xf32>,
    %13 = vector.shape_cast %7 : vector<1x128xf32> to vector<1x128xf32>
    %14 = vector.broadcast %13 : vector<1x128xf32> to vector<8x128xf32>
    %c0_9 = arith.constant 0 : index
    %c0_10 = arith.constant 0 : index
    %15 = vector.load %arg5[%c0_9, %c0_10] : memref<8x128xf32, #tpu.memory_space<vmem>>, vector<8x128xf32>
    tpu.vector_store %arg5[%c0_9, %c0_10], %14 {strides = array<i32>} : memref<8x128xf32, #tpu.memory_space<vmem>>, vector<8x128xf32>,
    return
  }
  func.func @transform_0(%arg0: i32) -> (i32, i32) {
    %c0_i32 = arith.constant 0 : i32
    %c0_i32_0 = arith.constant 0 : i32
    return %arg0, %c0_i32 : i32, i32
  }
  func.func @transform_1(%arg0: i32) -> (i32, i32) {
    %c0_i32 = arith.constant 0 : i32
    %c0_i32_0 = arith.constant 0 : i32
    %c0_i32_1 = arith.constant 0 : i32
    return %c0_i32, %c0_i32_0 : i32, i32
  }
  func.func @transform_2(%arg0: i32) -> (i32, i32) {
    %c0_i32 = arith.constant 0 : i32
    %c0_i32_0 = arith.constant 0 : i32
    return %arg0, %c0_i32 : i32, i32
  }
  func.func @transform_3(%arg0: i32) -> (i32, i32) {
    %c0_i32 = arith.constant 0 : i32
    %c0_i32_0 = arith.constant 0 : i32
    return %arg0, %c0_i32 : i32, i32
  }
  func.func @transform_4(%arg0: i32) -> (i32, i32) {
    %c0_i32 = arith.constant 0 : i32
    %c0_i32_0 = arith.constant 0 : i32
    return %arg0, %c0_i32 : i32, i32
  }
}

module attributes {stable_mosaic.version = 11 : i64} {
  func.func @_bn_act_kernel(%arg0: i32, %arg1: memref<128x128xbf16, #tpu.memory_space<vmem>>, %arg2: memref<1x128xf32, #tpu.memory_space<vmem>>, %arg3: memref<1x128xf32, #tpu.memory_space<vmem>>, %arg4: memref<128x128xbf16, #tpu.memory_space<vmem>>) attributes {dimension_semantics = [#tpu.dimension_semantics<parallel>], iteration_bounds = array<i64: 2>, scalar_prefetch = 0 : i64, scratch_operands = 0 : i64, tpu.core_type = #tpu.core_type<tc>, window_params = [{transform_indices = @transform_0, window_bounds = array<i64: 128, 128>}, {pipeline_mode = #tpu.pipeline_mode<synchronous>, transform_indices = @transform_1, window_bounds = array<i64: 1, 128>}, {pipeline_mode = #tpu.pipeline_mode<synchronous>, transform_indices = @transform_2, window_bounds = array<i64: 1, 128>}, {transform_indices = @transform_3, window_bounds = array<i64: 128, 128>}]} {
    %c0 = arith.constant 0 : index
    %c0_0 = arith.constant 0 : index
    %0 = vector.load %arg1[%c0, %c0_0] : memref<128x128xbf16, #tpu.memory_space<vmem>>, vector<128x128xbf16>
    %1 = arith.extf %0 : vector<128x128xbf16> to vector<128x128xf32>
    %c0_1 = arith.constant 0 : index
    %c0_2 = arith.constant 0 : index
    %2 = vector.load %arg2[%c0_1, %c0_2] : memref<1x128xf32, #tpu.memory_space<vmem>>, vector<1x128xf32>
    %3 = vector.broadcast %2 : vector<1x128xf32> to vector<128x128xf32>
    %4 = arith.mulf %1, %3 : vector<128x128xf32>
    %c0_3 = arith.constant 0 : index
    %c0_4 = arith.constant 0 : index
    %5 = vector.load %arg3[%c0_3, %c0_4] : memref<1x128xf32, #tpu.memory_space<vmem>>, vector<1x128xf32>
    %6 = vector.broadcast %5 : vector<1x128xf32> to vector<128x128xf32>
    %7 = arith.addf %4, %6 : vector<128x128xf32>
    %cst = arith.constant 0.000000e+00 : f32
    %8 = vector.broadcast %cst : f32 to vector<128x128xf32>
    %9 = arith.cmpf oge, %7, %8 : vector<128x128xf32>
    %cst_5 = arith.constant 2.000000e-01 : f32
    %10 = vector.broadcast %cst_5 : f32 to vector<128x128xf32>
    %11 = arith.mulf %10, %7 : vector<128x128xf32>
    %12 = arith.select %9, %7, %11 : vector<128x128xi1>, vector<128x128xf32>
    %13 = arith.truncf %12 : vector<128x128xf32> to vector<128x128xbf16>
    %c0_6 = arith.constant 0 : index
    %c0_7 = arith.constant 0 : index
    %14 = vector.load %arg4[%c0_6, %c0_7] : memref<128x128xbf16, #tpu.memory_space<vmem>>, vector<128x128xbf16>
    tpu.vector_store %arg4[%c0_6, %c0_7], %13 {strides = array<i32>} : memref<128x128xbf16, #tpu.memory_space<vmem>>, vector<128x128xbf16>,
    return
  }
  func.func @transform_0(%arg0: i32) -> (i32, i32) {
    %c0_i32 = arith.constant 0 : i32
    %c0_i32_0 = arith.constant 0 : i32
    return %arg0, %c0_i32 : i32, i32
  }
  func.func @transform_1(%arg0: i32) -> (i32, i32) {
    %c0_i32 = arith.constant 0 : i32
    %c0_i32_0 = arith.constant 0 : i32
    %c0_i32_1 = arith.constant 0 : i32
    return %c0_i32, %c0_i32_0 : i32, i32
  }
  func.func @transform_2(%arg0: i32) -> (i32, i32) {
    %c0_i32 = arith.constant 0 : i32
    %c0_i32_0 = arith.constant 0 : i32
    %c0_i32_1 = arith.constant 0 : i32
    return %c0_i32, %c0_i32_0 : i32, i32
  }
  func.func @transform_3(%arg0: i32) -> (i32, i32) {
    %c0_i32 = arith.constant 0 : i32
    %c0_i32_0 = arith.constant 0 : i32
    return %arg0, %c0_i32 : i32, i32
  }
}

module attributes {stable_mosaic.version = 11 : i64} {
  func.func @_matmul_stats_kernel(%arg0: i32, %arg1: memref<32x128xbf16, #tpu.memory_space<vmem>>, %arg2: memref<128x128xbf16, #tpu.memory_space<vmem>>, %arg3: memref<32x128xbf16, #tpu.memory_space<vmem>>, %arg4: memref<8x128xf32, #tpu.memory_space<vmem>>, %arg5: memref<8x128xf32, #tpu.memory_space<vmem>>) attributes {dimension_semantics = [#tpu.dimension_semantics<parallel>], iteration_bounds = array<i64: 2>, scalar_prefetch = 0 : i64, scratch_operands = 0 : i64, tpu.core_type = #tpu.core_type<tc>, window_params = [{transform_indices = @transform_0, window_bounds = array<i64: 32, 128>}, {pipeline_mode = #tpu.pipeline_mode<synchronous>, transform_indices = @transform_1, window_bounds = array<i64: 128, 128>}, {transform_indices = @transform_2, window_bounds = array<i64: 32, 128>}, {transform_indices = @transform_3, window_bounds = array<i64: 8, 128>}, {transform_indices = @transform_4, window_bounds = array<i64: 8, 128>}]} {
    %c0 = arith.constant 0 : index
    %c0_0 = arith.constant 0 : index
    %0 = vector.load %arg1[%c0, %c0_0] : memref<32x128xbf16, #tpu.memory_space<vmem>>, vector<32x128xbf16>
    %c0_1 = arith.constant 0 : index
    %c0_2 = arith.constant 0 : index
    %1 = vector.load %arg2[%c0_1, %c0_2] : memref<128x128xbf16, #tpu.memory_space<vmem>>, vector<128x128xbf16>
    %cst = arith.constant dense<0.000000e+00> : vector<32x128xf32>
    %2 = tpu.matmul %0, %1, %cst {dimension_numbers = #tpu.dot_dimension_numbers<[1], [0], [0], [1], [0, 0, 1, 1], [], []>} : vector<32x128xbf16>, vector<128x128xbf16>, vector<32x128xf32> -> vector<32x128xf32>
    %cst_3 = arith.constant dense<0.000000e+00> : vector<128xf32>
    %3 = vector.multi_reduction <add>, %2, %cst_3 [0] : vector<32x128xf32> to vector<128xf32>
    %4 = vector.shape_cast %3 : vector<128xf32> to vector<1x128xf32>
    %5 = arith.mulf %2, %2 : vector<32x128xf32>
    %cst_4 = arith.constant dense<0.000000e+00> : vector<128xf32>
    %6 = vector.multi_reduction <add>, %5, %cst_4 [0] : vector<32x128xf32> to vector<128xf32>
    %7 = vector.shape_cast %6 : vector<128xf32> to vector<1x128xf32>
    %8 = arith.truncf %2 : vector<32x128xf32> to vector<32x128xbf16>
    %c0_5 = arith.constant 0 : index
    %c0_6 = arith.constant 0 : index
    %9 = vector.load %arg3[%c0_5, %c0_6] : memref<32x128xbf16, #tpu.memory_space<vmem>>, vector<32x128xbf16>
    tpu.vector_store %arg3[%c0_5, %c0_6], %8 {strides = array<i32>} : memref<32x128xbf16, #tpu.memory_space<vmem>>, vector<32x128xbf16>,
    %10 = vector.shape_cast %4 : vector<1x128xf32> to vector<1x128xf32>
    %11 = vector.broadcast %10 : vector<1x128xf32> to vector<8x128xf32>
    %c0_7 = arith.constant 0 : index
    %c0_8 = arith.constant 0 : index
    %12 = vector.load %arg4[%c0_7, %c0_8] : memref<8x128xf32, #tpu.memory_space<vmem>>, vector<8x128xf32>
    tpu.vector_store %arg4[%c0_7, %c0_8], %11 {strides = array<i32>} : memref<8x128xf32, #tpu.memory_space<vmem>>, vector<8x128xf32>,
    %13 = vector.shape_cast %7 : vector<1x128xf32> to vector<1x128xf32>
    %14 = vector.broadcast %13 : vector<1x128xf32> to vector<8x128xf32>
    %c0_9 = arith.constant 0 : index
    %c0_10 = arith.constant 0 : index
    %15 = vector.load %arg5[%c0_9, %c0_10] : memref<8x128xf32, #tpu.memory_space<vmem>>, vector<8x128xf32>
    tpu.vector_store %arg5[%c0_9, %c0_10], %14 {strides = array<i32>} : memref<8x128xf32, #tpu.memory_space<vmem>>, vector<8x128xf32>,
    return
  }
  func.func @transform_0(%arg0: i32) -> (i32, i32) {
    %c0_i32 = arith.constant 0 : i32
    %c0_i32_0 = arith.constant 0 : i32
    return %arg0, %c0_i32 : i32, i32
  }
  func.func @transform_1(%arg0: i32) -> (i32, i32) {
    %c0_i32 = arith.constant 0 : i32
    %c0_i32_0 = arith.constant 0 : i32
    %c0_i32_1 = arith.constant 0 : i32
    return %c0_i32, %c0_i32_0 : i32, i32
  }
  func.func @transform_2(%arg0: i32) -> (i32, i32) {
    %c0_i32 = arith.constant 0 : i32
    %c0_i32_0 = arith.constant 0 : i32
    return %arg0, %c0_i32 : i32, i32
  }
  func.func @transform_3(%arg0: i32) -> (i32, i32) {
    %c0_i32 = arith.constant 0 : i32
    %c0_i32_0 = arith.constant 0 : i32
    return %arg0, %c0_i32 : i32, i32
  }
  func.func @transform_4(%arg0: i32) -> (i32, i32) {
    %c0_i32 = arith.constant 0 : i32
    %c0_i32_0 = arith.constant 0 : i32
    return %arg0, %c0_i32 : i32, i32
  }
}

module attributes {stable_mosaic.version = 11 : i64} {
  func.func @_bn_act_kernel(%arg0: i32, %arg1: memref<32x128xbf16, #tpu.memory_space<vmem>>, %arg2: memref<1x128xf32, #tpu.memory_space<vmem>>, %arg3: memref<1x128xf32, #tpu.memory_space<vmem>>, %arg4: memref<32x128xbf16, #tpu.memory_space<vmem>>) attributes {dimension_semantics = [#tpu.dimension_semantics<parallel>], iteration_bounds = array<i64: 2>, scalar_prefetch = 0 : i64, scratch_operands = 0 : i64, tpu.core_type = #tpu.core_type<tc>, window_params = [{transform_indices = @transform_0, window_bounds = array<i64: 32, 128>}, {pipeline_mode = #tpu.pipeline_mode<synchronous>, transform_indices = @transform_1, window_bounds = array<i64: 1, 128>}, {pipeline_mode = #tpu.pipeline_mode<synchronous>, transform_indices = @transform_2, window_bounds = array<i64: 1, 128>}, {transform_indices = @transform_3, window_bounds = array<i64: 32, 128>}]} {
    %c0 = arith.constant 0 : index
    %c0_0 = arith.constant 0 : index
    %0 = vector.load %arg1[%c0, %c0_0] : memref<32x128xbf16, #tpu.memory_space<vmem>>, vector<32x128xbf16>
    %1 = arith.extf %0 : vector<32x128xbf16> to vector<32x128xf32>
    %c0_1 = arith.constant 0 : index
    %c0_2 = arith.constant 0 : index
    %2 = vector.load %arg2[%c0_1, %c0_2] : memref<1x128xf32, #tpu.memory_space<vmem>>, vector<1x128xf32>
    %3 = vector.broadcast %2 : vector<1x128xf32> to vector<32x128xf32>
    %4 = arith.mulf %1, %3 : vector<32x128xf32>
    %c0_3 = arith.constant 0 : index
    %c0_4 = arith.constant 0 : index
    %5 = vector.load %arg3[%c0_3, %c0_4] : memref<1x128xf32, #tpu.memory_space<vmem>>, vector<1x128xf32>
    %6 = vector.broadcast %5 : vector<1x128xf32> to vector<32x128xf32>
    %7 = arith.addf %4, %6 : vector<32x128xf32>
    %cst = arith.constant 0.000000e+00 : f32
    %8 = vector.broadcast %cst : f32 to vector<32x128xf32>
    %9 = arith.cmpf oge, %7, %8 : vector<32x128xf32>
    %cst_5 = arith.constant 2.000000e-01 : f32
    %10 = vector.broadcast %cst_5 : f32 to vector<32x128xf32>
    %11 = arith.mulf %10, %7 : vector<32x128xf32>
    %12 = arith.select %9, %7, %11 : vector<32x128xi1>, vector<32x128xf32>
    %13 = arith.truncf %12 : vector<32x128xf32> to vector<32x128xbf16>
    %c0_6 = arith.constant 0 : index
    %c0_7 = arith.constant 0 : index
    %14 = vector.load %arg4[%c0_6, %c0_7] : memref<32x128xbf16, #tpu.memory_space<vmem>>, vector<32x128xbf16>
    tpu.vector_store %arg4[%c0_6, %c0_7], %13 {strides = array<i32>} : memref<32x128xbf16, #tpu.memory_space<vmem>>, vector<32x128xbf16>,
    return
  }
  func.func @transform_0(%arg0: i32) -> (i32, i32) {
    %c0_i32 = arith.constant 0 : i32
    %c0_i32_0 = arith.constant 0 : i32
    return %arg0, %c0_i32 : i32, i32
  }
  func.func @transform_1(%arg0: i32) -> (i32, i32) {
    %c0_i32 = arith.constant 0 : i32
    %c0_i32_0 = arith.constant 0 : i32
    %c0_i32_1 = arith.constant 0 : i32
    return %c0_i32, %c0_i32_0 : i32, i32
  }
  func.func @transform_2(%arg0: i32) -> (i32, i32) {
    %c0_i32 = arith.constant 0 : i32
    %c0_i32_0 = arith.constant 0 : i32
    %c0_i32_1 = arith.constant 0 : i32
    return %c0_i32, %c0_i32_0 : i32, i32
  }
  func.func @transform_3(%arg0: i32) -> (i32, i32) {
    %c0_i32 = arith.constant 0 : i32
    %c0_i32_0 = arith.constant 0 : i32
    return %arg0, %c0_i32 : i32, i32
  }
}

module attributes {stable_mosaic.version = 11 : i64} {
  func.func @_matmul_stats_kernel(%arg0: i32, %arg1: memref<8x256xbf16, #tpu.memory_space<vmem>>, %arg2: memref<256x128xbf16, #tpu.memory_space<vmem>>, %arg3: memref<8x128xbf16, #tpu.memory_space<vmem>>, %arg4: memref<8x128xf32, #tpu.memory_space<vmem>>, %arg5: memref<8x128xf32, #tpu.memory_space<vmem>>) attributes {dimension_semantics = [#tpu.dimension_semantics<parallel>], iteration_bounds = array<i64: 2>, scalar_prefetch = 0 : i64, scratch_operands = 0 : i64, tpu.core_type = #tpu.core_type<tc>, window_params = [{transform_indices = @transform_0, window_bounds = array<i64: 8, 256>}, {pipeline_mode = #tpu.pipeline_mode<synchronous>, transform_indices = @transform_1, window_bounds = array<i64: 256, 128>}, {transform_indices = @transform_2, window_bounds = array<i64: 8, 128>}, {transform_indices = @transform_3, window_bounds = array<i64: 8, 128>}, {transform_indices = @transform_4, window_bounds = array<i64: 8, 128>}]} {
    %c0 = arith.constant 0 : index
    %c0_0 = arith.constant 0 : index
    %0 = vector.load %arg1[%c0, %c0_0] : memref<8x256xbf16, #tpu.memory_space<vmem>>, vector<8x256xbf16>
    %c0_1 = arith.constant 0 : index
    %c0_2 = arith.constant 0 : index
    %1 = vector.load %arg2[%c0_1, %c0_2] : memref<256x128xbf16, #tpu.memory_space<vmem>>, vector<256x128xbf16>
    %cst = arith.constant dense<0.000000e+00> : vector<8x128xf32>
    %2 = tpu.matmul %0, %1, %cst {dimension_numbers = #tpu.dot_dimension_numbers<[1], [0], [0], [1], [0, 0, 1, 1], [], []>} : vector<8x256xbf16>, vector<256x128xbf16>, vector<8x128xf32> -> vector<8x128xf32>
    %cst_3 = arith.constant dense<0.000000e+00> : vector<128xf32>
    %3 = vector.multi_reduction <add>, %2, %cst_3 [0] : vector<8x128xf32> to vector<128xf32>
    %4 = vector.shape_cast %3 : vector<128xf32> to vector<1x128xf32>
    %5 = arith.mulf %2, %2 : vector<8x128xf32>
    %cst_4 = arith.constant dense<0.000000e+00> : vector<128xf32>
    %6 = vector.multi_reduction <add>, %5, %cst_4 [0] : vector<8x128xf32> to vector<128xf32>
    %7 = vector.shape_cast %6 : vector<128xf32> to vector<1x128xf32>
    %8 = arith.truncf %2 : vector<8x128xf32> to vector<8x128xbf16>
    %c0_5 = arith.constant 0 : index
    %c0_6 = arith.constant 0 : index
    %9 = vector.load %arg3[%c0_5, %c0_6] : memref<8x128xbf16, #tpu.memory_space<vmem>>, vector<8x128xbf16>
    tpu.vector_store %arg3[%c0_5, %c0_6], %8 {strides = array<i32>} : memref<8x128xbf16, #tpu.memory_space<vmem>>, vector<8x128xbf16>,
    %10 = vector.shape_cast %4 : vector<1x128xf32> to vector<1x128xf32>
    %11 = vector.broadcast %10 : vector<1x128xf32> to vector<8x128xf32>
    %c0_7 = arith.constant 0 : index
    %c0_8 = arith.constant 0 : index
    %12 = vector.load %arg4[%c0_7, %c0_8] : memref<8x128xf32, #tpu.memory_space<vmem>>, vector<8x128xf32>
    tpu.vector_store %arg4[%c0_7, %c0_8], %11 {strides = array<i32>} : memref<8x128xf32, #tpu.memory_space<vmem>>, vector<8x128xf32>,
    %13 = vector.shape_cast %7 : vector<1x128xf32> to vector<1x128xf32>
    %14 = vector.broadcast %13 : vector<1x128xf32> to vector<8x128xf32>
    %c0_9 = arith.constant 0 : index
    %c0_10 = arith.constant 0 : index
    %15 = vector.load %arg5[%c0_9, %c0_10] : memref<8x128xf32, #tpu.memory_space<vmem>>, vector<8x128xf32>
    tpu.vector_store %arg5[%c0_9, %c0_10], %14 {strides = array<i32>} : memref<8x128xf32, #tpu.memory_space<vmem>>, vector<8x128xf32>,
    return
  }
  func.func @transform_0(%arg0: i32) -> (i32, i32) {
    %c0_i32 = arith.constant 0 : i32
    %c0_i32_0 = arith.constant 0 : i32
    return %arg0, %c0_i32 : i32, i32
  }
  func.func @transform_1(%arg0: i32) -> (i32, i32) {
    %c0_i32 = arith.constant 0 : i32
    %c0_i32_0 = arith.constant 0 : i32
    %c0_i32_1 = arith.constant 0 : i32
    return %c0_i32, %c0_i32_0 : i32, i32
  }
  func.func @transform_2(%arg0: i32) -> (i32, i32) {
    %c0_i32 = arith.constant 0 : i32
    %c0_i32_0 = arith.constant 0 : i32
    return %arg0, %c0_i32 : i32, i32
  }
  func.func @transform_3(%arg0: i32) -> (i32, i32) {
    %c0_i32 = arith.constant 0 : i32
    %c0_i32_0 = arith.constant 0 : i32
    return %arg0, %c0_i32 : i32, i32
  }
  func.func @transform_4(%arg0: i32) -> (i32, i32) {
    %c0_i32 = arith.constant 0 : i32
    %c0_i32_0 = arith.constant 0 : i32
    return %arg0, %c0_i32 : i32, i32
  }
}

module attributes {stable_mosaic.version = 11 : i64} {
  func.func @_bn_act_kernel(%arg0: i32, %arg1: memref<8x128xbf16, #tpu.memory_space<vmem>>, %arg2: memref<1x128xf32, #tpu.memory_space<vmem>>, %arg3: memref<1x128xf32, #tpu.memory_space<vmem>>, %arg4: memref<8x128xbf16, #tpu.memory_space<vmem>>) attributes {dimension_semantics = [#tpu.dimension_semantics<parallel>], iteration_bounds = array<i64: 2>, scalar_prefetch = 0 : i64, scratch_operands = 0 : i64, tpu.core_type = #tpu.core_type<tc>, window_params = [{transform_indices = @transform_0, window_bounds = array<i64: 8, 128>}, {pipeline_mode = #tpu.pipeline_mode<synchronous>, transform_indices = @transform_1, window_bounds = array<i64: 1, 128>}, {pipeline_mode = #tpu.pipeline_mode<synchronous>, transform_indices = @transform_2, window_bounds = array<i64: 1, 128>}, {transform_indices = @transform_3, window_bounds = array<i64: 8, 128>}]} {
    %c0 = arith.constant 0 : index
    %c0_0 = arith.constant 0 : index
    %0 = vector.load %arg1[%c0, %c0_0] : memref<8x128xbf16, #tpu.memory_space<vmem>>, vector<8x128xbf16>
    %1 = arith.extf %0 : vector<8x128xbf16> to vector<8x128xf32>
    %c0_1 = arith.constant 0 : index
    %c0_2 = arith.constant 0 : index
    %2 = vector.load %arg2[%c0_1, %c0_2] : memref<1x128xf32, #tpu.memory_space<vmem>>, vector<1x128xf32>
    %3 = vector.broadcast %2 : vector<1x128xf32> to vector<8x128xf32>
    %4 = arith.mulf %1, %3 : vector<8x128xf32>
    %c0_3 = arith.constant 0 : index
    %c0_4 = arith.constant 0 : index
    %5 = vector.load %arg3[%c0_3, %c0_4] : memref<1x128xf32, #tpu.memory_space<vmem>>, vector<1x128xf32>
    %6 = vector.broadcast %5 : vector<1x128xf32> to vector<8x128xf32>
    %7 = arith.addf %4, %6 : vector<8x128xf32>
    %cst = arith.constant 0.000000e+00 : f32
    %8 = vector.broadcast %cst : f32 to vector<8x128xf32>
    %9 = arith.cmpf oge, %7, %8 : vector<8x128xf32>
    %cst_5 = arith.constant 2.000000e-01 : f32
    %10 = vector.broadcast %cst_5 : f32 to vector<8x128xf32>
    %11 = arith.mulf %10, %7 : vector<8x128xf32>
    %12 = arith.select %9, %7, %11 : vector<8x128xi1>, vector<8x128xf32>
    %13 = arith.truncf %12 : vector<8x128xf32> to vector<8x128xbf16>
    %c0_6 = arith.constant 0 : index
    %c0_7 = arith.constant 0 : index
    %14 = vector.load %arg4[%c0_6, %c0_7] : memref<8x128xbf16, #tpu.memory_space<vmem>>, vector<8x128xbf16>
    tpu.vector_store %arg4[%c0_6, %c0_7], %13 {strides = array<i32>} : memref<8x128xbf16, #tpu.memory_space<vmem>>, vector<8x128xbf16>,
    return
  }
  func.func @transform_0(%arg0: i32) -> (i32, i32) {
    %c0_i32 = arith.constant 0 : i32
    %c0_i32_0 = arith.constant 0 : i32
    return %arg0, %c0_i32 : i32, i32
  }
  func.func @transform_1(%arg0: i32) -> (i32, i32) {
    %c0_i32 = arith.constant 0 : i32
    %c0_i32_0 = arith.constant 0 : i32
    %c0_i32_1 = arith.constant 0 : i32
    return %c0_i32, %c0_i32_0 : i32, i32
  }
  func.func @transform_2(%arg0: i32) -> (i32, i32) {
    %c0_i32 = arith.constant 0 : i32
    %c0_i32_0 = arith.constant 0 : i32
    %c0_i32_1 = arith.constant 0 : i32
    return %c0_i32, %c0_i32_0 : i32, i32
  }
  func.func @transform_3(%arg0: i32) -> (i32, i32) {
    %c0_i32 = arith.constant 0 : i32
    %c0_i32_0 = arith.constant 0 : i32
    return %arg0, %c0_i32 : i32, i32
  }
}

module attributes {stable_mosaic.version = 11 : i64} {
  func.func @_enc_head_kernel(%arg0: memref<8x256xbf16, #tpu.memory_space<vmem>>, %arg1: memref<256x256xbf16, #tpu.memory_space<vmem>>, %arg2: memref<1x256xf32, #tpu.memory_space<vmem>>, %arg3: memref<8x128xf32, #tpu.memory_space<vmem>>, %arg4: memref<8x128xf32, #tpu.memory_space<vmem>>, %arg5: memref<8x128xf32, #tpu.memory_space<vmem>>, %arg6: memref<8x128xf32, #tpu.memory_space<vmem>>) attributes {dimension_semantics = [], scalar_prefetch = 0 : i64, scratch_operands = 0 : i64, tpu.core_type = #tpu.core_type<tc>} {
    %c0 = arith.constant 0 : index
    %c0_0 = arith.constant 0 : index
    %0 = vector.load %arg0[%c0, %c0_0] : memref<8x256xbf16, #tpu.memory_space<vmem>>, vector<8x256xbf16>
    %c0_1 = arith.constant 0 : index
    %c0_2 = arith.constant 0 : index
    %1 = vector.load %arg1[%c0_1, %c0_2] : memref<256x256xbf16, #tpu.memory_space<vmem>>, vector<256x256xbf16>
    %cst = arith.constant dense<0.000000e+00> : vector<8x256xf32>
    %2 = tpu.matmul %0, %1, %cst {dimension_numbers = #tpu.dot_dimension_numbers<[1], [0], [0], [1], [0, 0, 1, 1], [], []>} : vector<8x256xbf16>, vector<256x256xbf16>, vector<8x256xf32> -> vector<8x256xf32>
    %c0_3 = arith.constant 0 : index
    %c0_4 = arith.constant 0 : index
    %3 = vector.load %arg2[%c0_3, %c0_4] : memref<1x256xf32, #tpu.memory_space<vmem>>, vector<1x256xf32>
    %4 = vector.broadcast %3 : vector<1x256xf32> to vector<8x256xf32>
    %5 = arith.addf %2, %4 : vector<8x256xf32>
    %6 = vector.extract_strided_slice %5 {offsets = [0, 0], sizes = [8, 128], strides = [1, 1]} : vector<8x256xf32> to vector<8x128xf32>
    %7 = vector.extract_strided_slice %5 {offsets = [0, 128], sizes = [8, 128], strides = [1, 1]} : vector<8x256xf32> to vector<8x128xf32>
    %c0_5 = arith.constant 0 : index
    %c0_6 = arith.constant 0 : index
    %8 = vector.load %arg3[%c0_5, %c0_6] : memref<8x128xf32, #tpu.memory_space<vmem>>, vector<8x128xf32>
    %cst_7 = arith.constant 5.000000e-01 : f32
    %9 = vector.broadcast %cst_7 : f32 to vector<8x128xf32>
    %10 = arith.mulf %9, %7 : vector<8x128xf32>
    %11 = math.exp %10 : vector<8x128xf32>
    %12 = arith.mulf %8, %11 : vector<8x128xf32>
    %13 = arith.addf %6, %12 : vector<8x128xf32>
    %c0_8 = arith.constant 0 : index
    %c0_9 = arith.constant 0 : index
    %14 = vector.load %arg4[%c0_8, %c0_9] : memref<8x128xf32, #tpu.memory_space<vmem>>, vector<8x128xf32>
    tpu.vector_store %arg4[%c0_8, %c0_9], %6 {strides = array<i32>} : memref<8x128xf32, #tpu.memory_space<vmem>>, vector<8x128xf32>,
    %c0_10 = arith.constant 0 : index
    %c0_11 = arith.constant 0 : index
    %15 = vector.load %arg5[%c0_10, %c0_11] : memref<8x128xf32, #tpu.memory_space<vmem>>, vector<8x128xf32>
    tpu.vector_store %arg5[%c0_10, %c0_11], %7 {strides = array<i32>} : memref<8x128xf32, #tpu.memory_space<vmem>>, vector<8x128xf32>,
    %c0_12 = arith.constant 0 : index
    %c0_13 = arith.constant 0 : index
    %16 = vector.load %arg6[%c0_12, %c0_13] : memref<8x128xf32, #tpu.memory_space<vmem>>, vector<8x128xf32>
    tpu.vector_store %arg6[%c0_12, %c0_13], %13 {strides = array<i32>} : memref<8x128xf32, #tpu.memory_space<vmem>>, vector<8x128xf32>,
    return
  }
}

module attributes {stable_mosaic.version = 11 : i64} {
  func.func @_linear_kernel(%arg0: memref<8x128xbf16, #tpu.memory_space<vmem>>, %arg1: memref<128x128xbf16, #tpu.memory_space<vmem>>, %arg2: memref<1x128xf32, #tpu.memory_space<vmem>>, %arg3: memref<8x128xf32, #tpu.memory_space<vmem>>) attributes {dimension_semantics = [], scalar_prefetch = 0 : i64, scratch_operands = 0 : i64, tpu.core_type = #tpu.core_type<tc>} {
    %c0 = arith.constant 0 : index
    %c0_0 = arith.constant 0 : index
    %0 = vector.load %arg0[%c0, %c0_0] : memref<8x128xbf16, #tpu.memory_space<vmem>>, vector<8x128xbf16>
    %c0_1 = arith.constant 0 : index
    %c0_2 = arith.constant 0 : index
    %1 = vector.load %arg1[%c0_1, %c0_2] : memref<128x128xbf16, #tpu.memory_space<vmem>>, vector<128x128xbf16>
    %cst = arith.constant dense<0.000000e+00> : vector<8x128xf32>
    %2 = tpu.matmul %0, %1, %cst {dimension_numbers = #tpu.dot_dimension_numbers<[1], [0], [0], [1], [0, 0, 1, 1], [], []>} : vector<8x128xbf16>, vector<128x128xbf16>, vector<8x128xf32> -> vector<8x128xf32>
    %c0_3 = arith.constant 0 : index
    %c0_4 = arith.constant 0 : index
    %3 = vector.load %arg2[%c0_3, %c0_4] : memref<1x128xf32, #tpu.memory_space<vmem>>, vector<1x128xf32>
    %4 = vector.broadcast %3 : vector<1x128xf32> to vector<8x128xf32>
    %5 = arith.addf %2, %4 : vector<8x128xf32>
    %c0_5 = arith.constant 0 : index
    %c0_6 = arith.constant 0 : index
    %6 = vector.load %arg3[%c0_5, %c0_6] : memref<8x128xf32, #tpu.memory_space<vmem>>, vector<8x128xf32>
    tpu.vector_store %arg3[%c0_5, %c0_6], %5 {strides = array<i32>} : memref<8x128xf32, #tpu.memory_space<vmem>>, vector<8x128xf32>,
    return
  }
}

module attributes {stable_mosaic.version = 11 : i64} {
  func.func @_matmul_stats_kernel(%arg0: i32, %arg1: memref<32x384xbf16, #tpu.memory_space<vmem>>, %arg2: memref<384x128xbf16, #tpu.memory_space<vmem>>, %arg3: memref<32x128xbf16, #tpu.memory_space<vmem>>, %arg4: memref<8x128xf32, #tpu.memory_space<vmem>>, %arg5: memref<8x128xf32, #tpu.memory_space<vmem>>) attributes {dimension_semantics = [#tpu.dimension_semantics<parallel>], iteration_bounds = array<i64: 2>, scalar_prefetch = 0 : i64, scratch_operands = 0 : i64, tpu.core_type = #tpu.core_type<tc>, window_params = [{transform_indices = @transform_0, window_bounds = array<i64: 32, 384>}, {pipeline_mode = #tpu.pipeline_mode<synchronous>, transform_indices = @transform_1, window_bounds = array<i64: 384, 128>}, {transform_indices = @transform_2, window_bounds = array<i64: 32, 128>}, {transform_indices = @transform_3, window_bounds = array<i64: 8, 128>}, {transform_indices = @transform_4, window_bounds = array<i64: 8, 128>}]} {
    %c0 = arith.constant 0 : index
    %c0_0 = arith.constant 0 : index
    %0 = vector.load %arg1[%c0, %c0_0] : memref<32x384xbf16, #tpu.memory_space<vmem>>, vector<32x384xbf16>
    %c0_1 = arith.constant 0 : index
    %c0_2 = arith.constant 0 : index
    %1 = vector.load %arg2[%c0_1, %c0_2] : memref<384x128xbf16, #tpu.memory_space<vmem>>, vector<384x128xbf16>
    %cst = arith.constant dense<0.000000e+00> : vector<32x128xf32>
    %2 = tpu.matmul %0, %1, %cst {dimension_numbers = #tpu.dot_dimension_numbers<[1], [0], [0], [1], [0, 0, 1, 1], [], []>} : vector<32x384xbf16>, vector<384x128xbf16>, vector<32x128xf32> -> vector<32x128xf32>
    %cst_3 = arith.constant dense<0.000000e+00> : vector<128xf32>
    %3 = vector.multi_reduction <add>, %2, %cst_3 [0] : vector<32x128xf32> to vector<128xf32>
    %4 = vector.shape_cast %3 : vector<128xf32> to vector<1x128xf32>
    %5 = arith.mulf %2, %2 : vector<32x128xf32>
    %cst_4 = arith.constant dense<0.000000e+00> : vector<128xf32>
    %6 = vector.multi_reduction <add>, %5, %cst_4 [0] : vector<32x128xf32> to vector<128xf32>
    %7 = vector.shape_cast %6 : vector<128xf32> to vector<1x128xf32>
    %8 = arith.truncf %2 : vector<32x128xf32> to vector<32x128xbf16>
    %c0_5 = arith.constant 0 : index
    %c0_6 = arith.constant 0 : index
    %9 = vector.load %arg3[%c0_5, %c0_6] : memref<32x128xbf16, #tpu.memory_space<vmem>>, vector<32x128xbf16>
    tpu.vector_store %arg3[%c0_5, %c0_6], %8 {strides = array<i32>} : memref<32x128xbf16, #tpu.memory_space<vmem>>, vector<32x128xbf16>,
    %10 = vector.shape_cast %4 : vector<1x128xf32> to vector<1x128xf32>
    %11 = vector.broadcast %10 : vector<1x128xf32> to vector<8x128xf32>
    %c0_7 = arith.constant 0 : index
    %c0_8 = arith.constant 0 : index
    %12 = vector.load %arg4[%c0_7, %c0_8] : memref<8x128xf32, #tpu.memory_space<vmem>>, vector<8x128xf32>
    tpu.vector_store %arg4[%c0_7, %c0_8], %11 {strides = array<i32>} : memref<8x128xf32, #tpu.memory_space<vmem>>, vector<8x128xf32>,
    %13 = vector.shape_cast %7 : vector<1x128xf32> to vector<1x128xf32>
    %14 = vector.broadcast %13 : vector<1x128xf32> to vector<8x128xf32>
    %c0_9 = arith.constant 0 : index
    %c0_10 = arith.constant 0 : index
    %15 = vector.load %arg5[%c0_9, %c0_10] : memref<8x128xf32, #tpu.memory_space<vmem>>, vector<8x128xf32>
    tpu.vector_store %arg5[%c0_9, %c0_10], %14 {strides = array<i32>} : memref<8x128xf32, #tpu.memory_space<vmem>>, vector<8x128xf32>,
    return
  }
  func.func @transform_0(%arg0: i32) -> (i32, i32) {
    %c0_i32 = arith.constant 0 : i32
    %c0_i32_0 = arith.constant 0 : i32
    return %arg0, %c0_i32 : i32, i32
  }
  func.func @transform_1(%arg0: i32) -> (i32, i32) {
    %c0_i32 = arith.constant 0 : i32
    %c0_i32_0 = arith.constant 0 : i32
    %c0_i32_1 = arith.constant 0 : i32
    return %c0_i32, %c0_i32_0 : i32, i32
  }
  func.func @transform_2(%arg0: i32) -> (i32, i32) {
    %c0_i32 = arith.constant 0 : i32
    %c0_i32_0 = arith.constant 0 : i32
    return %arg0, %c0_i32 : i32, i32
  }
  func.func @transform_3(%arg0: i32) -> (i32, i32) {
    %c0_i32 = arith.constant 0 : i32
    %c0_i32_0 = arith.constant 0 : i32
    return %arg0, %c0_i32 : i32, i32
  }
  func.func @transform_4(%arg0: i32) -> (i32, i32) {
    %c0_i32 = arith.constant 0 : i32
    %c0_i32_0 = arith.constant 0 : i32
    return %arg0, %c0_i32 : i32, i32
  }
}

module attributes {stable_mosaic.version = 11 : i64} {
  func.func @_matmul_stats_kernel(%arg0: i32, %arg1: memref<128x256xbf16, #tpu.memory_space<vmem>>, %arg2: memref<256x128xbf16, #tpu.memory_space<vmem>>, %arg3: memref<128x128xbf16, #tpu.memory_space<vmem>>, %arg4: memref<8x128xf32, #tpu.memory_space<vmem>>, %arg5: memref<8x128xf32, #tpu.memory_space<vmem>>) attributes {dimension_semantics = [#tpu.dimension_semantics<parallel>], iteration_bounds = array<i64: 2>, scalar_prefetch = 0 : i64, scratch_operands = 0 : i64, tpu.core_type = #tpu.core_type<tc>, window_params = [{transform_indices = @transform_0, window_bounds = array<i64: 128, 256>}, {pipeline_mode = #tpu.pipeline_mode<synchronous>, transform_indices = @transform_1, window_bounds = array<i64: 256, 128>}, {transform_indices = @transform_2, window_bounds = array<i64: 128, 128>}, {transform_indices = @transform_3, window_bounds = array<i64: 8, 128>}, {transform_indices = @transform_4, window_bounds = array<i64: 8, 128>}]} {
    %c0 = arith.constant 0 : index
    %c0_0 = arith.constant 0 : index
    %0 = vector.load %arg1[%c0, %c0_0] : memref<128x256xbf16, #tpu.memory_space<vmem>>, vector<128x256xbf16>
    %c0_1 = arith.constant 0 : index
    %c0_2 = arith.constant 0 : index
    %1 = vector.load %arg2[%c0_1, %c0_2] : memref<256x128xbf16, #tpu.memory_space<vmem>>, vector<256x128xbf16>
    %cst = arith.constant dense<0.000000e+00> : vector<128x128xf32>
    %2 = tpu.matmul %0, %1, %cst {dimension_numbers = #tpu.dot_dimension_numbers<[1], [0], [0], [1], [0, 0, 1, 1], [], []>} : vector<128x256xbf16>, vector<256x128xbf16>, vector<128x128xf32> -> vector<128x128xf32>
    %cst_3 = arith.constant dense<0.000000e+00> : vector<128xf32>
    %3 = vector.multi_reduction <add>, %2, %cst_3 [0] : vector<128x128xf32> to vector<128xf32>
    %4 = vector.shape_cast %3 : vector<128xf32> to vector<1x128xf32>
    %5 = arith.mulf %2, %2 : vector<128x128xf32>
    %cst_4 = arith.constant dense<0.000000e+00> : vector<128xf32>
    %6 = vector.multi_reduction <add>, %5, %cst_4 [0] : vector<128x128xf32> to vector<128xf32>
    %7 = vector.shape_cast %6 : vector<128xf32> to vector<1x128xf32>
    %8 = arith.truncf %2 : vector<128x128xf32> to vector<128x128xbf16>
    %c0_5 = arith.constant 0 : index
    %c0_6 = arith.constant 0 : index
    %9 = vector.load %arg3[%c0_5, %c0_6] : memref<128x128xbf16, #tpu.memory_space<vmem>>, vector<128x128xbf16>
    tpu.vector_store %arg3[%c0_5, %c0_6], %8 {strides = array<i32>} : memref<128x128xbf16, #tpu.memory_space<vmem>>, vector<128x128xbf16>,
    %10 = vector.shape_cast %4 : vector<1x128xf32> to vector<1x128xf32>
    %11 = vector.broadcast %10 : vector<1x128xf32> to vector<8x128xf32>
    %c0_7 = arith.constant 0 : index
    %c0_8 = arith.constant 0 : index
    %12 = vector.load %arg4[%c0_7, %c0_8] : memref<8x128xf32, #tpu.memory_space<vmem>>, vector<8x128xf32>
    tpu.vector_store %arg4[%c0_7, %c0_8], %11 {strides = array<i32>} : memref<8x128xf32, #tpu.memory_space<vmem>>, vector<8x128xf32>,
    %13 = vector.shape_cast %7 : vector<1x128xf32> to vector<1x128xf32>
    %14 = vector.broadcast %13 : vector<1x128xf32> to vector<8x128xf32>
    %c0_9 = arith.constant 0 : index
    %c0_10 = arith.constant 0 : index
    %15 = vector.load %arg5[%c0_9, %c0_10] : memref<8x128xf32, #tpu.memory_space<vmem>>, vector<8x128xf32>
    tpu.vector_store %arg5[%c0_9, %c0_10], %14 {strides = array<i32>} : memref<8x128xf32, #tpu.memory_space<vmem>>, vector<8x128xf32>,
    return
  }
  func.func @transform_0(%arg0: i32) -> (i32, i32) {
    %c0_i32 = arith.constant 0 : i32
    %c0_i32_0 = arith.constant 0 : i32
    return %arg0, %c0_i32 : i32, i32
  }
  func.func @transform_1(%arg0: i32) -> (i32, i32) {
    %c0_i32 = arith.constant 0 : i32
    %c0_i32_0 = arith.constant 0 : i32
    %c0_i32_1 = arith.constant 0 : i32
    return %c0_i32, %c0_i32_0 : i32, i32
  }
  func.func @transform_2(%arg0: i32) -> (i32, i32) {
    %c0_i32 = arith.constant 0 : i32
    %c0_i32_0 = arith.constant 0 : i32
    return %arg0, %c0_i32 : i32, i32
  }
  func.func @transform_3(%arg0: i32) -> (i32, i32) {
    %c0_i32 = arith.constant 0 : i32
    %c0_i32_0 = arith.constant 0 : i32
    return %arg0, %c0_i32 : i32, i32
  }
  func.func @transform_4(%arg0: i32) -> (i32, i32) {
    %c0_i32 = arith.constant 0 : i32
    %c0_i32_0 = arith.constant 0 : i32
    return %arg0, %c0_i32 : i32, i32
  }
}

module attributes {stable_mosaic.version = 11 : i64} {
  func.func @_matmul_stats_kernel(%arg0: i32, %arg1: memref<512x128xbf16, #tpu.memory_space<vmem>>, %arg2: memref<128x128xbf16, #tpu.memory_space<vmem>>, %arg3: memref<512x128xbf16, #tpu.memory_space<vmem>>, %arg4: memref<8x128xf32, #tpu.memory_space<vmem>>, %arg5: memref<8x128xf32, #tpu.memory_space<vmem>>) attributes {dimension_semantics = [#tpu.dimension_semantics<parallel>], iteration_bounds = array<i64: 2>, scalar_prefetch = 0 : i64, scratch_operands = 0 : i64, tpu.core_type = #tpu.core_type<tc>, window_params = [{transform_indices = @transform_0, window_bounds = array<i64: 512, 128>}, {pipeline_mode = #tpu.pipeline_mode<synchronous>, transform_indices = @transform_1, window_bounds = array<i64: 128, 128>}, {transform_indices = @transform_2, window_bounds = array<i64: 512, 128>}, {transform_indices = @transform_3, window_bounds = array<i64: 8, 128>}, {transform_indices = @transform_4, window_bounds = array<i64: 8, 128>}]} {
    %c0 = arith.constant 0 : index
    %c0_0 = arith.constant 0 : index
    %0 = vector.load %arg1[%c0, %c0_0] : memref<512x128xbf16, #tpu.memory_space<vmem>>, vector<512x128xbf16>
    %c0_1 = arith.constant 0 : index
    %c0_2 = arith.constant 0 : index
    %1 = vector.load %arg2[%c0_1, %c0_2] : memref<128x128xbf16, #tpu.memory_space<vmem>>, vector<128x128xbf16>
    %cst = arith.constant dense<0.000000e+00> : vector<512x128xf32>
    %2 = tpu.matmul %0, %1, %cst {dimension_numbers = #tpu.dot_dimension_numbers<[1], [0], [0], [1], [0, 0, 1, 1], [], []>} : vector<512x128xbf16>, vector<128x128xbf16>, vector<512x128xf32> -> vector<512x128xf32>
    %cst_3 = arith.constant dense<0.000000e+00> : vector<128xf32>
    %3 = vector.multi_reduction <add>, %2, %cst_3 [0] : vector<512x128xf32> to vector<128xf32>
    %4 = vector.shape_cast %3 : vector<128xf32> to vector<1x128xf32>
    %5 = arith.mulf %2, %2 : vector<512x128xf32>
    %cst_4 = arith.constant dense<0.000000e+00> : vector<128xf32>
    %6 = vector.multi_reduction <add>, %5, %cst_4 [0] : vector<512x128xf32> to vector<128xf32>
    %7 = vector.shape_cast %6 : vector<128xf32> to vector<1x128xf32>
    %8 = arith.truncf %2 : vector<512x128xf32> to vector<512x128xbf16>
    %c0_5 = arith.constant 0 : index
    %c0_6 = arith.constant 0 : index
    %9 = vector.load %arg3[%c0_5, %c0_6] : memref<512x128xbf16, #tpu.memory_space<vmem>>, vector<512x128xbf16>
    tpu.vector_store %arg3[%c0_5, %c0_6], %8 {strides = array<i32>} : memref<512x128xbf16, #tpu.memory_space<vmem>>, vector<512x128xbf16>,
    %10 = vector.shape_cast %4 : vector<1x128xf32> to vector<1x128xf32>
    %11 = vector.broadcast %10 : vector<1x128xf32> to vector<8x128xf32>
    %c0_7 = arith.constant 0 : index
    %c0_8 = arith.constant 0 : index
    %12 = vector.load %arg4[%c0_7, %c0_8] : memref<8x128xf32, #tpu.memory_space<vmem>>, vector<8x128xf32>
    tpu.vector_store %arg4[%c0_7, %c0_8], %11 {strides = array<i32>} : memref<8x128xf32, #tpu.memory_space<vmem>>, vector<8x128xf32>,
    %13 = vector.shape_cast %7 : vector<1x128xf32> to vector<1x128xf32>
    %14 = vector.broadcast %13 : vector<1x128xf32> to vector<8x128xf32>
    %c0_9 = arith.constant 0 : index
    %c0_10 = arith.constant 0 : index
    %15 = vector.load %arg5[%c0_9, %c0_10] : memref<8x128xf32, #tpu.memory_space<vmem>>, vector<8x128xf32>
    tpu.vector_store %arg5[%c0_9, %c0_10], %14 {strides = array<i32>} : memref<8x128xf32, #tpu.memory_space<vmem>>, vector<8x128xf32>,
    return
  }
  func.func @transform_0(%arg0: i32) -> (i32, i32) {
    %c0_i32 = arith.constant 0 : i32
    %c0_i32_0 = arith.constant 0 : i32
    return %arg0, %c0_i32 : i32, i32
  }
  func.func @transform_1(%arg0: i32) -> (i32, i32) {
    %c0_i32 = arith.constant 0 : i32
    %c0_i32_0 = arith.constant 0 : i32
    %c0_i32_1 = arith.constant 0 : i32
    return %c0_i32, %c0_i32_0 : i32, i32
  }
  func.func @transform_2(%arg0: i32) -> (i32, i32) {
    %c0_i32 = arith.constant 0 : i32
    %c0_i32_0 = arith.constant 0 : i32
    return %arg0, %c0_i32 : i32, i32
  }
  func.func @transform_3(%arg0: i32) -> (i32, i32) {
    %c0_i32 = arith.constant 0 : i32
    %c0_i32_0 = arith.constant 0 : i32
    return %arg0, %c0_i32 : i32, i32
  }
  func.func @transform_4(%arg0: i32) -> (i32, i32) {
    %c0_i32 = arith.constant 0 : i32
    %c0_i32_0 = arith.constant 0 : i32
    return %arg0, %c0_i32 : i32, i32
  }
}

module attributes {stable_mosaic.version = 11 : i64} {
  func.func @_bn_act_kernel(%arg0: i32, %arg1: memref<512x128xbf16, #tpu.memory_space<vmem>>, %arg2: memref<1x128xf32, #tpu.memory_space<vmem>>, %arg3: memref<1x128xf32, #tpu.memory_space<vmem>>, %arg4: memref<512x128xf32, #tpu.memory_space<vmem>>) attributes {dimension_semantics = [#tpu.dimension_semantics<parallel>], iteration_bounds = array<i64: 2>, scalar_prefetch = 0 : i64, scratch_operands = 0 : i64, tpu.core_type = #tpu.core_type<tc>, window_params = [{transform_indices = @transform_0, window_bounds = array<i64: 512, 128>}, {pipeline_mode = #tpu.pipeline_mode<synchronous>, transform_indices = @transform_1, window_bounds = array<i64: 1, 128>}, {pipeline_mode = #tpu.pipeline_mode<synchronous>, transform_indices = @transform_2, window_bounds = array<i64: 1, 128>}, {transform_indices = @transform_3, window_bounds = array<i64: 512, 128>}]} {
    %c0 = arith.constant 0 : index
    %c0_0 = arith.constant 0 : index
    %0 = vector.load %arg1[%c0, %c0_0] : memref<512x128xbf16, #tpu.memory_space<vmem>>, vector<512x128xbf16>
    %1 = arith.extf %0 : vector<512x128xbf16> to vector<512x128xf32>
    %c0_1 = arith.constant 0 : index
    %c0_2 = arith.constant 0 : index
    %2 = vector.load %arg2[%c0_1, %c0_2] : memref<1x128xf32, #tpu.memory_space<vmem>>, vector<1x128xf32>
    %3 = vector.broadcast %2 : vector<1x128xf32> to vector<512x128xf32>
    %4 = arith.mulf %1, %3 : vector<512x128xf32>
    %c0_3 = arith.constant 0 : index
    %c0_4 = arith.constant 0 : index
    %5 = vector.load %arg3[%c0_3, %c0_4] : memref<1x128xf32, #tpu.memory_space<vmem>>, vector<1x128xf32>
    %6 = vector.broadcast %5 : vector<1x128xf32> to vector<512x128xf32>
    %7 = arith.addf %4, %6 : vector<512x128xf32>
    %cst = arith.constant 0.000000e+00 : f32
    %8 = vector.broadcast %cst : f32 to vector<512x128xf32>
    %9 = arith.cmpf oge, %7, %8 : vector<512x128xf32>
    %cst_5 = arith.constant 2.000000e-01 : f32
    %10 = vector.broadcast %cst_5 : f32 to vector<512x128xf32>
    %11 = arith.mulf %10, %7 : vector<512x128xf32>
    %12 = arith.select %9, %7, %11 : vector<512x128xi1>, vector<512x128xf32>
    %13 = arith.negf %12 : vector<512x128xf32>
    %14 = math.exp %13 : vector<512x128xf32>
    %cst_6 = arith.constant 1.000000e+00 : f32
    %15 = vector.broadcast %cst_6 : f32 to vector<512x128xf32>
    %16 = arith.addf %15, %14 : vector<512x128xf32>
    %17 = arith.divf %15, %16 : vector<512x128xf32>
    %c0_7 = arith.constant 0 : index
    %c0_8 = arith.constant 0 : index
    %18 = vector.load %arg4[%c0_7, %c0_8] : memref<512x128xf32, #tpu.memory_space<vmem>>, vector<512x128xf32>
    tpu.vector_store %arg4[%c0_7, %c0_8], %17 {strides = array<i32>} : memref<512x128xf32, #tpu.memory_space<vmem>>, vector<512x128xf32>,
    return
  }
  func.func @transform_0(%arg0: i32) -> (i32, i32) {
    %c0_i32 = arith.constant 0 : i32
    %c0_i32_0 = arith.constant 0 : i32
    return %arg0, %c0_i32 : i32, i32
  }
  func.func @transform_1(%arg0: i32) -> (i32, i32) {
    %c0_i32 = arith.constant 0 : i32
    %c0_i32_0 = arith.constant 0 : i32
    %c0_i32_1 = arith.constant 0 : i32
    return %c0_i32, %c0_i32_0 : i32, i32
  }
  func.func @transform_2(%arg0: i32) -> (i32, i32) {
    %c0_i32 = arith.constant 0 : i32
    %c0_i32_0 = arith.constant 0 : i32
    %c0_i32_1 = arith.constant 0 : i32
    return %c0_i32, %c0_i32_0 : i32, i32
  }
  func.func @transform_3(%arg0: i32) -> (i32, i32) {
    %c0_i32 = arith.constant 0 : i32
    %c0_i32_0 = arith.constant 0 : i32
    return %arg0, %c0_i32 : i32, i32
  }
}

</mosaic_0001>

<bundles_post_ra>
// kernel: tpu_custom_call.1
= control target key start
LH: loop header
LB: loop body
LE: loop exit
PB: predicated region body
PF: predicated region fallthrough
CT: control target
= control target key end

     0   :  { %6 = vsyncpa [#allocation3], 0  ;;  %s341_s0 = inlined_call_operand.hbm [shape: f32[8,128], index: 0, kind: input, shape index: {}]   ;;  %s342_s1 = inlined_call_operand.hbm [shape: f32[8,128], index: 1, kind: output, shape index: {}]  }
   0x1   :  { %7 = vsyncpa [#allocation4], 0  ;;  %s262_s6 = smov 0  }
   0x2 LB: > { %s145_s7 = sadd.s32 4294967295, %s248_s6   ;;  %p146_p0 = scmp.ge.s32.totalorder %s248_s6, 1  ;;  %s248_s6 = sphi %s262_s6, %s13_s6  }
   0x3   : > { %p60_p1 = scmp.lt.s32.totalorder %s248_s6, 3  ;;  %p276_p3 = scmp.eq.s32.totalorder %s145_s7, 0 }
   0x4   : > { %s250_s10 = smov [#allocation2]   ;;  %s180_s15 = scalar_lea.hbm %s341_s0, 128 }
   0x5   : > { %p270_p2 = pnand %p146_p0, %p60_p1  ;;  %s73_s11 = sshll.u32 %s250_s10, 4  ;;  %s74_s11 = int_to_ptr.vmem [resolvable:$true] %s73_s11 }
   0x6   : > { %s347_s9 = scalar_select %p276_p3, 1, 0 }
   0x7   : > { %s346_s8 = scalar_select %p270_p2, 1, 0 }
   0x8   : > { %p162_p4 = pneg %p270_p2  ;;  %p181_p6 = scmp.ne.s32.totalorder %s341_s0, %s180_s15 }
   0x9   : > { %p187_p10 = scmp.lt.u32.totalorder %s180_s15, %s341_s0 }
   0xa   : > { %p284_p5 = pnand %p276_p3, %p162_p4 }
   0xc   : > { %p182_p7 = pneg %p284_p5 }
   0xe   : > { %p183_p8 = pnand %p182_p7, %p181_p6 }
  0x10   : > { %p184_p9 = pneg %p183_p8 }
  0x12   : > { %p189_p11 = pnand %p187_p10, %p184_p9 }
  0x14   : > { %192 = shalt.err (!%p189_p11)
}
  0x15   : > { %s193_s20 = scalar_lea.vmem %s74_s11, 128  ;;  %p201_p1 = scmp.lt.s32.totalorder %s74_s11, %s74_s11 }
  0x16   : > { %p194_p12 = scmp.ne.s32.totalorder %s74_s11, %s193_s20  ;;  %p202_p4 = scmp.lt.s32.totalorder %s193_s20, %s193_s20 }
  0x18   : > { %p196_p13 = pnand %p194_p12, %p182_p7  ;;  %p203_p3 = por %p202_p4, %p201_p1 }
  0x1a   : > { %p197_p0 = pneg %p196_p13 }
  0x1c   : > { %p204_p2 = pnand %p203_p3, %p197_p0 }
  0x1e   : > { %207 = shalt.err (!%p204_p2)
}
  0x1f   : > { %165 = dma.hbm_to_vmem [thread:$0]  (!%p284_p5), %s341_s0, 128, %s74_s11, [#allocation3]  }
  0x20   : > { %p349_p6 = scmp.ne.s32.totalorder %s346_s8, 0 }
  0x21   : > { %p350_p8 = scmp.ne.s32.totalorder (!%p349_p6), %s347_s9, 0 }
  0x22   : > { %86 = sbr.rel (%p349_p6) target bundleno = 67 (0x43), region = 24 }
  0x29   : > { %239 = dma.done.wait (%p350_p8), [#allocation3], 128  }
  0x2a   : > { %241 = vsyncadd (%p350_p8), [#allocation3], 4294967168  ;;  %s251_s23 = smov [#allocation5]   ;;  %v96_v0 = vld [vmem:[#allocation2] sm:$0xff]  ;;  %p312_p2 = scmp.eq.s32.totalorder %s145_s7, 1 }
  0x2b   : > { %s106_s24 = sshll.u32 %s251_s23, 4  ;;  %v97_v1 = vadd.f32 1.0, %v96_v0  ;;  %s107_s24 = int_to_ptr.vmem [resolvable:$true] %s106_s24 }
  0x2c   : > { %s208_s26 = scalar_lea.vmem %s107_s24, 128  ;;  %p215_p9 = scmp.lt.s32.totalorder %s107_s24, %s107_s24 }
  0x2d   : > { %98 = vst [vmem:[#allocation5] sm:$0xff] %v97_v1  ;;  %p209_p3 = scmp.ne.s32.totalorder %s107_s24, %s208_s26  ;;  %p216_p10 = scmp.lt.s32.totalorder %s208_s26, %s208_s26 }
  0x2f   : > { %p210_p5 = pnand %p209_p3, %p312_p2  ;;  %p217_p11 = por %p216_p10, %p215_p9 }
  0x31   : > { %p211_p7 = pneg %p210_p5 }
  0x33   : > { %p218_p12 = pnand %p217_p11, %p211_p7 }
  0x35   : > { %221 = shalt.err (!%p218_p12)
}
  0x36   : > { %s222_s29 = scalar_lea.hbm %s342_s1, 128 }
  0x37   : > { %p223_p13 = scmp.ne.s32.totalorder %s342_s1, %s222_s29  ;;  %p228_p4 = scmp.lt.u32.totalorder %s222_s29, %s342_s1 }
  0x39   : > { %p224_p0 = pnand %p223_p13, %p312_p2 }
  0x3b   : > { %p225_p1 = pneg %p224_p0 }
  0x3d   : > { %p230_p6 = pnand %p228_p4, %p225_p1 }
  0x3f   : > { %233 = shalt.err (!%p230_p6)
}
  0x40   : > { %159 = dma.vmem_to_hbm [thread:$0]  (%p312_p2), %s107_s24, 128, %s342_s1, [#allocation4]  }
  0x41   : > { %243 = dma.done.wait (%p312_p2), [#allocation4], 128  }
  0x42   : > { %245 = vsyncadd (%p312_p2), [#allocation4], 4294967168 }
  0x43 PF: > { %s13_s6 = sadd.s32 1, %s248_s6  }
  0x44   : > { %p10_p8 = scmp.ge.s32.totalorder %s13_s6, 4  }
  0x46   :  { %12 = sbr.rel (!%p10_p8) target bundleno = 2 (0x2), region = 53 }
  0x4d   :  { %119 = vsyncpa [#allocation3], 1 }
  0x4e   :  { %121 = vsyncpa [#allocation3 + $0x1], 1 }
  0x4f   :  { %122 = vsyncpa [#allocation4], 1 }
  0x50   :  { %124 = vsyncpa [#allocation4 + $0x1], 1 }

// kernel: _forward_impl.15
= control target key start
LH: loop header
LB: loop body
LE: loop exit
PB: predicated region body
PF: predicated region fallthrough
CT: control target
= control target key end

     0   :  { %s603_s12 = smov 0   ;;  %s690_s0 = inlined_call_operand.vmem [shape: bf16[256,128], index: 0, kind: input, shape index: {}]   ;;  %s691_s1 = inlined_call_operand.vmem [shape: f32[1,128], index: 1, kind: input, shape index: {}]   ;;  %s692_s2 = inlined_call_operand.vmem [shape: f32[1,128], index: 2, kind: input, shape index: {}]   ;;  %s693_s3 = inlined_call_operand.vmem [shape: bf16[256,128], index: 3, kind: output, shape index: {}]  }
   0x1 LB: > { %s436_s13 = sadd.s32 4294967295, %s581_s12   ;;  %p440_p0 = scmp.ge.s32.totalorder %s581_s12, 1  ;;  %s581_s12 = sphi %s603_s12, %s13_s12  }
   0x2   : > { %p138_p1 = scmp.lt.s32.totalorder %s581_s12, 3 }
   0x4   : > { %p139_p2 = pnand %p440_p0, %p138_p1 }
   0x5   : > { %s441_s14 = sshll.u32 (!%p139_p2), %s436_s13, 4  ;;  %v624_v0 = vld [vmem:[%s691_s1] ss:$0 sm:$0xff] (!%p139_p2) }
   0x6   : > { %142 = sbr.rel (%p139_p2) target bundleno = 49 (0x31), region = 32  ;;  %p163_p3 = scmp.lt.s32.totalorder (!%p139_p2), %s441_s14, 31  ;;  %v633_v9 = vld [vmem:[%s692_s2] ss:$0 sm:$0xff] (!%p139_p2) }
   0xd   : > { %s695_s14 = smov (!%p163_p3, %s441_s14), 31 }
   0xe   : > { %s442_s15 = sshll.u32 %s695_s14, 2 }
   0xf   : > { %s619_s18 = scalar_lea.vmem %s690_s0, %s442_s15  ;;  %s656_s25 = scalar_lea.vmem %s693_s3, %s442_s15 }
  0x10   : > { %v482_v1 = vld [vmem:[%s619_s18] sm:$0xff]   ;;  %v553_v2 = vld [vmem:[%s619_s18 + $0x8] sm:$0xff]   ;;  %v554_v3 = vld [vmem:[%s619_s18 + $0x10] sm:$0xff]  }
  0x11   : > { %v483_v4 = vunpack.c.l.bf16 %v482_v1  ;;  %v484_v5 = vunpack.c.h.bf16 %v482_v1  ;;  %v487_v6 = vunpack.c.l.bf16 %v553_v2  ;;  %v488_v7 = vunpack.c.h.bf16 %v553_v2  ;;  %v555_v8 = vld [vmem:[%s619_s18 + $0x18] sm:$0xff]   ;;  %v556_v36 = vld [vmem:[%s619_s18 + $0x20] sm:$0xff]   ;;  %v557_v41 = vld [vmem:[%s619_s18 + $0x28] sm:$0xff]  }
  0x12   : > { %v491_v10 = vunpack.c.l.bf16 %v554_v3  ;;  %v492_v11 = vunpack.c.h.bf16 %v554_v3  ;;  %v495_v12 = vunpack.c.l.bf16 %v555_v8  ;;  %v496_v13 = vunpack.c.h.bf16 %v555_v8  ;;  %v558_v52 = vld [vmem:[%s619_s18 + $0x30] sm:$0xff]   ;;  %v559_v53 = vld [vmem:[%s619_s18 + $0x38] sm:$0xff]  }
  0x13   : > { %v213_v14 = vmul.f32 %v483_v4, %v624_v0  ;;  %v214_v15 = vmul.f32 %v484_v5, %v624_v0  ;;  %v215_v16 = vmul.f32 %v487_v6, %v624_v0  ;;  %v216_v17 = vmul.f32 %v488_v7, %v624_v0 }
  0x14   : > { %v217_v18 = vmul.f32 %v491_v10, %v624_v0  ;;  %v218_v19 = vmul.f32 %v492_v11, %v624_v0  ;;  %v219_v20 = vmul.f32 %v495_v12, %v624_v0  ;;  %v220_v21 = vmul.f32 %v496_v13, %v624_v0 }
  0x15   : > { %v236_v22 = vadd.f32 %v633_v9, %v213_v14  ;;  %v237_v23 = vadd.f32 %v633_v9, %v214_v15  ;;  %v238_v24 = vadd.f32 %v633_v9, %v215_v16  ;;  %v239_v25 = vadd.f32 %v633_v9, %v216_v17 }
  0x16   : > { %v240_v26 = vadd.f32 %v633_v9, %v217_v18  ;;  %v241_v27 = vadd.f32 %v633_v9, %v218_v19  ;;  %v242_v28 = vadd.f32 %v633_v9, %v219_v20  ;;  %v243_v29 = vadd.f32 %v633_v9, %v220_v21 }
  0x17   : > { %vm252_vm0 = vcmp.ge.f32.partialorder %v236_v22, 0.0  ;;  %vm253_vm1 = vcmp.ge.f32.partialorder %v237_v23, 0.0  ;;  %v268_v30 = vmul.f32 0.2, %v236_v22  ;;  %v269_v31 = vmul.f32 0.2, %v237_v23 }
  0x18   : > { %vm254_vm2 = vcmp.ge.f32.partialorder %v238_v24, 0.0  ;;  %vm255_vm3 = vcmp.ge.f32.partialorder %v239_v25, 0.0  ;;  %v270_v32 = vmul.f32 0.2, %v238_v24  ;;  %v271_v33 = vmul.f32 0.2, %v239_v25 }
  0x19   : > { %v284_v34 = vsel %vm252_vm0, %v236_v22, %v268_v30  ;;  %v285_v35 = vsel %vm253_vm1, %v237_v23, %v269_v31  ;;  %vm256_vm4 = vcmp.ge.f32.partialorder %v240_v26, 0.0  ;;  %vm257_vm5 = vcmp.ge.f32.partialorder %v241_v27, 0.0 }
  0x1a   : > { %v516_v37 = vpack.c.bf16 %v285_v35, %v284_v34  ;;  %v286_v38 = vsel %vm254_vm2, %v238_v24, %v270_v32  ;;  %v287_v39 = vsel %vm255_vm3, %v239_v25, %v271_v33  ;;  %v272_v40 = vmul.f32 0.2, %v240_v26 }
  0x1b   : > { %v521_v42 = vpack.c.bf16 %v287_v39, %v286_v38  ;;  %v273_v43 = vmul.f32 0.2, %v241_v27  ;;  %vm258_vm6 = vcmp.ge.f32.partialorder %v242_v28, 0.0  ;;  %vm259_vm7 = vcmp.ge.f32.partialorder %v243_v29, 0.0 }
  0x1c   : > { %517 = vst [vmem:[%s656_s25] sm:$0xff] %v516_v37   ;;  %v288_v44 = vsel %vm256_vm4, %v240_v26, %v272_v40  ;;  %v274_v45 = vmul.f32 0.2, %v242_v28  ;;  %v275_v46 = vmul.f32 0.2, %v243_v29  ;;  %v499_v47 = vunpack.c.l.bf16 %v556_v36 }
  0x1d   : > { %560 = vst [vmem:[%s656_s25 + $0x8] sm:$0xff] %v521_v42   ;;  %v289_v48 = vsel %vm257_vm5, %v241_v27, %v273_v43  ;;  %v500_v49 = vunpack.c.h.bf16 %v556_v36  ;;  %v503_v50 = vunpack.c.l.bf16 %v557_v41  ;;  %v504_v51 = vunpack.c.h.bf16 %v557_v41 }
  0x1e   : > { %v526_v54 = vpack.c.bf16 %v289_v48, %v288_v44  ;;  %v290_v55 = vsel %vm258_vm6, %v242_v28, %v274_v45  ;;  %v291_v56 = vsel %vm259_vm7, %v243_v29, %v275_v46  ;;  %v221_v57 = vmul.f32 %v499_v47, %v624_v0 }
  0x1f   : > { %v531_v58 = vpack.c.bf16 %v291_v56, %v290_v55  ;;  %v222_v59 = vmul.f32 %v500_v49, %v624_v0  ;;  %v223_v60 = vmul.f32 %v503_v50, %v624_v0  ;;  %v224_v61 = vmul.f32 %v504_v51, %v624_v0 }
  0x20   : > { %561 = vst [vmem:[%s656_s25 + $0x10] sm:$0xff] %v526_v54   ;;  %v244_v62 = vadd.f32 %v633_v9, %v221_v57  ;;  %v507_v63 = vunpack.c.l.bf16 %v558_v52  ;;  %v508_v1 = vunpack.c.h.bf16 %v558_v52  ;;  %v511_v2 = vunpack.c.l.bf16 %v559_v53 }
  0x21   : > { %562 = vst [vmem:[%s656_s25 + $0x18] sm:$0xff] %v531_v58   ;;  %v245_v3 = vadd.f32 %v633_v9, %v222_v59  ;;  %v246_v4 = vadd.f32 %v633_v9, %v223_v60  ;;  %v247_v5 = vadd.f32 %v633_v9, %v224_v61  ;;  %v512_v6 = vunpack.c.h.bf16 %v559_v53 }
  0x22   : > { %vm260_vm8 = vcmp.ge.f32.partialorder %v244_v62, 0.0  ;;  %v276_v7 = vmul.f32 0.2, %v244_v62  ;;  %v225_v8 = vmul.f32 %v507_v63, %v624_v0  ;;  %v226_v10 = vmul.f32 %v508_v1, %v624_v0 }
  0x23   : > { %vm261_vm9 = vcmp.ge.f32.partialorder %v245_v3, 0.0  ;;  %v277_v11 = vmul.f32 0.2, %v245_v3  ;;  %vm262_vm10 = vcmp.ge.f32.partialorder %v246_v4, 0.0  ;;  %vm263_vm11 = vcmp.ge.f32.partialorder %v247_v5, 0.0 }
  0x24   : > { %v292_v12 = vsel %vm260_vm8, %v244_v62, %v276_v7  ;;  %v278_v13 = vmul.f32 0.2, %v246_v4  ;;  %v279_v14 = vmul.f32 0.2, %v247_v5  ;;  %v248_v15 = vadd.f32 %v633_v9, %v225_v8 }
  0x25   : > { %v293_v16 = vsel %vm261_vm9, %v245_v3, %v277_v11  ;;  %v249_v17 = vadd.f32 %v633_v9, %v226_v10  ;;  %v227_v18 = vmul.f32 %v511_v2, %v624_v0  ;;  %v228_v19 = vmul.f32 %v512_v6, %v624_v0 }
  0x26   : > { %v536_v20 = vpack.c.bf16 %v293_v16, %v292_v12  ;;  %v294_v21 = vsel %vm262_vm10, %v246_v4, %v278_v13  ;;  %v295_v22 = vsel %vm263_vm11, %v247_v5, %v279_v14  ;;  %vm264_vm12 = vcmp.ge.f32.partialorder %v248_v15, 0.0 }
  0x27   : > { %v541_v23 = vpack.c.bf16 %v295_v22, %v294_v21  ;;  %vm265_vm13 = vcmp.ge.f32.partialorder %v249_v17, 0.0  ;;  %v280_v24 = vmul.f32 0.2, %v248_v15  ;;  %v281_v25 = vmul.f32 0.2, %v249_v17 }
  0x28   : > { %563 = vst [vmem:[%s656_s25 + $0x20] sm:$0xff] %v536_v20   ;;  %v250_v26 = vadd.f32 %v633_v9, %v227_v18  ;;  %v251_v27 = vadd.f32 %v633_v9, %v228_v19 }
  0x29   : > { %564 = vst [vmem:[%s656_s25 + $0x28] sm:$0xff] %v541_v23   ;;  %v296_v28 = vsel %vm264_vm12, %v248_v15, %v280_v24  ;;  %v297_v29 = vsel %vm265_vm13, %v249_v17, %v281_v25 }
  0x2a   : > { %v546_v30 = vpack.c.bf16 %v297_v29, %v296_v28  ;;  %vm266_vm14 = vcmp.ge.f32.partialorder %v250_v26, 0.0  ;;  %vm267_vm15 = vcmp.ge.f32.partialorder %v251_v27, 0.0  ;;  %v282_v0 = vmul.f32 0.2, %v250_v26 }
  0x2b   : > { %v283_v31 = vmul.f32 0.2, %v251_v27 }
  0x2c   : > { %565 = vst [vmem:[%s656_s25 + $0x30] sm:$0xff] %v546_v30   ;;  %v298_v32 = vsel %vm266_vm14, %v250_v26, %v282_v0 }
  0x2d   : > { %v299_v33 = vsel %vm267_vm15, %v251_v27, %v283_v31 }
  0x2e   : > { %v551_v34 = vpack.c.bf16 %v299_v33, %v298_v32 }
  0x30   : > { %566 = vst [vmem:[%s656_s25 + $0x38] sm:$0xff] %v551_v34  }
  0x31 PF: > { %s13_s12 = sadd.s32 1, %s581_s12  }
  0x32   : > { %p10_p4 = scmp.ge.s32.totalorder %s13_s12, 4  }
  0x34   :  { %12 = sbr.rel (!%p10_p4) target bundleno = 1 (0x1), region = 62 }

// kernel: _forward_impl.14
= control target key start
LH: loop header
LB: loop body
LE: loop exit
PB: predicated region body
PF: predicated region fallthrough
CT: control target
= control target key end

     0   :  { %s935_s15 = smov 0   ;;  %s1014_s0 = inlined_call_operand.vmem [shape: bf16[256,128], index: 0, kind: input, shape index: {}]   ;;  %s1015_s1 = inlined_call_operand.vmem [shape: bf16[128,128], index: 1, kind: input, shape index: {}]   ;;  %s1016_s2 = inlined_call_operand.vmem [shape: bf16[256,128], index: 2, kind: output, shape index: {0}]   ;;  %s1017_s3 = inlined_call_operand.vmem [shape: f32[16,128], index: 3, kind: output, shape index: {1}]   ;;  %s1018_s4 = inlined_call_operand.vmem [shape: f32[16,128], index: 4, kind: output, shape index: {2}]  }
   0x1 LB: > { %s941_s16 = sadd.s32 4294967295, %s908_s15   ;;  %p710_p0 = scmp.ge.s32.totalorder %s908_s15, 1  ;;  %s908_s15 = sphi %s935_s15, %s15_s15  }
   0x2   : > { %p168_p1 = scmp.lt.s32.totalorder %s908_s15, 3 }
   0x4   : > { %p169_p2 = pnand %p710_p0, %p168_p1 }
   0x5   : > { %v886_v0 = vld [vmem:[%s1015_s1] sm:$0xff] (!%p169_p2)   ;;  %s711_s19 = sshll.u32 (!%p169_p2), %s941_s16, 4  ;;  %v887_v1 = vld [vmem:[%s1015_s1 + $0x8] sm:$0xff] (!%p169_p2)   ;;  %v888_v2 = vld [vmem:[%s1015_s1 + $0x10] sm:$0xff] (!%p169_p2)   ;;  %p214_p4 = scmp.lt.s32.totalorder (!%p169_p2), %s941_s16, 1 }
   0x6   : > { %172 = sbr.rel (%p169_p2) target bundleno = 298 (0x12a), region = 28  ;;  %p203_p3 = scmp.lt.s32.totalorder (!%p169_p2), %s711_s19, 31  ;;  %830 = vmatprep.subr.bf16.mxu0 (!%p169_p2), %v886_v0  ;;  %862 = vmatprep.subr.bf16.mxu1 (!%p169_p2), %v886_v0  ;;  %v889_v3 = vld [vmem:[%s1015_s1 + $0x18] sm:$0xff] (!%p169_p2)   ;;  %v890_v5 = vld [vmem:[%s1015_s1 + $0x20] sm:$0xff] (!%p169_p2)   ;;  %v891_v7 = vld [vmem:[%s1015_s1 + $0x28] sm:$0xff] (!%p169_p2)  }
   0x7   : > { %831 = vmatpush3.bf16.msra.mxu0 (!%p169_p2), %v886_v0  ;;  %870 = vmatpush3.bf16.msra.mxu1 (!%p169_p2), %v886_v0  ;;  %v892_v8 = vld [vmem:[%s1015_s1 + $0x30] sm:$0xff] (!%p169_p2)   ;;  %v893_v9 = vld [vmem:[%s1015_s1 + $0x38] sm:$0xff] (!%p169_p2)  }
   0x8   : > { %832 = vmatprep.subr.bf16.mxu0 (!%p169_p2), %v887_v1  ;;  %863 = vmatprep.subr.bf16.mxu1 (!%p169_p2), %v887_v1 }
   0xb   : > { %833 = vmatpush3.bf16.msra.mxu0 (!%p169_p2), %v887_v1  ;;  %871 = vmatpush3.bf16.msra.mxu1 (!%p169_p2), %v887_v1 }
   0xc   : > { %834 = vmatprep.subr.bf16.mxu0 (!%p169_p2), %v888_v2  ;;  %864 = vmatprep.subr.bf16.mxu1 (!%p169_p2), %v888_v2 }
   0xd   : > { %s1020_s19 = smov (!%p203_p3, %s711_s19), 31  ;;  %s1022_s16 = smov (!%p214_p4, %s941_s16), 1 }
   0xe   : > { %s712_s24 = sshll.u32 %s1020_s19, 2  ;;  %s715_s17 = sshll.u32 %s1022_s16, 3 }
   0xf   : > { %s963_s27 = scalar_lea.vmem %s1014_s0, %s712_s24  ;;  %835 = vmatpush3.bf16.msra.mxu0 %v888_v2  ;;  %872 = vmatpush3.bf16.msra.mxu1 %v888_v2  ;;  %s993_s14 = scalar_lea.vmem %s1016_s2, %s712_s24 }
  0x10   : > { %v894_v4 = vld [vmem:[%s963_s27] sm:$0xff]   ;;  %836 = vmatprep.subr.bf16.mxu0 %v889_v3  ;;  %865 = vmatprep.subr.bf16.mxu1 %v889_v3  ;;  %v895_v10 = vld [vmem:[%s963_s27 + $0x8] sm:$0xff]   ;;  %v896_v12 = vld [vmem:[%s963_s27 + $0x10] sm:$0xff]   ;;  %s217_s20 = scalar_lea.vmem %s1017_s3, %s715_s17  ;;  %s221_s23 = scalar_lea.vmem %s1018_s4, %s715_s17 }
  0x11   : > { %846 = vmatprep.mubr.bf16.mxu0 %v894_v4  ;;  %v898_v6 = vld [vmem:[%s963_s27 + $0x20] sm:$0xff]   ;;  %v899_v11 = vld [vmem:[%s963_s27 + $0x28] sm:$0xff]   ;;  %v900_v13 = vld [vmem:[%s963_s27 + $0x30] sm:$0xff]  }
  0x12   : > { %854 = vmatprep.mubr.bf16.mxu1 %v898_v6  ;;  %v897_v14 = vld [vmem:[%s963_s27 + $0x18] sm:$0xff]  }
  0x13   : > { %837 = vmatpush3.bf16.msra.mxu0 %v889_v3  ;;  %873 = vmatpush3.bf16.msra.mxu1 %v889_v3  ;;  %v901_v15 = vld [vmem:[%s963_s27 + $0x38] sm:$0xff]  }
  0x14   : > { %838 = vmatprep.subr.bf16.mxu0 %v890_v5  ;;  %866 = vmatprep.subr.bf16.mxu1 %v890_v5 }
  0x17   : > { %839 = vmatpush3.bf16.msra.mxu0 %v890_v5  ;;  %874 = vmatpush3.bf16.msra.mxu1 %v890_v5 }
  0x18   : > { %840 = vmatprep.subr.bf16.mxu0 %v891_v7  ;;  %867 = vmatprep.subr.bf16.mxu1 %v891_v7 }
  0x1b   : > { %841 = vmatpush3.bf16.msra.mxu0 %v891_v7  ;;  %875 = vmatpush3.bf16.msra.mxu1 %v891_v7 }
  0x1c   : > { %842 = vmatprep.subr.bf16.mxu0 %v892_v8  ;;  %868 = vmatprep.subr.bf16.mxu1 %v892_v8 }
  0x1f   : > { %843 = vmatpush3.bf16.msra.mxu0 %v892_v8  ;;  %876 = vmatpush3.bf16.msra.mxu1 %v892_v8 }
  0x20   : > { %844 = vmatprep.subr.bf16.mxu0 %v893_v9  ;;  %869 = vmatprep.subr.bf16.mxu1 %v893_v9 }
  0x23   : > { %845 = vmatpush3.bf16.msra.mxu0 %v893_v9  ;;  %877 = vmatpush3.bf16.msra.mxu1 %v893_v9 }
  0x26   : > { %847 = vmatmul.mubr.bf16.vlgmr.msra.gmra.mrb[0].mxu0 %v895_v10  ;;  %855 = vmatmul.mubr.bf16.vlgmr.msra.gmra.mrb[0].mxu1 %v899_v11 }
  0x27   : > { %850 = vmatprep.mubr.bf16.mxu0 %v896_v12  ;;  %858 = vmatprep.mubr.bf16.mxu1 %v900_v13 }
  0x2e   : > { %851 = vmatmul.mubr.bf16.gmra.mrb[4].mxu0 %v897_v14  ;;  %859 = vmatmul.mubr.bf16.gmra.mrb[4].mxu1 %v901_v15 }
  0xf9   : > { %v848_v16 = vpop.f32.mrb[0].mxu0  ;;  %v856_v17 = vpop.f32.mrb[0].mxu1 }
  0xfa   : > { %v385_v18 = vpop.f32.mrb[1].mxu0  ;;  %v417_v19 = vpop.f32.mrb[1].mxu1  ;;  %v471_v31 = vmul.f32 %v848_v16, %v848_v16  ;;  %v479_v3 = vmul.f32 %v856_v17, %v856_v17 }
  0xfb   : > { %v849_v20 = vpop.f32.mrb[2].mxu0  ;;  %v857_v21 = vpop.f32.mrb[2].mxu1  ;;  %v469_v26 = vmul.f32 %v385_v18, %v385_v18  ;;  %v477_v61 = vmul.f32 %v417_v19, %v417_v19 }
  0xfc   : > { %v775_v22 = vpack.c.bf16 %v849_v20, %v848_v16  ;;  %v388_v23 = vpop.f32.mrb[3].mxu0  ;;  %v795_v24 = vpack.c.bf16 %v857_v21, %v856_v17  ;;  %v420_v25 = vpop.f32.mrb[3].mxu1  ;;  %v472_v34 = vmul.f32 %v849_v20, %v849_v20  ;;  %v480_v6 = vmul.f32 %v857_v21, %v857_v21 }
  0xfd   : > { %v448_v27 = vadd.f32 %v388_v23, %v385_v18  ;;  %v470_v28 = vmul.f32 %v388_v23, %v388_v23  ;;  %v770_v29 = vpack.c.bf16 %v388_v23, %v385_v18  ;;  %v790_v30 = vpack.c.bf16 %v420_v25, %v417_v19 }
  0xfe   : > { %807 = vst [vmem:[%s993_s14 + $0x8] sm:$0xff] %v775_v22   ;;  %811 = vst [vmem:[%s993_s14 + $0x28] sm:$0xff] %v795_v24   ;;  %v478_v2 = vmul.f32 %v420_v25, %v420_v25 }
  0xff   : > { %v449_v32 = vadd.f32 %v848_v16, %v448_v27  ;;  %v485_v33 = vadd.f32 %v470_v28, %v469_v26  ;;  %771 = vst [vmem:[%s993_s14] sm:$0xff] %v770_v29   ;;  %810 = vst [vmem:[%s993_s14 + $0x20] sm:$0xff] %v790_v30  }
 0x101   : > { %v486_v35 = vadd.f32 %v485_v33, %v471_v31  ;;  %v852_v36 = vpop.f32.mrb[4].mxu0  ;;  %v450_v37 = vadd.f32 %v849_v20, %v449_v32  ;;  %v860_v38 = vpop.f32.mrb[4].mxu1 }
 0x102   : > { %v401_v39 = vpop.f32.mrb[5].mxu0  ;;  %v433_v40 = vpop.f32.mrb[5].mxu1  ;;  %v475_v55 = vmul.f32 %v852_v36, %v852_v36  ;;  %v483_v15 = vmul.f32 %v860_v38, %v860_v38 }
 0x103   : > { %v451_v41 = vadd.f32 %v450_v37, %v401_v39  ;;  %v473_v42 = vmul.f32 %v401_v39, %v401_v39  ;;  %v487_v43 = vadd.f32 %v486_v35, %v472_v34  ;;  %v853_v44 = vpop.f32.mrb[6].mxu0  ;;  %v861_v45 = vpop.f32.mrb[6].mxu1  ;;  %v481_v9 = vmul.f32 %v433_v40, %v433_v40 }
 0x104   : > { %v785_v46 = vpack.c.bf16 %v853_v44, %v852_v36  ;;  %v404_v47 = vpop.f32.mrb[7].mxu0  ;;  %v805_v48 = vpack.c.bf16 %v861_v45, %v860_v38  ;;  %v436_v49 = vpop.f32.mrb[7].mxu1  ;;  %v476_v58 = vmul.f32 %v853_v44, %v853_v44 }
 0x105   : > { %v488_v50 = vadd.f32 %v487_v43, %v473_v42  ;;  %v452_v51 = vadd.f32 %v451_v41, %v404_v47  ;;  %v474_v52 = vmul.f32 %v404_v47, %v404_v47  ;;  %v780_v53 = vpack.c.bf16 %v404_v47, %v401_v39 }
 0x106   : > { %809 = vst [vmem:[%s993_s14 + $0x18] sm:$0xff] %v785_v46   ;;  %813 = vst [vmem:[%s993_s14 + $0x38] sm:$0xff] %v805_v48   ;;  %v800_v54 = vpack.c.bf16 %v436_v49, %v433_v40  ;;  %v482_v14 = vmul.f32 %v436_v49, %v436_v49 }
 0x107   : > { %v453_v56 = vadd.f32 %v852_v36, %v452_v51  ;;  %v489_v57 = vadd.f32 %v488_v50, %v474_v52  ;;  %808 = vst [vmem:[%s993_s14 + $0x10] sm:$0xff] %v780_v53  }
 0x108   : > { %812 = vst [vmem:[%s993_s14 + $0x30] sm:$0xff] %v800_v54  }
 0x109   : > { %v490_v59 = vadd.f32 %v489_v57, %v475_v55  ;;  %v454_v60 = vadd.f32 %v853_v44, %v453_v56 }
 0x10b   : > { %v455_v62 = vadd.f32 %v454_v60, %v417_v19  ;;  %v491_v63 = vadd.f32 %v490_v59, %v476_v58  ;;  %v484_v19 = vmul.f32 %v861_v45, %v861_v45 }
 0x10d   : > { %v492_v0 = vadd.f32 %v491_v63, %v477_v61  ;;  %v456_v1 = vadd.f32 %v455_v62, %v420_v25 }
 0x10f   : > { %v457_v4 = vadd.f32 %v856_v17, %v456_v1  ;;  %v493_v5 = vadd.f32 %v492_v0, %v478_v2 }
 0x111   : > { %v494_v7 = vadd.f32 %v493_v5, %v479_v3  ;;  %v458_v8 = vadd.f32 %v857_v21, %v457_v4 }
 0x113   : > { %v459_v10 = vadd.f32 %v458_v8, %v433_v40  ;;  %v495_v11 = vadd.f32 %v494_v7, %v480_v6 }
 0x115   : > { %v496_v12 = vadd.f32 %v495_v11, %v481_v9  ;;  %v460_v13 = vadd.f32 %v459_v10, %v436_v49 }
 0x117   : > { %v461_v16 = vadd.f32 %v860_v38, %v460_v13  ;;  %v497_v18 = vadd.f32 %v496_v12, %v482_v14 }
 0x119   : > { %v462_v20 = vadd.f32 %v861_v45, %v461_v16  ;;  %v498_v22 = vadd.f32 %v497_v18, %v483_v15 }
 0x11b   : > { %v463_v23 = vrot.slane %v462_v20, 4  ;;  %v499_v17 = vadd.f32 %v498_v22, %v484_v19 }
 0x11d   : > { %v464_v24 = vadd.f32 %v463_v23, %v462_v20  ;;  %v500_v25 = vrot.slane %v499_v17, 4 }
 0x11f   : > { %v465_v21 = vrot.slane %v464_v24, 2  ;;  %v501_v26 = vadd.f32 %v500_v25, %v499_v17 }
 0x121   : > { %v466_v27 = vadd.f32 %v465_v21, %v464_v24  ;;  %v502_v28 = vrot.slane %v501_v26, 2 }
 0x123   : > { %v467_v29 = vrot.slane %v466_v27, 1  ;;  %v503_v30 = vadd.f32 %v502_v28, %v501_v26 }
 0x125   : > { %v468_v31 = vadd.f32 %v467_v29, %v466_v27  ;;  %v504_v32 = vrot.slane %v503_v30, 1 }
 0x127   : > { %v505_v33 = vadd.f32 %v504_v32, %v503_v30  ;;  %586 = vst [vmem:[%s217_s20] sm:$0xff] %v468_v31 }
 0x129   : > { %587 = vst [vmem:[%s221_s23] sm:$0xff] %v505_v33 }
 0x12a PF: > { %s15_s15 = sadd.s32 1, %s908_s15  }
 0x12b   : > { %p12_p5 = scmp.ge.s32.totalorder %s15_s15, 4  }
 0x12d   :  { %14 = sbr.rel (!%p12_p5) target bundleno = 1 (0x1), region = 82 }

// kernel: _forward_impl.16
= control target key start
LH: loop header
LB: loop body
LE: loop exit
PB: predicated region body
PF: predicated region fallthrough
CT: control target
= control target key end

     0   :  { %s637_s15 = smov 0   ;;  %s692_s0 = inlined_call_operand.vmem [shape: bf16[64,128], index: 0, kind: input, shape index: {}]   ;;  %s693_s1 = inlined_call_operand.vmem [shape: bf16[128,128], index: 1, kind: input, shape index: {}]   ;;  %s694_s2 = inlined_call_operand.vmem [shape: bf16[64,128], index: 2, kind: output, shape index: {0}]   ;;  %s695_s3 = inlined_call_operand.vmem [shape: f32[16,128], index: 3, kind: output, shape index: {1}]   ;;  %s696_s4 = inlined_call_operand.vmem [shape: f32[16,128], index: 4, kind: output, shape index: {2}]  }
   0x1 LB: > { %s643_s16 = sadd.s32 4294967295, %s610_s15   ;;  %p518_p0 = scmp.ge.s32.totalorder %s610_s15, 1  ;;  %s610_s15 = sphi %s637_s15, %s15_s15  }
   0x2   : > { %p168_p1 = scmp.lt.s32.totalorder %s610_s15, 3 }
   0x4   : > { %p169_p2 = pnand %p518_p0, %p168_p1 }
   0x5   : > { %v594_v0 = vld [vmem:[%s693_s1] sm:$0xff] (!%p169_p2)   ;;  %s519_s19 = sshll.u32 (!%p169_p2), %s643_s16, 2  ;;  %v595_v1 = vld [vmem:[%s693_s1 + $0x8] sm:$0xff] (!%p169_p2)   ;;  %v596_v2 = vld [vmem:[%s693_s1 + $0x10] sm:$0xff] (!%p169_p2)   ;;  %p214_p4 = scmp.lt.s32.totalorder (!%p169_p2), %s643_s16, 1 }
   0x6   : > { %172 = sbr.rel (%p169_p2) target bundleno = 274 (0x112), region = 28  ;;  %p203_p3 = scmp.lt.s32.totalorder (!%p169_p2), %s519_s19, 7  ;;  %566 = vmatprep.subr.bf16.mxu0 (!%p169_p2), %v594_v0  ;;  %v597_v3 = vld [vmem:[%s693_s1 + $0x18] sm:$0xff] (!%p169_p2)   ;;  %v598_v5 = vld [vmem:[%s693_s1 + $0x20] sm:$0xff] (!%p169_p2)   ;;  %v599_v6 = vld [vmem:[%s693_s1 + $0x28] sm:$0xff] (!%p169_p2)  }
   0x7   : > { %567 = vmatpush3.bf16.msra.mxu0 (!%p169_p2), %v594_v0  ;;  %v600_v7 = vld [vmem:[%s693_s1 + $0x30] sm:$0xff] (!%p169_p2)   ;;  %v601_v8 = vld [vmem:[%s693_s1 + $0x38] sm:$0xff] (!%p169_p2)  }
   0x8   : > { %568 = vmatprep.subr.bf16.mxu0 (!%p169_p2), %v595_v1 }
   0xb   : > { %569 = vmatpush3.bf16.msra.mxu0 (!%p169_p2), %v595_v1 }
   0xc   : > { %570 = vmatprep.subr.bf16.mxu0 (!%p169_p2), %v596_v2 }
   0xd   : > { %s698_s19 = smov (!%p203_p3, %s519_s19), 7  ;;  %s700_s16 = smov (!%p214_p4, %s643_s16), 1 }
   0xe   : > { %s520_s24 = sshll.u32 %s698_s19, 2  ;;  %s523_s17 = sshll.u32 %s700_s16, 3 }
   0xf   : > { %s206_s27 = scalar_lea.vmem %s692_s0, %s520_s24  ;;  %571 = vmatpush3.bf16.msra.mxu0 %v596_v2  ;;  %s212_s14 = scalar_lea.vmem %s694_s2, %s520_s24 }
  0x10   : > { %v602_v4 = vld [vmem:[%s206_s27] sm:$0xff]   ;;  %572 = vmatprep.subr.bf16.mxu0 %v597_v3  ;;  %v603_v9 = vld [vmem:[%s206_s27 + $0x8] sm:$0xff]   ;;  %s217_s20 = scalar_lea.vmem %s695_s3, %s523_s17  ;;  %s221_s23 = scalar_lea.vmem %s696_s4, %s523_s17 }
  0x11   : > { %582 = vmatprep.mubr.bf16.mxu0 %v602_v4 }
  0x13   : > { %573 = vmatpush3.bf16.msra.mxu0 %v597_v3 }
  0x14   : > { %574 = vmatprep.subr.bf16.mxu0 %v598_v5 }
  0x17   : > { %575 = vmatpush3.bf16.msra.mxu0 %v598_v5 }
  0x18   : > { %576 = vmatprep.subr.bf16.mxu0 %v599_v6 }
  0x1b   : > { %577 = vmatpush3.bf16.msra.mxu0 %v599_v6 }
  0x1c   : > { %578 = vmatprep.subr.bf16.mxu0 %v600_v7 }
  0x1f   : > { %579 = vmatpush3.bf16.msra.mxu0 %v600_v7 }
  0x20   : > { %580 = vmatprep.subr.bf16.mxu0 %v601_v8 }
  0x23   : > { %581 = vmatpush3.bf16.msra.mxu0 %v601_v8 }
  0x26   : > { %583 = vmatmul.mubr.bf16.vlgmr.msra.gmra.mrb[0].mxu0 %v603_v9 }
  0xf9   : > { %v584_v10 = vpop.f32.mrb[0].mxu0 }
  0xfa   : > { %v337_v11 = vpop.f32.mrb[1].mxu0  ;;  %v363_v19 = vmul.f32 %v584_v10, %v584_v10 }
  0xfb   : > { %v585_v12 = vpop.f32.mrb[2].mxu0  ;;  %v361_v15 = vmul.f32 %v337_v11, %v337_v11 }
  0xfc   : > { %v553_v13 = vpack.c.bf16 %v585_v12, %v584_v10  ;;  %v340_v14 = vpop.f32.mrb[3].mxu0  ;;  %v364_v22 = vmul.f32 %v585_v12, %v585_v12 }
  0xfd   : > { %v352_v16 = vadd.f32 %v340_v14, %v337_v11  ;;  %v362_v17 = vmul.f32 %v340_v14, %v340_v14  ;;  %v548_v18 = vpack.c.bf16 %v340_v14, %v337_v11 }
  0xfe   : > { %555 = vst [vmem:[%s212_s14 + $0x8] sm:$0xff] %v553_v13  }
  0xff   : > { %v353_v20 = vadd.f32 %v584_v10, %v352_v16  ;;  %v365_v21 = vadd.f32 %v362_v17, %v361_v15  ;;  %549 = vst [vmem:[%s212_s14] sm:$0xff] %v548_v18  }
 0x101   : > { %v354_v23 = vadd.f32 %v585_v12, %v353_v20  ;;  %v366_v24 = vadd.f32 %v365_v21, %v363_v19 }
 0x103   : > { %v355_v25 = vrot.slane %v354_v23, 4  ;;  %v367_v26 = vadd.f32 %v366_v24, %v364_v22 }
 0x105   : > { %v356_v27 = vadd.f32 %v355_v25, %v354_v23  ;;  %v368_v28 = vrot.slane %v367_v26, 4 }
 0x107   : > { %v357_v29 = vrot.slane %v356_v27, 2  ;;  %v369_v30 = vadd.f32 %v368_v28, %v367_v26 }
 0x109   : > { %v358_v31 = vadd.f32 %v357_v29, %v356_v27  ;;  %v370_v32 = vrot.slane %v369_v30, 2 }
 0x10b   : > { %v359_v33 = vrot.slane %v358_v31, 1  ;;  %v371_v34 = vadd.f32 %v370_v32, %v369_v30 }
 0x10d   : > { %v360_v35 = vadd.f32 %v359_v33, %v358_v31  ;;  %v372_v36 = vrot.slane %v371_v34, 1 }
 0x10f   : > { %v373_v37 = vadd.f32 %v372_v36, %v371_v34  ;;  %394 = vst [vmem:[%s217_s20] sm:$0xff] %v360_v35 }
 0x111   : > { %395 = vst [vmem:[%s221_s23] sm:$0xff] %v373_v37 }
 0x112 PF: > { %s15_s15 = sadd.s32 1, %s610_s15  }
 0x113   : > { %p12_p5 = scmp.ge.s32.totalorder %s15_s15, 4  }
 0x115   :  { %14 = sbr.rel (!%p12_p5) target bundleno = 1 (0x1), region = 82 }

// kernel: _forward_impl.17
= control target key start
LH: loop header
LB: loop body
LE: loop exit
PB: predicated region body
PF: predicated region fallthrough
CT: control target
= control target key end

     0   :  { %s369_s12 = smov 0   ;;  %s392_s0 = inlined_call_operand.vmem [shape: bf16[64,128], index: 0, kind: input, shape index: {}]   ;;  %s393_s1 = inlined_call_operand.vmem [shape: f32[1,128], index: 1, kind: input, shape index: {}]   ;;  %s394_s2 = inlined_call_operand.vmem [shape: f32[1,128], index: 2, kind: input, shape index: {}]   ;;  %s395_s3 = inlined_call_operand.vmem [shape: bf16[64,128], index: 3, kind: output, shape index: {}]  }
   0x1 LB: > { %s292_s13 = sadd.s32 4294967295, %s347_s12   ;;  %p296_p0 = scmp.ge.s32.totalorder %s347_s12, 1  ;;  %s347_s12 = sphi %s369_s12, %s13_s12  }
   0x2   : > { %p138_p1 = scmp.lt.s32.totalorder %s347_s12, 3 }
   0x4   : > { %p139_p2 = pnand %p296_p0, %p138_p1 }
   0x5   : > { %s297_s14 = sshll.u32 (!%p139_p2), %s292_s13, 2  ;;  %v301_v2 = vld [vmem:[%s393_s1] ss:$0 sm:$0xff] (!%p139_p2) }
   0x6   : > { %142 = sbr.rel (%p139_p2) target bundleno = 30 (0x1e), region = 32  ;;  %p163_p3 = scmp.lt.s32.totalorder (!%p139_p2), %s297_s14, 7  ;;  %v302_v7 = vld [vmem:[%s394_s2] ss:$0 sm:$0xff] (!%p139_p2) }
   0xd   : > { %s397_s14 = smov (!%p163_p3, %s297_s14), 7 }
   0xe   : > { %s298_s15 = sshll.u32 %s397_s14, 2 }
   0xf   : > { %s166_s18 = scalar_lea.vmem %s392_s0, %s298_s15  ;;  %s172_s25 = scalar_lea.vmem %s395_s3, %s298_s15 }
  0x10   : > { %v314_v0 = vld [vmem:[%s166_s18] sm:$0xff]   ;;  %v331_v1 = vld [vmem:[%s166_s18 + $0x8] sm:$0xff]  }
  0x11   : > { %v315_v3 = vunpack.c.l.bf16 %v314_v0  ;;  %v316_v4 = vunpack.c.h.bf16 %v314_v0  ;;  %v319_v5 = vunpack.c.l.bf16 %v331_v1  ;;  %v320_v6 = vunpack.c.h.bf16 %v331_v1 }
  0x13   : > { %v189_v8 = vmul.f32 %v315_v3, %v301_v2  ;;  %v190_v9 = vmul.f32 %v316_v4, %v301_v2  ;;  %v191_v10 = vmul.f32 %v319_v5, %v301_v2  ;;  %v192_v11 = vmul.f32 %v320_v6, %v301_v2 }
  0x15   : > { %v200_v12 = vadd.f32 %v302_v7, %v189_v8  ;;  %v201_v13 = vadd.f32 %v302_v7, %v190_v9  ;;  %v202_v14 = vadd.f32 %v302_v7, %v191_v10  ;;  %v203_v15 = vadd.f32 %v302_v7, %v192_v11 }
  0x17   : > { %vm204_vm0 = vcmp.ge.f32.partialorder %v200_v12, 0.0  ;;  %vm205_vm1 = vcmp.ge.f32.partialorder %v201_v13, 0.0  ;;  %v208_v16 = vmul.f32 0.2, %v200_v12  ;;  %v209_v17 = vmul.f32 0.2, %v201_v13 }
  0x18   : > { %vm206_vm2 = vcmp.ge.f32.partialorder %v202_v14, 0.0  ;;  %vm207_vm3 = vcmp.ge.f32.partialorder %v203_v15, 0.0  ;;  %v210_v18 = vmul.f32 0.2, %v202_v14  ;;  %v211_v19 = vmul.f32 0.2, %v203_v15 }
  0x19   : > { %v212_v20 = vsel %vm204_vm0, %v200_v12, %v208_v16  ;;  %v213_v21 = vsel %vm205_vm1, %v201_v13, %v209_v17 }
  0x1a   : > { %v324_v22 = vpack.c.bf16 %v213_v21, %v212_v20  ;;  %v214_v23 = vsel %vm206_vm2, %v202_v14, %v210_v18  ;;  %v215_v24 = vsel %vm207_vm3, %v203_v15, %v211_v19 }
  0x1b   : > { %v329_v25 = vpack.c.bf16 %v215_v24, %v214_v23 }
  0x1c   : > { %325 = vst [vmem:[%s172_s25] sm:$0xff] %v324_v22  }
  0x1d   : > { %332 = vst [vmem:[%s172_s25 + $0x8] sm:$0xff] %v329_v25  }
  0x1e PF: > { %s13_s12 = sadd.s32 1, %s347_s12  }
  0x1f   : > { %p10_p4 = scmp.ge.s32.totalorder %s13_s12, 4  }
  0x21   :  { %12 = sbr.rel (!%p10_p4) target bundleno = 1 (0x1), region = 62 }

// kernel: _forward_impl.18
= control target key start
LH: loop header
LB: loop body
LE: loop exit
PB: predicated region body
PF: predicated region fallthrough
CT: control target
= control target key end

     0   :  { %s638_s15 = smov 0   ;;  %s718_s0 = inlined_call_operand.vmem [shape: bf16[16,256], index: 0, kind: input, shape index: {}]   ;;  %s719_s1 = inlined_call_operand.vmem [shape: bf16[256,128], index: 1, kind: input, shape index: {}]   ;;  %s720_s2 = inlined_call_operand.vmem [shape: bf16[16,128], index: 2, kind: output, shape index: {0}]   ;;  %s721_s3 = inlined_call_operand.vmem [shape: f32[16,128], index: 3, kind: output, shape index: {1}]   ;;  %s722_s4 = inlined_call_operand.vmem [shape: f32[16,128], index: 4, kind: output, shape index: {2}]  }
   0x1 LB: > { %s526_s16 = sadd.s32 4294967295, %s611_s15   ;;  %p530_p0 = scmp.ge.s32.totalorder %s611_s15, 1  ;;  %s611_s15 = sphi %s638_s15, %s15_s15  }
   0x2   : > { %p167_p1 = scmp.lt.s32.totalorder %s611_s15, 3 }
   0x4   : > { %p168_p2 = pnand %p530_p0, %p167_p1 }
   0x5   : > { %v587_v0 = vld [vmem:[%s719_s1 + $0x40] sm:$0xff] (!%p168_p2)   ;;  %v589_v2 = vld [vmem:[%s719_s1 + $0x48] sm:$0xff] (!%p168_p2)   ;;  %p200_p3 = scmp.lt.s32.totalorder (!%p168_p2), %s526_s16, 1  ;;  %v591_v4 = vld [vmem:[%s719_s1 + $0x50] sm:$0xff] (!%p168_p2)  }
   0x6   : > { %171 = sbr.rel (%p168_p2) target bundleno = 268 (0x10c), region = 28  ;;  %v588_v1 = vld [vmem:[%s719_s1] sm:$0xff] (!%p168_p2)   ;;  %557 = vmatprep.subr.bf16.mxu0 (!%p168_p2), %v587_v0  ;;  %v590_v3 = vld [vmem:[%s719_s1 + $0x8] sm:$0xff] (!%p168_p2)   ;;  %v592_v5 = vld [vmem:[%s719_s1 + $0x10] sm:$0xff] (!%p168_p2)  }
   0x7   : > { %558 = vmatpush3.bf16.msra.mxu0 (!%p168_p2), %v588_v1  ;;  %v593_v6 = vld [vmem:[%s719_s1 + $0x58] sm:$0xff] (!%p168_p2)   ;;  %v595_v8 = vld [vmem:[%s719_s1 + $0x60] sm:$0xff] (!%p168_p2)   ;;  %v597_v10 = vld [vmem:[%s719_s1 + $0x68] sm:$0xff] (!%p168_p2)  }
   0x8   : > { %559 = vmatprep.subr.bf16.mxu0 (!%p168_p2), %v589_v2  ;;  %v594_v7 = vld [vmem:[%s719_s1 + $0x18] sm:$0xff] (!%p168_p2)   ;;  %v596_v9 = vld [vmem:[%s719_s1 + $0x20] sm:$0xff] (!%p168_p2)   ;;  %v598_v13 = vld [vmem:[%s719_s1 + $0x28] sm:$0xff] (!%p168_p2)  }
   0x9   : > { %v599_v14 = vld [vmem:[%s719_s1 + $0x70] sm:$0xff] (!%p168_p2)   ;;  %v601_v16 = vld [vmem:[%s719_s1 + $0x78] sm:$0xff] (!%p168_p2)  }
   0xa   : > { %v600_v15 = vld [vmem:[%s719_s1 + $0x30] sm:$0xff] (!%p168_p2)   ;;  %v602_v17 = vld [vmem:[%s719_s1 + $0x38] sm:$0xff] (!%p168_p2)  }
   0xb   : > { %560 = vmatpush3.bf16.msra.mxu0 (!%p168_p2), %v590_v3 }
   0xc   : > { %561 = vmatprep.subr.bf16.mxu0 (!%p168_p2), %v591_v4 }
   0xd   : > { %s724_s16 = smov (!%p200_p3, %s526_s16), 1 }
   0xe   : > { %s670_s5 = sshll.u32 %s724_s16, 3  ;;  %s533_s29 = sshll.u32 %s724_s16, 2 }
   0xf   : > { %562 = vmatpush3.bf16.msra.mxu0 %v592_v5  ;;  %s204_s12 = scalar_lea.vmem %s718_s0, %s670_s5  ;;  %s208_s7 = scalar_lea.vmem %s720_s2, %s533_s29 }
  0x10   : > { %563 = vmatprep.subr.bf16.mxu0 %v593_v6  ;;  %v218_v11 = vld [vmem:[%s204_s12] sm:$0xff]  ;;  %s212_s9 = scalar_lea.vmem %s721_s3, %s670_s5  ;;  %s216_s12 = scalar_lea.vmem %s722_s4, %s670_s5 }
  0x11   : > { %v537_v12 = vcombine.high %v218_v11, %v218_v11  ;;  %v536_v18 = vcombine.low %v218_v11, %v218_v11 }
  0x13   : > { %564 = vmatpush3.bf16.msra.mxu0 %v594_v7  ;;  %386 = vmatprep.mubr.bf16.mxu0 %v537_v12 }
  0x14   : > { %565 = vmatprep.subr.bf16.mxu0 %v595_v8 }
  0x17   : > { %566 = vmatpush3.bf16.msra.mxu0 %v596_v9 }
  0x18   : > { %567 = vmatprep.subr.bf16.mxu0 %v597_v10 }
  0x1b   : > { %568 = vmatpush3.bf16.msra.mxu0 %v598_v13 }
  0x1c   : > { %569 = vmatprep.subr.bf16.mxu0 %v599_v14 }
  0x1f   : > { %570 = vmatpush3.bf16.msra.mxu0 %v600_v15 }
  0x20   : > { %571 = vmatprep.subr.bf16.mxu0 %v601_v16 }
  0x23   : > { %572 = vmatpush3.bf16.msra.mxu0 %v602_v17 }
  0x26   : > { %387 = vmatmul.mubr.bf16.vlgmr.msra.gmra.mrb[0].mxu0 %v536_v18 }
  0xf9   : > { %v573_v19 = vpop.f32.mrb[0].mxu0 }
  0xfa   : > { %v574_v20 = vpop.f32.mrb[1].mxu0 }
  0xfb   : > { %v575_v21 = vadd.f32 %v574_v20, %v573_v19  ;;  %v576_v22 = vpop.f32.mrb[2].mxu0 }
  0xfc   : > { %v577_v23 = vpop.f32.mrb[3].mxu0 }
  0xfd   : > { %v394_v24 = vrot.slane %v575_v21, 4  ;;  %v400_v25 = vmul.f32 %v575_v21, %v575_v21  ;;  %v407_v26 = vpack.c.bf16 %v575_v21, %v575_v21 }
  0xff   : > { %v395_v27 = vadd.f32 %v575_v21, %v394_v24  ;;  %v401_v28 = vrot.slane %v400_v25, 4  ;;  %408 = vst [vmem:[%s208_s7] sm:$0xf] %v407_v26 }
 0x101   : > { %v396_v29 = vrot.slane %v395_v27, 2  ;;  %v402_v30 = vadd.f32 %v401_v28, %v400_v25 }
 0x103   : > { %v397_v31 = vadd.f32 %v396_v29, %v395_v27  ;;  %v403_v32 = vrot.slane %v402_v30, 2 }
 0x105   : > { %v398_v33 = vrot.slane %v397_v31, 1  ;;  %v404_v34 = vadd.f32 %v403_v32, %v402_v30 }
 0x107   : > { %v399_v35 = vadd.f32 %v398_v33, %v397_v31  ;;  %v405_v36 = vrot.slane %v404_v34, 1 }
 0x109   : > { %v406_v37 = vadd.f32 %v405_v36, %v404_v34  ;;  %409 = vst [vmem:[%s212_s9] sm:$0xff] %v399_v35 }
 0x10b   : > { %410 = vst [vmem:[%s216_s12] sm:$0xff] %v406_v37 }
 0x10c PF: > { %s15_s15 = sadd.s32 1, %s611_s15  }
 0x10d   : > { %p12_p4 = scmp.ge.s32.totalorder %s15_s15, 4  }
 0x10f   :  { %14 = sbr.rel (!%p12_p4) target bundleno = 1 (0x1), region = 82 }

// kernel: _forward_impl.19
= control target key start
LH: loop header
LB: loop body
LE: loop exit
PB: predicated region body
PF: predicated region fallthrough
CT: control target
= control target key end

     0   :  { %s265_s12 = smov 0   ;;  %s301_s0 = inlined_call_operand.vmem [shape: bf16[16,128], index: 0, kind: input, shape index: {}]   ;;  %s302_s1 = inlined_call_operand.vmem [shape: f32[1,128], index: 1, kind: input, shape index: {}]   ;;  %s303_s2 = inlined_call_operand.vmem [shape: f32[1,128], index: 2, kind: input, shape index: {}]   ;;  %s304_s3 = inlined_call_operand.vmem [shape: bf16[16,128], index: 3, kind: output, shape index: {}]  }
   0x1 LB: > { %s242_s13 = sadd.s32 4294967295, %s267_s12   ;;  %p246_p0 = scmp.ge.s32.totalorder %s267_s12, 1  ;;  %s267_s12 = sphi %s265_s12, %s13_s12  }
   0x2   : > { %p136_p1 = scmp.lt.s32.totalorder %s267_s12, 3 }
   0x4   : > { %p137_p2 = pnand %p246_p0, %p136_p1 }
   0x5   : > { %p158_p3 = scmp.lt.s32.totalorder (!%p137_p2), %s242_s13, 1  ;;  %v249_v1 = vld [vmem:[%s302_s1] ss:$0 sm:$0xff] (!%p137_p2) }
   0x6   : > { %140 = sbr.rel (%p137_p2) target bundleno = 29 (0x1d), region = 32  ;;  %v250_v3 = vld [vmem:[%s303_s2] ss:$0 sm:$0xff] (!%p137_p2) }
   0xd   : > { %s306_s13 = smov (!%p158_p3, %s242_s13), 1 }
   0xe   : > { %s247_s14 = sshll.u32 %s306_s13, 2 }
   0xf   : > { %s161_s17 = scalar_lea.vmem %s301_s0, %s247_s14  ;;  %s165_s24 = scalar_lea.vmem %s304_s3, %s247_s14 }
  0x10   : > { %v166_v0 = vld [vmem:[%s161_s17] sm:$0xf] }
  0x11   : > { %v167_v2 = vunpack.c.l.bf16 %v166_v0 }
  0x13   : > { %v175_v4 = vmul.f32 %v249_v1, %v167_v2 }
  0x15   : > { %v183_v5 = vadd.f32 %v250_v3, %v175_v4 }
  0x17   : > { %vm184_vm0 = vcmp.ge.f32.partialorder %v183_v5, 0.0  ;;  %v185_v6 = vmul.f32 0.2, %v183_v5 }
  0x19   : > { %v186_v7 = vsel %vm184_vm0, %v183_v5, %v185_v6 }
  0x1a   : > { %v187_v8 = vpack.c.bf16 %v186_v7, %v186_v7 }
  0x1c   : > { %188 = vst [vmem:[%s165_s24] sm:$0xf] %v187_v8 }
  0x1d PF: > { %s13_s12 = sadd.s32 1, %s267_s12  }
  0x1e   : > { %p10_p4 = scmp.ge.s32.totalorder %s13_s12, 4  }
  0x20   :  { %12 = sbr.rel (!%p10_p4) target bundleno = 1 (0x1), region = 62 }

// kernel: _forward_impl.21
= control target key start
LH: loop header
LB: loop body
LE: loop exit
PB: predicated region body
PF: predicated region fallthrough
CT: control target
= control target key end

     0   :  { %v180_v0 = vmov 0.0   ;;  %vm181_vm0 = vmmov 0   ;;  %s235_s1 = inlined_call_operand.vmem [shape: bf16[128,128], index: 1, kind: input, shape index: {}]   ;;  %s236_s0 = inlined_call_operand.vmem [shape: bf16[8,128], index: 0, kind: input, shape index: {}]   ;;  %s237_s2 = inlined_call_operand.vmem [shape: f32[1,128], index: 2, kind: input, shape index: {}]   ;;  %s238_s3 = inlined_call_operand.vmem [shape: f32[8,128], index: 3, kind: output, shape index: {}]  }
   0x1   :  { %150 = vmatprep.subr.bf16.mxu0 %v180_v0  ;;  %v172_v1 = vld [vmem:[%s235_s1] sm:$0xff]   ;;  %166 = vmatprep.mubr.msk.bf16.mxu0 %vm181_vm0, %v180_v0  ;;  %v173_v2 = vld [vmem:[%s235_s1 + $0x8] sm:$0xff]   ;;  %v174_v3 = vld [vmem:[%s235_s1 + $0x10] sm:$0xff]  }
   0x2   :  { %151 = vmatpush3.bf16.msra.mxu0 %v172_v1  ;;  %v175_v4 = vld [vmem:[%s235_s1 + $0x18] sm:$0xff]   ;;  %v176_v5 = vld [vmem:[%s235_s1 + $0x20] sm:$0xff]   ;;  %v177_v6 = vld [vmem:[%s235_s1 + $0x28] sm:$0xff]  }
   0x3   :  { %152 = vmatprep.subr.bf16.mxu0 %v180_v0  ;;  %v178_v7 = vld [vmem:[%s235_s1 + $0x30] sm:$0xff]   ;;  %v179_v8 = vld [vmem:[%s235_s1 + $0x38] sm:$0xff]   ;;  %v15_v9 = vld [vmem:[%s236_s0] sm:$0xf] }
   0x4   :  { %v132_v10 = vld [vmem:[%s237_s2] ss:$0 sm:$0xff] }
   0x6   :  { %153 = vmatpush3.bf16.msra.mxu0 %v173_v2 }
   0x7   :  { %154 = vmatprep.subr.bf16.mxu0 %v180_v0 }
   0xa   :  { %155 = vmatpush3.bf16.msra.mxu0 %v174_v3 }
   0xb   :  { %156 = vmatprep.subr.bf16.mxu0 %v180_v0 }
   0xe   :  { %157 = vmatpush3.bf16.msra.mxu0 %v175_v4 }
   0xf   :  { %158 = vmatprep.subr.bf16.mxu0 %v180_v0 }
  0x12   :  { %159 = vmatpush3.bf16.msra.mxu0 %v176_v5 }
  0x13   :  { %160 = vmatprep.subr.bf16.mxu0 %v180_v0 }
  0x16   :  { %161 = vmatpush3.bf16.msra.mxu0 %v177_v6 }
  0x17   :  { %162 = vmatprep.subr.bf16.mxu0 %v180_v0 }
  0x1a   :  { %163 = vmatpush3.bf16.msra.mxu0 %v178_v7 }
  0x1b   :  { %164 = vmatprep.subr.bf16.mxu0 %v180_v0 }
  0x1e   :  { %165 = vmatpush3.bf16.msra.mxu0 %v179_v8 }
  0x21   :  { %167 = vmatmul.mubr.bf16.vlgmr.msra.gmra.mrb[0].mxu0 %v15_v9 }
  0xf4   :  { %v121_v11 = vpop.f32.mrb[0].mxu0 }
  0xf5   :  { %v122_v12 = vadd.f32 %v132_v10, %v121_v11  ;;  %v168_v13 = vpop.f32.mrb[1].mxu0 }
  0xf6   :  { %v124_v14 = vpop.f32.mrb[2].mxu0 }
  0xf7   :  { %127 = vst [vmem:[%s238_s3] sm:$0xff] %v122_v12  ;;  %v169_v15 = vpop.f32.mrb[3].mxu0 }

// kernel: _forward_impl.20
= control target key start
LH: loop header
LB: loop body
LE: loop exit
PB: predicated region body
PF: predicated region fallthrough
CT: control target
= control target key end

     0   :  { %v55_v35 = vlaneseq  ;;  %s529_s1 = inlined_call_operand.vmem [shape: bf16[256,256], index: 1, kind: input, shape index: {}]   ;;  %s530_s0 = inlined_call_operand.vmem [shape: bf16[8,256], index: 0, kind: input, shape index: {}]   ;;  %s531_s2 = inlined_call_operand.vmem [shape: f32[1,256], index: 2, kind: input, shape index: {}]   ;;  %s532_s4 = inlined_call_operand.vmem [shape: f32[8,128], index: 4, kind: output, shape index: {0}]   ;;  %s533_s5 = inlined_call_operand.vmem [shape: f32[8,128], index: 5, kind: output, shape index: {1}]   ;;  %s534_s3 = inlined_call_operand.vmem [shape: f32[8,128], index: 3, kind: input, shape index: {}]   ;;  %s535_s6 = inlined_call_operand.vmem [shape: f32[8,128], index: 6, kind: output, shape index: {2}]  }
   0x1   :  { %v328_v0 = vld [vmem:[%s529_s1 + $0x4] ss:$8 sps:$4 sm:$0xff]   ;;  %v330_v1 = vld [vmem:[%s529_s1] ss:$8 sps:$4 sm:$0xff]   ;;  %v331_v2 = vld [vmem:[%s529_s1 + $0x14] ss:$8 sps:$4 sm:$0xff]  }
   0x2   :  { %232 = vmatprep.subr.bf16.mxu0 %v328_v0  ;;  %v333_v3 = vld [vmem:[%s529_s1 + $0x10] ss:$8 sps:$4 sm:$0xff]   ;;  %v334_v4 = vld [vmem:[%s529_s1 + $0x24] ss:$8 sps:$4 sm:$0xff]   ;;  %v336_v5 = vld [vmem:[%s529_s1 + $0x20] ss:$8 sps:$4 sm:$0xff]  }
   0x3   :  { %233 = vmatpush1.bf16.msra.mxu0 %v330_v1  ;;  %v337_v6 = vld [vmem:[%s529_s1 + $0x34] ss:$8 sps:$4 sm:$0xff]   ;;  %v339_v7 = vld [vmem:[%s529_s1 + $0x30] ss:$8 sps:$4 sm:$0xff]   ;;  %v340_v8 = vld [vmem:[%s529_s1 + $0x44] ss:$8 sps:$4 sm:$0xff]  }
   0x4   :  { %234 = vmatprep.subr.bf16.mxu0 %v331_v2  ;;  %v342_v9 = vld [vmem:[%s529_s1 + $0x40] ss:$8 sps:$4 sm:$0xff]   ;;  %v343_v10 = vld [vmem:[%s529_s1 + $0x54] ss:$8 sps:$4 sm:$0xff]   ;;  %v345_v11 = vld [vmem:[%s529_s1 + $0x50] ss:$8 sps:$4 sm:$0xff]  }
   0x5   :  { %v346_v12 = vld [vmem:[%s529_s1 + $0x64] ss:$8 sps:$4 sm:$0xff]   ;;  %v348_v15 = vld [vmem:[%s529_s1 + $0x60] ss:$8 sps:$4 sm:$0xff]   ;;  %v349_v16 = vld [vmem:[%s529_s1 + $0x74] ss:$8 sps:$4 sm:$0xff]  }
   0x6   :  { %v20_v13 = vld [vmem:[%s530_s0] sm:$0xff]  ;;  %v351_v17 = vld [vmem:[%s529_s1 + $0x70] ss:$8 sps:$4 sm:$0xff]   ;;  %v355_v20 = vld [vmem:[%s529_s1 + $0x94] ss:$8 sps:$4 sm:$0xff]   ;;  %v56_v36 = vshrl.u32 %v55_v35, 7 }
   0x7   :  { %235 = vmatpush1.bf16.msra.mxu0 %v333_v3  ;;  %v295_v14 = vcombine.high %v20_v13, %v20_v13  ;;  %v352_v18 = vld [vmem:[%s529_s1 + $0x84] ss:$8 sps:$4 sm:$0xff]   ;;  %v354_v19 = vld [vmem:[%s529_s1 + $0x80] ss:$8 sps:$4 sm:$0xff]   ;;  %v357_v21 = vld [vmem:[%s529_s1 + $0x90] ss:$8 sps:$4 sm:$0xff]   ;;  %v294_v34 = vcombine.low %v20_v13, %v20_v13 }
   0x8   :  { %236 = vmatprep.subr.bf16.mxu0 %v334_v4  ;;  %v358_v22 = vld [vmem:[%s529_s1 + $0xa4] ss:$8 sps:$4 sm:$0xff]   ;;  %v360_v23 = vld [vmem:[%s529_s1 + $0xa0] ss:$8 sps:$4 sm:$0xff]   ;;  %v361_v24 = vld [vmem:[%s529_s1 + $0xb4] ss:$8 sps:$4 sm:$0xff]  }
   0x9   :  { %264 = vmatprep.mubr.bf16.mxu0 %v295_v14  ;;  %v363_v25 = vld [vmem:[%s529_s1 + $0xb0] ss:$8 sps:$4 sm:$0xff]   ;;  %v364_v26 = vld [vmem:[%s529_s1 + $0xc4] ss:$8 sps:$4 sm:$0xff]   ;;  %v366_v27 = vld [vmem:[%s529_s1 + $0xc0] ss:$8 sps:$4 sm:$0xff]  }
   0xa   :  { %v367_v28 = vld [vmem:[%s529_s1 + $0xd4] ss:$8 sps:$4 sm:$0xff]   ;;  %v369_v29 = vld [vmem:[%s529_s1 + $0xd0] ss:$8 sps:$4 sm:$0xff]   ;;  %v370_v30 = vld [vmem:[%s529_s1 + $0xe4] ss:$8 sps:$4 sm:$0xff]  }
   0xb   :  { %237 = vmatpush1.bf16.msra.mxu0 %v336_v5  ;;  %v372_v31 = vld [vmem:[%s529_s1 + $0xe0] ss:$8 sps:$4 sm:$0xff]   ;;  %v373_v32 = vld [vmem:[%s529_s1 + $0xf4] ss:$8 sps:$4 sm:$0xff]   ;;  %v375_v33 = vld [vmem:[%s529_s1 + $0xf0] ss:$8 sps:$4 sm:$0xff]  }
   0xc   :  { %238 = vmatprep.subr.bf16.mxu0 %v337_v6  ;;  %v57_v37 = vsub.s32 0, %v56_v36  ;;  %v53_v38 = vld [vmem:[%s531_s2] sm:$0x3]  ;;  %v61_v39 = vsub.s32 1, %v56_v36 }
   0xd   :  { %v273_v50 = vld [vmem:[%s534_s3] sm:$0xff] }
   0xe   :  { %v58_v40 = vrot.slane %v53_v38, %v57_v37  ;;  %v62_v41 = vrot.slane %v53_v38, %v61_v39 }
   0xf   :  { %239 = vmatpush1.bf16.msra.mxu0 %v339_v7 }
  0x10   :  { %240 = vmatprep.subr.bf16.mxu0 %v340_v8 }
  0x13   :  { %241 = vmatpush1.bf16.msra.mxu0 %v342_v9 }
  0x14   :  { %242 = vmatprep.subr.bf16.mxu0 %v343_v10 }
  0x17   :  { %243 = vmatpush1.bf16.msra.mxu0 %v345_v11 }
  0x18   :  { %244 = vmatprep.subr.bf16.mxu0 %v346_v12 }
  0x1b   :  { %245 = vmatpush1.bf16.msra.mxu0 %v348_v15 }
  0x1c   :  { %246 = vmatprep.subr.bf16.mxu0 %v349_v16 }
  0x1f   :  { %247 = vmatpush1.bf16.msra.mxu0 %v351_v17 }
  0x20   :  { %248 = vmatprep.subr.bf16.mxu0 %v352_v18 }
  0x23   :  { %249 = vmatpush1.bf16.msra.mxu0 %v354_v19 }
  0x24   :  { %250 = vmatprep.subr.bf16.mxu0 %v355_v20 }
  0x27   :  { %251 = vmatpush1.bf16.msra.mxu0 %v357_v21 }
  0x28   :  { %252 = vmatprep.subr.bf16.mxu0 %v358_v22 }
  0x2b   :  { %253 = vmatpush1.bf16.msra.mxu0 %v360_v23 }
  0x2c   :  { %254 = vmatprep.subr.bf16.mxu0 %v361_v24 }
  0x2f   :  { %255 = vmatpush1.bf16.msra.mxu0 %v363_v25 }
  0x30   :  { %256 = vmatprep.subr.bf16.mxu0 %v364_v26 }
  0x33   :  { %257 = vmatpush1.bf16.msra.mxu0 %v366_v27 }
  0x34   :  { %258 = vmatprep.subr.bf16.mxu0 %v367_v28 }
  0x37   :  { %259 = vmatpush1.bf16.msra.mxu0 %v369_v29 }
  0x38   :  { %260 = vmatprep.subr.bf16.mxu0 %v370_v30 }
  0x3b   :  { %261 = vmatpush1.bf16.msra.mxu0 %v372_v31 }
  0x3c   :  { %262 = vmatprep.subr.bf16.mxu0 %v373_v32 }
  0x3f   :  { %263 = vmatpush1.bf16.msra.mxu0 %v375_v33 }
  0x42   :  { %265 = vmatmul.mubr.bf16.vlgmr.msra.gmra.mrb[0].mxu0 %v294_v34 }
 0x115   :  { %v266_v42 = vpop.f32.mrb[0].mxu0 }
 0x116   :  { %v267_v43 = vadd.f32 %v266_v42, %v58_v40  ;;  %v268_v44 = vpop.f32.mrb[1].mxu0 }
 0x117   :  { %v269_v45 = vadd.f32 %v268_v44, %v62_v41  ;;  %v270_v46 = vpop.f32.mrb[2].mxu0 }
 0x118   :  { %279 = vst [vmem:[%s532_s4] sm:$0xff] %v267_v43  ;;  %v271_v47 = vpop.f32.mrb[3].mxu0 }
 0x119   :  { %v274_v48 = vmul.f32 0.5, %v269_v45  ;;  %280 = vst [vmem:[%s533_s5] sm:$0xff] %v269_v45 }
 0x11b   :  { %v275_v49 = vmul.f32 1.442695, %v274_v48 }
 0x11d   :  { %378 = vpow2.f32 %v275_v49 }
 0x127   :  { %v379_v51 = vpop.eup %378 }
 0x128   :  { %v277_v52 = vmul.f32 %v379_v51, %v273_v50 }
 0x12a   :  { %v278_v53 = vadd.f32 %v277_v52, %v267_v43 }
 0x12c   :  { %281 = vst [vmem:[%s535_s6] sm:$0xff] %v278_v53 }

// kernel: _forward_impl.22
= control target key start
LH: loop header
LB: loop body
LE: loop exit
PB: predicated region body
PF: predicated region fallthrough
CT: control target
= control target key end

     0   :  { %s912_s15 = smov 0   ;;  %s1016_s0 = inlined_call_operand.vmem [shape: bf16[64,384], index: 0, kind: input, shape index: {}]   ;;  %s1017_s1 = inlined_call_operand.vmem [shape: bf16[384,128], index: 1, kind: input, shape index: {}]   ;;  %s1018_s2 = inlined_call_operand.vmem [shape: bf16[64,128], index: 2, kind: output, shape index: {0}]   ;;  %s1019_s3 = inlined_call_operand.vmem [shape: f32[16,128], index: 3, kind: output, shape index: {1}]   ;;  %s1020_s4 = inlined_call_operand.vmem [shape: f32[16,128], index: 4, kind: output, shape index: {2}]  }
   0x1 LB: > { %s918_s16 = sadd.s32 4294967295, %s885_s15   ;;  %p722_p0 = scmp.ge.s32.totalorder %s885_s15, 1  ;;  %s885_s15 = sphi %s912_s15, %s15_s15  }
   0x2   : > { %p169_p1 = scmp.lt.s32.totalorder %s885_s15, 3 }
   0x4   : > { %p170_p2 = pnand %p722_p0, %p169_p1 }
   0x5   : > { %v847_v0 = vld [vmem:[%s1017_s1 + $0x40] sm:$0xff] (!%p170_p2)   ;;  %v850_v3 = vld [vmem:[%s1017_s1 + $0x48] sm:$0xff] (!%p170_p2)   ;;  %v853_v6 = vld [vmem:[%s1017_s1 + $0x50] sm:$0xff] (!%p170_p2)   ;;  %s723_s7 = sshll.u32 (!%p170_p2), %s918_s16, 2  ;;  %p217_p4 = scmp.lt.s32.totalorder (!%p170_p2), %s918_s16, 1 }
   0x6   : > { %173 = sbr.rel (%p170_p2) target bundleno = 282 (0x11a), region = 28  ;;  %v848_v1 = vld [vmem:[%s1017_s1] sm:$0xff] (!%p170_p2)   ;;  %780 = vmatprep.subr.bf16.mxu0 (!%p170_p2), %v847_v0  ;;  %v851_v4 = vld [vmem:[%s1017_s1 + $0x8] sm:$0xff] (!%p170_p2)   ;;  %v854_v7 = vld [vmem:[%s1017_s1 + $0x10] sm:$0xff] (!%p170_p2)   ;;  %p205_p3 = scmp.lt.s32.totalorder (!%p170_p2), %s723_s7, 7 }
   0x7   : > { %v849_v2 = vld [vmem:[%s1017_s1 + $0x80] sm:$0xff] (!%p170_p2)   ;;  %781 = vmatpush3.bf16.msra.mxu0 (!%p170_p2), %v848_v1  ;;  %v852_v5 = vld [vmem:[%s1017_s1 + $0x88] sm:$0xff] (!%p170_p2)   ;;  %v855_v8 = vld [vmem:[%s1017_s1 + $0x90] sm:$0xff] (!%p170_p2)  }
   0x8   : > { %818 = vmatprep.subr.bf16.mxu1 (!%p170_p2), %v849_v2  ;;  %782 = vmatprep.subr.bf16.mxu0 (!%p170_p2), %v850_v3  ;;  %v856_v9 = vld [vmem:[%s1017_s1 + $0x58] sm:$0xff] (!%p170_p2)   ;;  %v859_v12 = vld [vmem:[%s1017_s1 + $0x60] sm:$0xff] (!%p170_p2)   ;;  %v862_v15 = vld [vmem:[%s1017_s1 + $0x68] sm:$0xff] (!%p170_p2)  }
   0x9   : > { %819 = vmatpush3.bf16.msra.mxu1 (!%p170_p2), %v849_v2  ;;  %v857_v10 = vld [vmem:[%s1017_s1 + $0x18] sm:$0xff] (!%p170_p2)   ;;  %v861_v13 = vld [vmem:[%s1017_s1 + $0xa0] sm:$0xff] (!%p170_p2)   ;;  %v864_v16 = vld [vmem:[%s1017_s1 + $0xa8] sm:$0xff] (!%p170_p2)  }
   0xa   : > { %820 = vmatprep.subr.bf16.mxu1 (!%p170_p2), %v852_v5  ;;  %v858_v11 = vld [vmem:[%s1017_s1 + $0x98] sm:$0xff] (!%p170_p2)   ;;  %v860_v14 = vld [vmem:[%s1017_s1 + $0x20] sm:$0xff] (!%p170_p2)   ;;  %v863_v17 = vld [vmem:[%s1017_s1 + $0x28] sm:$0xff] (!%p170_p2)  }
   0xb   : > { %783 = vmatpush3.bf16.msra.mxu0 (!%p170_p2), %v851_v4  ;;  %v865_v18 = vld [vmem:[%s1017_s1 + $0x70] sm:$0xff] (!%p170_p2)   ;;  %v868_v21 = vld [vmem:[%s1017_s1 + $0x78] sm:$0xff] (!%p170_p2)  }
   0xc   : > { %784 = vmatprep.subr.bf16.mxu0 (!%p170_p2), %v853_v6  ;;  %v866_v19 = vld [vmem:[%s1017_s1 + $0x30] sm:$0xff] (!%p170_p2)   ;;  %v870_v22 = vld [vmem:[%s1017_s1 + $0xb8] sm:$0xff] (!%p170_p2)  }
   0xd   : > { %821 = vmatpush3.bf16.msra.mxu1 %v852_v5  ;;  %s1022_s7 = smov (!%p205_p3, %s723_s7), 7  ;;  %v867_v20 = vld [vmem:[%s1017_s1 + $0xb0] sm:$0xff]   ;;  %v869_v25 = vld [vmem:[%s1017_s1 + $0x38] sm:$0xff]   ;;  %s1024_s16 = smov (!%p217_p4, %s918_s16), 1 }
   0xe   : > { %822 = vmatprep.subr.bf16.mxu1 %v855_v8  ;;  %s838_s28 = smul.u32 12, %s1022_s7  ;;  %s726_s23 = sshll.u32 %s1022_s7, 2 }
   0xf   : > { %785 = vmatpush3.bf16.msra.mxu0 %v854_v7  ;;  %s215_s26 = scalar_lea.vmem %s1018_s2, %s726_s23  ;;  %s727_s7 = sshll.u32 %s1024_s16, 3 }
  0x10   : > { %786 = vmatprep.subr.bf16.mxu0 %v856_v9  ;;  %s209_s14 = scalar_lea.vmem %s1016_s0, %s838_s28  ;;  %s220_s29 = scalar_lea.vmem %s1019_s3, %s727_s7 }
  0x11   : > { %823 = vmatpush3.bf16.msra.mxu1 %v855_v8  ;;  %v873_v23 = vld [vmem:[%s209_s14 + $0x4] ss:$12 sps:$4 sm:$0xff]   ;;  %v874_v24 = vld [vmem:[%s209_s14 + $0x8] ss:$12 sps:$4 sm:$0xff]   ;;  %v871_v26 = vld [vmem:[%s209_s14] ss:$12 sps:$4 sm:$0xff]   ;;  %s224_s6 = scalar_lea.vmem %s1020_s4, %s727_s7 }
  0x12   : > { %824 = vmatprep.subr.bf16.mxu1 %v858_v11  ;;  %490 = vmatprep.mubr.bf16.mxu0 %v873_v23  ;;  %v876_v27 = vld [vmem:[%s209_s14 + $0x1c] ss:$12 sps:$4 sm:$0xff]   ;;  %v875_v28 = vld [vmem:[%s209_s14 + $0x20] ss:$12 sps:$4 sm:$0xff]   ;;  %v878_v29 = vld [vmem:[%s209_s14 + $0x18] ss:$12 sps:$4 sm:$0xff]  }
  0x13   : > { %787 = vmatpush3.bf16.msra.mxu0 %v857_v10  ;;  %834 = vmatprep.mubr.bf16.mxu1 %v874_v24 }
  0x14   : > { %788 = vmatprep.subr.bf16.mxu0 %v859_v12 }
  0x15   : > { %825 = vmatpush3.bf16.msra.mxu1 %v858_v11 }
  0x16   : > { %826 = vmatprep.subr.bf16.mxu1 %v861_v13 }
  0x17   : > { %789 = vmatpush3.bf16.msra.mxu0 %v860_v14 }
  0x18   : > { %790 = vmatprep.subr.bf16.mxu0 %v862_v15 }
  0x19   : > { %827 = vmatpush3.bf16.msra.mxu1 %v861_v13 }
  0x1a   : > { %828 = vmatprep.subr.bf16.mxu1 %v864_v16 }
  0x1b   : > { %791 = vmatpush3.bf16.msra.mxu0 %v863_v17 }
  0x1c   : > { %792 = vmatprep.subr.bf16.mxu0 %v865_v18 }
  0x1d   : > { %829 = vmatpush3.bf16.msra.mxu1 %v864_v16 }
  0x1e   : > { %830 = vmatprep.subr.bf16.mxu1 %v867_v20 }
  0x1f   : > { %793 = vmatpush3.bf16.msra.mxu0 %v866_v19 }
  0x20   : > { %794 = vmatprep.subr.bf16.mxu0 %v868_v21 }
  0x21   : > { %831 = vmatpush3.bf16.msra.mxu1 %v867_v20 }
  0x22   : > { %832 = vmatprep.subr.bf16.mxu1 %v870_v22 }
  0x23   : > { %795 = vmatpush3.bf16.msra.mxu0 %v869_v25 }
  0x25   : > { %833 = vmatpush3.bf16.msra.mxu1 %v870_v22 }
  0x26   : > { %491 = vmatmul.mubr.bf16.vlgmr.msra.gmra.mrb[0].mxu0 %v871_v26 }
  0x27   : > { %498 = vmatprep.mubr.bf16.mxu0 %v876_v27 }
  0x28   : > { %835 = vmatmul.mubr.bf16.vlgmr.msra.gmra.mrb[0].mxu1 %v875_v28 }
  0x2e   : > { %499 = vmatmul.mubr.bf16.gmra.mrb[4].mxu0 %v878_v29 }
  0xf9   : > { %v796_v30 = vpop.f32.mrb[0].mxu0 }
  0xfa   : > { %v797_v31 = vpop.f32.mrb[1].mxu0 }
  0xfb   : > { %v798_v32 = vadd.f32 %v797_v31, %v796_v30  ;;  %v799_v33 = vpop.f32.mrb[2].mxu0  ;;  %v836_v34 = vpop.f32.mrb[0].mxu1 }
  0xfc   : > { %v800_v35 = vpop.f32.mrb[3].mxu0  ;;  %v541_v36 = vpop.f32.mrb[1].mxu1 }
  0xfd   : > { %v801_v37 = vadd.f32 %v800_v35, %v799_v33  ;;  %v542_v38 = vadd.f32 %v798_v32, %v541_v36  ;;  %v837_v39 = vpop.f32.mrb[2].mxu1 }
  0xfe   : > { %v544_v40 = vpop.f32.mrb[3].mxu1 }
  0xff   : > { %v545_v41 = vadd.f32 %v801_v37, %v544_v40  ;;  %v565_v42 = vmul.f32 %v542_v38, %v542_v38 }
 0x101   : > { %v556_v43 = vadd.f32 %v545_v41, %v542_v38  ;;  %v566_v44 = vmul.f32 %v545_v41, %v545_v41  ;;  %v772_v45 = vpack.c.bf16 %v545_v41, %v542_v38  ;;  %v802_v46 = vpop.f32.mrb[4].mxu0 }
 0x102   : > { %v803_v47 = vpop.f32.mrb[5].mxu0 }
 0x103   : > { %v569_v48 = vadd.f32 %v566_v44, %v565_v42  ;;  %773 = vst [vmem:[%s215_s26] sm:$0xff] %v772_v45   ;;  %v804_v49 = vadd.f32 %v803_v47, %v802_v46  ;;  %v805_v50 = vpop.f32.mrb[6].mxu0 }
 0x104   : > { %v806_v51 = vpop.f32.mrb[7].mxu0 }
 0x105   : > { %v550_v52 = vadd.f32 %v836_v34, %v804_v49  ;;  %v807_v53 = vadd.f32 %v806_v51, %v805_v50 }
 0x107   : > { %v557_v54 = vadd.f32 %v556_v43, %v550_v52  ;;  %v567_v55 = vmul.f32 %v550_v52, %v550_v52  ;;  %v553_v56 = vadd.f32 %v837_v39, %v807_v53 }
 0x109   : > { %v570_v57 = vadd.f32 %v569_v48, %v567_v55  ;;  %v558_v58 = vadd.f32 %v557_v54, %v553_v56  ;;  %v568_v59 = vmul.f32 %v553_v56, %v553_v56  ;;  %v777_v60 = vpack.c.bf16 %v553_v56, %v550_v52 }
 0x10b   : > { %v559_v61 = vrot.slane %v558_v58, 4  ;;  %v571_v62 = vadd.f32 %v570_v57, %v568_v59  ;;  %779 = vst [vmem:[%s215_s26 + $0x8] sm:$0xff] %v777_v60  }
 0x10d   : > { %v560_v63 = vadd.f32 %v559_v61, %v558_v58  ;;  %v572_v0 = vrot.slane %v571_v62, 4 }
 0x10f   : > { %v561_v1 = vrot.slane %v560_v63, 2  ;;  %v573_v2 = vadd.f32 %v572_v0, %v571_v62 }
 0x111   : > { %v562_v3 = vadd.f32 %v561_v1, %v560_v63  ;;  %v574_v4 = vrot.slane %v573_v2, 2 }
 0x113   : > { %v563_v5 = vrot.slane %v562_v3, 1  ;;  %v575_v6 = vadd.f32 %v574_v4, %v573_v2 }
 0x115   : > { %v564_v7 = vadd.f32 %v563_v5, %v562_v3  ;;  %v576_v8 = vrot.slane %v575_v6, 1 }
 0x117   : > { %v577_v9 = vadd.f32 %v576_v8, %v575_v6  ;;  %598 = vst [vmem:[%s220_s29] sm:$0xff] %v564_v7 }
 0x119   : > { %599 = vst [vmem:[%s224_s6] sm:$0xff] %v577_v9 }
 0x11a PF: > { %s15_s15 = sadd.s32 1, %s885_s15  }
 0x11b   : > { %p12_p5 = scmp.ge.s32.totalorder %s15_s15, 4  }
 0x11d   :  { %14 = sbr.rel (!%p12_p5) target bundleno = 1 (0x1), region = 82 }

// kernel: _forward_impl.24
= control target key start
LH: loop header
LB: loop body
LE: loop exit
PB: predicated region body
PF: predicated region fallthrough
CT: control target
= control target key end

     0   :  { %s1092_s15 = smov 0   ;;  %s1218_s0 = inlined_call_operand.vmem [shape: bf16[256,256], index: 0, kind: input, shape index: {}]   ;;  %s1219_s1 = inlined_call_operand.vmem [shape: bf16[256,128], index: 1, kind: input, shape index: {}]   ;;  %s1220_s2 = inlined_call_operand.vmem [shape: bf16[256,128], index: 2, kind: output, shape index: {0}]   ;;  %s1221_s3 = inlined_call_operand.vmem [shape: f32[16,128], index: 3, kind: output, shape index: {1}]   ;;  %s1222_s4 = inlined_call_operand.vmem [shape: f32[16,128], index: 4, kind: output, shape index: {2}]  }
   0x1 LB: > { %s1098_s16 = sadd.s32 4294967295, %s1065_s15   ;;  %p809_p0 = scmp.ge.s32.totalorder %s1065_s15, 1  ;;  %s1065_s15 = sphi %s1092_s15, %s15_s15  }
   0x2   : > { %p169_p1 = scmp.lt.s32.totalorder %s1065_s15, 3 }
   0x4   : > { %p170_p2 = pnand %p809_p0, %p169_p1 }
   0x5   : > { %v1019_v0 = vld [vmem:[%s1219_s1 + $0x40] sm:$0xff] (!%p170_p2)   ;;  %s810_s19 = sshll.u32 (!%p170_p2), %s1098_s16, 4  ;;  %v1021_v2 = vld [vmem:[%s1219_s1 + $0x48] sm:$0xff] (!%p170_p2)   ;;  %v1023_v4 = vld [vmem:[%s1219_s1 + $0x50] sm:$0xff] (!%p170_p2)   ;;  %p217_p4 = scmp.lt.s32.totalorder (!%p170_p2), %s1098_s16, 1 }
   0x6   : > { %173 = sbr.rel (%p170_p2) target bundleno = 312 (0x138), region = 28  ;;  %v1020_v1 = vld [vmem:[%s1219_s1] sm:$0xff] (!%p170_p2)   ;;  %931 = vmatprep.subr.bf16.mxu0 (!%p170_p2), %v1019_v0  ;;  %995 = vmatprep.subr.bf16.mxu1 (!%p170_p2), %v1019_v0  ;;  %v1022_v3 = vld [vmem:[%s1219_s1 + $0x8] sm:$0xff] (!%p170_p2)   ;;  %p205_p3 = scmp.lt.s32.totalorder (!%p170_p2), %s810_s19, 31  ;;  %v1024_v5 = vld [vmem:[%s1219_s1 + $0x10] sm:$0xff] (!%p170_p2)  }
   0x7   : > { %932 = vmatpush3.bf16.msra.mxu0 (!%p170_p2), %v1020_v1  ;;  %1003 = vmatpush3.bf16.msra.mxu1 (!%p170_p2), %v1020_v1  ;;  %v1025_v6 = vld [vmem:[%s1219_s1 + $0x58] sm:$0xff] (!%p170_p2)   ;;  %v1027_v8 = vld [vmem:[%s1219_s1 + $0x60] sm:$0xff] (!%p170_p2)   ;;  %v1029_v10 = vld [vmem:[%s1219_s1 + $0x68] sm:$0xff] (!%p170_p2)  }
   0x8   : > { %933 = vmatprep.subr.bf16.mxu0 (!%p170_p2), %v1021_v2  ;;  %996 = vmatprep.subr.bf16.mxu1 (!%p170_p2), %v1021_v2  ;;  %v1026_v7 = vld [vmem:[%s1219_s1 + $0x18] sm:$0xff] (!%p170_p2)   ;;  %v1028_v9 = vld [vmem:[%s1219_s1 + $0x20] sm:$0xff] (!%p170_p2)   ;;  %v1030_v12 = vld [vmem:[%s1219_s1 + $0x28] sm:$0xff] (!%p170_p2)  }
   0x9   : > { %v1031_v14 = vld [vmem:[%s1219_s1 + $0x70] sm:$0xff] (!%p170_p2)   ;;  %v1033_v16 = vld [vmem:[%s1219_s1 + $0x78] sm:$0xff] (!%p170_p2)  }
   0xa   : > { %v1032_v15 = vld [vmem:[%s1219_s1 + $0x30] sm:$0xff] (!%p170_p2)   ;;  %v1034_v17 = vld [vmem:[%s1219_s1 + $0x38] sm:$0xff] (!%p170_p2)  }
   0xb   : > { %934 = vmatpush3.bf16.msra.mxu0 (!%p170_p2), %v1022_v3  ;;  %1004 = vmatpush3.bf16.msra.mxu1 (!%p170_p2), %v1022_v3 }
   0xc   : > { %935 = vmatprep.subr.bf16.mxu0 (!%p170_p2), %v1023_v4  ;;  %997 = vmatprep.subr.bf16.mxu1 (!%p170_p2), %v1023_v4 }
   0xd   : > { %s1224_s19 = smov (!%p205_p3, %s810_s19), 31  ;;  %s1226_s16 = smov (!%p217_p4, %s1098_s16), 1 }
   0xe   : > { %s867_s8 = sshll.u32 %s1224_s19, 3  ;;  %s814_s5 = sshll.u32 %s1224_s19, 2 }
   0xf   : > { %936 = vmatpush3.bf16.msra.mxu0 %v1024_v5  ;;  %1005 = vmatpush3.bf16.msra.mxu1 %v1024_v5  ;;  %s1136_s13 = scalar_lea.vmem %s1218_s0, %s867_s8  ;;  %s1183_s8 = scalar_lea.vmem %s1220_s2, %s814_s5 }
  0x10   : > { %937 = vmatprep.subr.bf16.mxu0 %v1025_v6  ;;  %998 = vmatprep.subr.bf16.mxu1 %v1025_v6  ;;  %v1037_v11 = vld [vmem:[%s1136_s13 + $0x4] ss:$8 sps:$4 sm:$0xff]   ;;  %v1035_v18 = vld [vmem:[%s1136_s13] ss:$8 sps:$4 sm:$0xff]   ;;  %v1038_v20 = vld [vmem:[%s1136_s13 + $0x14] ss:$8 sps:$4 sm:$0xff]  }
  0x11   : > { %v1043_v13 = vld [vmem:[%s1136_s13 + $0x44] ss:$8 sps:$4 sm:$0xff]   ;;  %482 = vmatprep.mubr.bf16.mxu0 %v1037_v11  ;;  %v1041_v19 = vld [vmem:[%s1136_s13 + $0x40] ss:$8 sps:$4 sm:$0xff]   ;;  %v1047_v21 = vld [vmem:[%s1136_s13 + $0x54] ss:$8 sps:$4 sm:$0xff]  }
  0x12   : > { %514 = vmatprep.mubr.bf16.mxu1 %v1043_v13  ;;  %v1040_v22 = vld [vmem:[%s1136_s13 + $0x10] ss:$8 sps:$4 sm:$0xff]   ;;  %v1044_v24 = vld [vmem:[%s1136_s13 + $0x24] ss:$8 sps:$4 sm:$0xff]   ;;  %v1046_v26 = vld [vmem:[%s1136_s13 + $0x20] ss:$8 sps:$4 sm:$0xff]  }
  0x13   : > { %938 = vmatpush3.bf16.msra.mxu0 %v1026_v7  ;;  %1006 = vmatpush3.bf16.msra.mxu1 %v1026_v7  ;;  %v1049_v23 = vld [vmem:[%s1136_s13 + $0x50] ss:$8 sps:$4 sm:$0xff]   ;;  %v1053_v25 = vld [vmem:[%s1136_s13 + $0x64] ss:$8 sps:$4 sm:$0xff]   ;;  %v1055_v27 = vld [vmem:[%s1136_s13 + $0x60] ss:$8 sps:$4 sm:$0xff]  }
  0x14   : > { %939 = vmatprep.subr.bf16.mxu0 %v1027_v8  ;;  %999 = vmatprep.subr.bf16.mxu1 %v1027_v8  ;;  %v1050_v28 = vld [vmem:[%s1136_s13 + $0x34] ss:$8 sps:$4 sm:$0xff]   ;;  %v1052_v30 = vld [vmem:[%s1136_s13 + $0x30] ss:$8 sps:$4 sm:$0xff]   ;;  %s815_s19 = sshll.u32 %s1226_s16, 3 }
  0x15   : > { %v1056_v29 = vld [vmem:[%s1136_s13 + $0x74] ss:$8 sps:$4 sm:$0xff]   ;;  %v1058_v31 = vld [vmem:[%s1136_s13 + $0x70] ss:$8 sps:$4 sm:$0xff]   ;;  %s220_s11 = scalar_lea.vmem %s1221_s3, %s815_s19  ;;  %s224_s14 = scalar_lea.vmem %s1222_s4, %s815_s19 }
  0x17   : > { %940 = vmatpush3.bf16.msra.mxu0 %v1028_v9  ;;  %1007 = vmatpush3.bf16.msra.mxu1 %v1028_v9 }
  0x18   : > { %941 = vmatprep.subr.bf16.mxu0 %v1029_v10  ;;  %1000 = vmatprep.subr.bf16.mxu1 %v1029_v10 }
  0x1b   : > { %942 = vmatpush3.bf16.msra.mxu0 %v1030_v12  ;;  %1008 = vmatpush3.bf16.msra.mxu1 %v1030_v12 }
  0x1c   : > { %943 = vmatprep.subr.bf16.mxu0 %v1031_v14  ;;  %1001 = vmatprep.subr.bf16.mxu1 %v1031_v14 }
  0x1f   : > { %944 = vmatpush3.bf16.msra.mxu0 %v1032_v15  ;;  %1009 = vmatpush3.bf16.msra.mxu1 %v1032_v15 }
  0x20   : > { %945 = vmatprep.subr.bf16.mxu0 %v1033_v16  ;;  %1002 = vmatprep.subr.bf16.mxu1 %v1033_v16 }
  0x23   : > { %946 = vmatpush3.bf16.msra.mxu0 %v1034_v17  ;;  %1010 = vmatpush3.bf16.msra.mxu1 %v1034_v17 }
  0x26   : > { %483 = vmatmul.mubr.bf16.vlgmr.msra.gmra.mrb[0].mxu0 %v1035_v18  ;;  %515 = vmatmul.mubr.bf16.vlgmr.msra.gmra.mrb[0].mxu1 %v1041_v19 }
  0x27   : > { %490 = vmatprep.mubr.bf16.mxu0 %v1038_v20  ;;  %522 = vmatprep.mubr.bf16.mxu1 %v1047_v21 }
  0x2e   : > { %491 = vmatmul.mubr.bf16.gmra.mrb[4].mxu0 %v1040_v22  ;;  %523 = vmatmul.mubr.bf16.gmra.mrb[4].mxu1 %v1049_v23 }
  0x2f   : > { %498 = vmatprep.mubr.bf16.mxu0 %v1044_v24  ;;  %530 = vmatprep.mubr.bf16.mxu1 %v1053_v25 }
  0x36   : > { %499 = vmatmul.mubr.bf16.gmra.mrb[8].mxu0 %v1046_v26  ;;  %531 = vmatmul.mubr.bf16.gmra.mrb[8].mxu1 %v1055_v27 }
  0x37   : > { %506 = vmatprep.mubr.bf16.mxu0 %v1050_v28  ;;  %538 = vmatprep.mubr.bf16.mxu1 %v1056_v29 }
  0x3e   : > { %507 = vmatmul.mubr.bf16.gmra.mrb[12].mxu0 %v1052_v30  ;;  %539 = vmatmul.mubr.bf16.gmra.mrb[12].mxu1 %v1058_v31 }
  0xf9   : > { %v947_v32 = vpop.f32.mrb[0].mxu0  ;;  %v971_v33 = vpop.f32.mrb[0].mxu1 }
  0xfa   : > { %v948_v34 = vpop.f32.mrb[1].mxu0  ;;  %v972_v35 = vpop.f32.mrb[1].mxu1 }
  0xfb   : > { %v949_v36 = vadd.f32 %v948_v34, %v947_v32  ;;  %v950_v37 = vpop.f32.mrb[2].mxu0  ;;  %v1176_v38 = vadd.f32 %v972_v35, %v971_v33  ;;  %v974_v39 = vpop.f32.mrb[2].mxu1 }
  0xfc   : > { %v951_v40 = vpop.f32.mrb[3].mxu0  ;;  %v975_v41 = vpop.f32.mrb[3].mxu1 }
  0xfd   : > { %v952_v42 = vadd.f32 %v951_v40, %v950_v37  ;;  %v1178_v43 = vadd.f32 %v975_v41, %v974_v39  ;;  %v568_v44 = vmul.f32 %v949_v36, %v949_v36 }
  0xff   : > { %v547_v45 = vadd.f32 %v952_v42, %v949_v36  ;;  %v569_v46 = vmul.f32 %v952_v42, %v952_v42  ;;  %v887_v47 = vpack.c.bf16 %v952_v42, %v949_v36  ;;  %v907_v48 = vpack.c.bf16 %v1178_v43, %v1176_v38 }
 0x101   : > { %v584_v49 = vadd.f32 %v569_v46, %v568_v44  ;;  %888 = vst [vmem:[%s1183_s8] sm:$0xff] %v887_v47   ;;  %v953_v50 = vpop.f32.mrb[4].mxu0  ;;  %v977_v51 = vpop.f32.mrb[4].mxu1  ;;  %927 = vst [vmem:[%s1183_s8 + $0x20] sm:$0xff] %v907_v48   ;;  %v576_v47 = vmul.f32 %v1176_v38, %v1176_v38 }
 0x102   : > { %v954_v52 = vpop.f32.mrb[5].mxu0  ;;  %v978_v53 = vpop.f32.mrb[5].mxu1 }
 0x103   : > { %v955_v54 = vadd.f32 %v954_v52, %v953_v50  ;;  %v956_v55 = vpop.f32.mrb[6].mxu0  ;;  %v1189_v56 = vadd.f32 %v978_v53, %v977_v51  ;;  %v980_v57 = vpop.f32.mrb[6].mxu1  ;;  %v577_v50 = vmul.f32 %v1178_v43, %v1178_v43 }
 0x104   : > { %v957_v58 = vpop.f32.mrb[7].mxu0  ;;  %v981_v59 = vpop.f32.mrb[7].mxu1 }
 0x105   : > { %v548_v60 = vadd.f32 %v955_v54, %v547_v45  ;;  %v570_v61 = vmul.f32 %v955_v54, %v955_v54  ;;  %v958_v62 = vadd.f32 %v957_v58, %v956_v55  ;;  %v982_v63 = vadd.f32 %v981_v59, %v980_v57 }
 0x106   : > { %v578_v53 = vmul.f32 %v1189_v56, %v1189_v56 }
 0x107   : > { %v585_v0 = vadd.f32 %v584_v49, %v570_v61  ;;  %v549_v1 = vadd.f32 %v958_v62, %v548_v60  ;;  %v571_v2 = vmul.f32 %v958_v62, %v958_v62  ;;  %v892_v3 = vpack.c.bf16 %v958_v62, %v955_v54 }
 0x108   : > { %v912_v4 = vpack.c.bf16 %v982_v63, %v1189_v56  ;;  %v579_v57 = vmul.f32 %v982_v63, %v982_v63 }
 0x109   : > { %v586_v5 = vadd.f32 %v585_v0, %v571_v2  ;;  %924 = vst [vmem:[%s1183_s8 + $0x8] sm:$0xff] %v892_v3   ;;  %v959_v6 = vpop.f32.mrb[8].mxu0  ;;  %v983_v7 = vpop.f32.mrb[8].mxu1 }
 0x10a   : > { %v960_v8 = vpop.f32.mrb[9].mxu0  ;;  %928 = vst [vmem:[%s1183_s8 + $0x28] sm:$0xff] %v912_v4   ;;  %v984_v9 = vpop.f32.mrb[9].mxu1 }
 0x10b   : > { %v961_v10 = vadd.f32 %v960_v8, %v959_v6  ;;  %v962_v11 = vpop.f32.mrb[10].mxu0  ;;  %v985_v12 = vadd.f32 %v984_v9, %v983_v7  ;;  %v986_v13 = vpop.f32.mrb[10].mxu1 }
 0x10c   : > { %v963_v14 = vpop.f32.mrb[11].mxu0  ;;  %v987_v15 = vpop.f32.mrb[11].mxu1 }
 0x10d   : > { %v550_v16 = vadd.f32 %v961_v10, %v549_v1  ;;  %v572_v17 = vmul.f32 %v961_v10, %v961_v10  ;;  %v964_v18 = vadd.f32 %v963_v14, %v962_v11  ;;  %v988_v19 = vadd.f32 %v987_v15, %v986_v13 }
 0x10e   : > { %v580_v60 = vmul.f32 %v985_v12, %v985_v12 }
 0x10f   : > { %v587_v20 = vadd.f32 %v586_v5, %v572_v17  ;;  %v551_v21 = vadd.f32 %v964_v18, %v550_v16  ;;  %v573_v22 = vmul.f32 %v964_v18, %v964_v18  ;;  %v897_v23 = vpack.c.bf16 %v964_v18, %v961_v10 }
 0x110   : > { %v917_v24 = vpack.c.bf16 %v988_v19, %v985_v12  ;;  %v581_v1 = vmul.f32 %v988_v19, %v988_v19 }
 0x111   : > { %v588_v25 = vadd.f32 %v587_v20, %v573_v22  ;;  %925 = vst [vmem:[%s1183_s8 + $0x10] sm:$0xff] %v897_v23   ;;  %v965_v26 = vpop.f32.mrb[12].mxu0  ;;  %v989_v27 = vpop.f32.mrb[12].mxu1 }
 0x112   : > { %v966_v28 = vpop.f32.mrb[13].mxu0  ;;  %929 = vst [vmem:[%s1183_s8 + $0x30] sm:$0xff] %v917_v24   ;;  %v990_v29 = vpop.f32.mrb[13].mxu1 }
 0x113   : > { %v967_v30 = vadd.f32 %v966_v28, %v965_v26  ;;  %v968_v31 = vpop.f32.mrb[14].mxu0  ;;  %v991_v32 = vadd.f32 %v990_v29, %v989_v27  ;;  %v992_v33 = vpop.f32.mrb[14].mxu1 }
 0x114   : > { %v969_v34 = vpop.f32.mrb[15].mxu0  ;;  %v993_v35 = vpop.f32.mrb[15].mxu1 }
 0x115   : > { %v552_v36 = vadd.f32 %v967_v30, %v551_v21  ;;  %v574_v37 = vmul.f32 %v967_v30, %v967_v30  ;;  %v970_v39 = vadd.f32 %v969_v34, %v968_v31  ;;  %v994_v40 = vadd.f32 %v993_v35, %v992_v33 }
 0x116   : > { %v582_v2 = vmul.f32 %v991_v32, %v991_v32 }
 0x117   : > { %v589_v41 = vadd.f32 %v588_v25, %v574_v37  ;;  %v553_v42 = vadd.f32 %v970_v39, %v552_v36  ;;  %v575_v44 = vmul.f32 %v970_v39, %v970_v39  ;;  %v902_v45 = vpack.c.bf16 %v970_v39, %v967_v30 }
 0x118   : > { %v922_v46 = vpack.c.bf16 %v994_v40, %v991_v32  ;;  %v583_v6 = vmul.f32 %v994_v40, %v994_v40 }
 0x119   : > { %v554_v48 = vadd.f32 %v1176_v38, %v553_v42  ;;  %v590_v49 = vadd.f32 %v589_v41, %v575_v44  ;;  %926 = vst [vmem:[%s1183_s8 + $0x18] sm:$0xff] %v902_v45  }
 0x11a   : > { %930 = vst [vmem:[%s1183_s8 + $0x38] sm:$0xff] %v922_v46  }
 0x11b   : > { %v555_v51 = vadd.f32 %v1178_v43, %v554_v48  ;;  %v591_v52 = vadd.f32 %v590_v49, %v576_v47 }
 0x11d   : > { %v592_v54 = vadd.f32 %v591_v52, %v577_v50  ;;  %v556_v55 = vadd.f32 %v1189_v56, %v555_v51 }
 0x11f   : > { %v557_v58 = vadd.f32 %v982_v63, %v556_v55  ;;  %v593_v59 = vadd.f32 %v592_v54, %v578_v53 }
 0x121   : > { %v558_v38 = vadd.f32 %v985_v12, %v557_v58  ;;  %v594_v61 = vadd.f32 %v593_v59, %v579_v57 }
 0x123   : > { %v595_v62 = vadd.f32 %v594_v61, %v580_v60  ;;  %v559_v0 = vadd.f32 %v988_v19, %v558_v38 }
 0x125   : > { %v596_v43 = vadd.f32 %v595_v62, %v581_v1  ;;  %v560_v3 = vadd.f32 %v991_v32, %v559_v0 }
 0x127   : > { %v597_v4 = vadd.f32 %v596_v43, %v582_v2  ;;  %v561_v5 = vadd.f32 %v994_v40, %v560_v3 }
 0x129   : > { %v562_v7 = vrot.slane %v561_v5, 4  ;;  %v598_v8 = vadd.f32 %v597_v4, %v583_v6 }
 0x12b   : > { %v563_v56 = vadd.f32 %v562_v7, %v561_v5  ;;  %v599_v63 = vrot.slane %v598_v8, 4 }
 0x12d   : > { %v564_v9 = vrot.slane %v563_v56, 2  ;;  %v600_v10 = vadd.f32 %v599_v63, %v598_v8 }
 0x12f   : > { %v565_v11 = vadd.f32 %v564_v9, %v563_v56  ;;  %v601_v12 = vrot.slane %v600_v10, 2 }
 0x131   : > { %v566_v13 = vrot.slane %v565_v11, 1  ;;  %v602_v14 = vadd.f32 %v601_v12, %v600_v10 }
 0x133   : > { %v567_v15 = vadd.f32 %v566_v13, %v565_v11  ;;  %v603_v16 = vrot.slane %v602_v14, 1 }
 0x135   : > { %v604_v17 = vadd.f32 %v603_v16, %v602_v14  ;;  %685 = vst [vmem:[%s220_s11] sm:$0xff] %v567_v15 }
 0x137   : > { %686 = vst [vmem:[%s224_s14] sm:$0xff] %v604_v17 }
 0x138 PF: > { %s15_s15 = sadd.s32 1, %s1065_s15  }
 0x139   : > { %p12_p5 = scmp.ge.s32.totalorder %s15_s15, 4  }
 0x13b   :  { %14 = sbr.rel (!%p12_p5) target bundleno = 1 (0x1), region = 82 }

// kernel: _forward_impl.26
= control target key start
LH: loop header
LB: loop body
LE: loop exit
PB: predicated region body
PF: predicated region fallthrough
CT: control target
= control target key end

     0   :  { %s2063_s15 = smov 0   ;;  %s2382_s0 = inlined_call_operand.vmem [shape: bf16[1024,128], index: 0, kind: input, shape index: {}]   ;;  %s2383_s1 = inlined_call_operand.vmem [shape: bf16[128,128], index: 1, kind: input, shape index: {}]   ;;  %s2384_s2 = inlined_call_operand.vmem [shape: bf16[1024,128], index: 2, kind: output, shape index: {0}]   ;;  %s2385_s3 = inlined_call_operand.vmem [shape: f32[16,128], index: 3, kind: output, shape index: {1}]   ;;  %s2386_s4 = inlined_call_operand.vmem [shape: f32[16,128], index: 4, kind: output, shape index: {2}]  }
   0x1 LB: > { %s2069_s16 = sadd.s32 4294967295, %s2036_s15   ;;  %p1478_p0 = scmp.ge.s32.totalorder %s2036_s15, 1  ;;  %s2036_s15 = sphi %s2063_s15, %s15_s15  }
   0x2   : > { %p168_p1 = scmp.lt.s32.totalorder %s2036_s15, 3 }
   0x4   : > { %p169_p2 = pnand %p1478_p0, %p168_p1 }
   0x5   : > { %v1990_v0 = vld [vmem:[%s2383_s1] sm:$0xff] (!%p169_p2)   ;;  %s1479_s19 = sshll.u32 (!%p169_p2), %s2069_s16, 6  ;;  %v1991_v1 = vld [vmem:[%s2383_s1 + $0x8] sm:$0xff] (!%p169_p2)   ;;  %v1992_v2 = vld [vmem:[%s2383_s1 + $0x10] sm:$0xff] (!%p169_p2)   ;;  %p214_p4 = scmp.lt.s32.totalorder (!%p169_p2), %s2069_s16, 1 }
   0x6   : > { %172 = sbr.rel (%p169_p2) target bundleno = 394 (0x18a), region = 28  ;;  %p203_p3 = scmp.lt.s32.totalorder (!%p169_p2), %s1479_s19, 127  ;;  %1886 = vmatprep.subr.bf16.mxu0 (!%p169_p2), %v1990_v0  ;;  %1966 = vmatprep.subr.bf16.mxu1 (!%p169_p2), %v1990_v0  ;;  %v1993_v3 = vld [vmem:[%s2383_s1 + $0x18] sm:$0xff] (!%p169_p2)   ;;  %v1994_v5 = vld [vmem:[%s2383_s1 + $0x20] sm:$0xff] (!%p169_p2)   ;;  %v1995_v6 = vld [vmem:[%s2383_s1 + $0x28] sm:$0xff] (!%p169_p2)  }
   0x7   : > { %1887 = vmatpush3.bf16.msra.mxu0 (!%p169_p2), %v1990_v0  ;;  %1974 = vmatpush3.bf16.msra.mxu1 (!%p169_p2), %v1990_v0  ;;  %v1996_v7 = vld [vmem:[%s2383_s1 + $0x30] sm:$0xff] (!%p169_p2)   ;;  %v1997_v8 = vld [vmem:[%s2383_s1 + $0x38] sm:$0xff] (!%p169_p2)  }
   0x8   : > { %1888 = vmatprep.subr.bf16.mxu0 (!%p169_p2), %v1991_v1  ;;  %1967 = vmatprep.subr.bf16.mxu1 (!%p169_p2), %v1991_v1 }
   0xb   : > { %1889 = vmatpush3.bf16.msra.mxu0 (!%p169_p2), %v1991_v1  ;;  %1975 = vmatpush3.bf16.msra.mxu1 (!%p169_p2), %v1991_v1 }
   0xc   : > { %1890 = vmatprep.subr.bf16.mxu0 (!%p169_p2), %v1992_v2  ;;  %1968 = vmatprep.subr.bf16.mxu1 (!%p169_p2), %v1992_v2 }
   0xd   : > { %s2388_s19 = smov (!%p203_p3, %s1479_s19), 127  ;;  %s2390_s16 = smov (!%p214_p4, %s2069_s16), 1 }
   0xe   : > { %s1480_s24 = sshll.u32 %s2388_s19, 2  ;;  %s1483_s17 = sshll.u32 %s2390_s16, 3 }
   0xf   : > { %s2091_s27 = scalar_lea.vmem %s2382_s0, %s1480_s24  ;;  %1891 = vmatpush3.bf16.msra.mxu0 %v1992_v2  ;;  %1976 = vmatpush3.bf16.msra.mxu1 %v1992_v2  ;;  %s2149_s14 = scalar_lea.vmem %s2384_s2, %s1480_s24 }
  0x10   : > { %v1998_v4 = vld [vmem:[%s2091_s27] sm:$0xff]   ;;  %1892 = vmatprep.subr.bf16.mxu0 %v1993_v3  ;;  %1969 = vmatprep.subr.bf16.mxu1 %v1993_v3  ;;  %v1999_v10 = vld [vmem:[%s2091_s27 + $0x8] sm:$0xff]   ;;  %v2000_v11 = vld [vmem:[%s2091_s27 + $0x10] sm:$0xff]   ;;  %s217_s20 = scalar_lea.vmem %s2385_s3, %s1483_s17  ;;  %s221_s23 = scalar_lea.vmem %s2386_s4, %s1483_s17 }
  0x11   : > { %1902 = vmatprep.mubr.bf16.mxu0 %v1998_v4  ;;  %v2014_v9 = vld [vmem:[%s2091_s27 + $0x80] sm:$0xff]   ;;  %v2015_v12 = vld [vmem:[%s2091_s27 + $0x88] sm:$0xff]   ;;  %v2016_v13 = vld [vmem:[%s2091_s27 + $0x90] sm:$0xff]  }
  0x12   : > { %1934 = vmatprep.mubr.bf16.mxu1 %v2014_v9  ;;  %v2001_v14 = vld [vmem:[%s2091_s27 + $0x18] sm:$0xff]   ;;  %v2002_v15 = vld [vmem:[%s2091_s27 + $0x20] sm:$0xff]   ;;  %v2003_v18 = vld [vmem:[%s2091_s27 + $0x28] sm:$0xff]  }
  0x13   : > { %1893 = vmatpush3.bf16.msra.mxu0 %v1993_v3  ;;  %1977 = vmatpush3.bf16.msra.mxu1 %v1993_v3  ;;  %v2017_v16 = vld [vmem:[%s2091_s27 + $0x98] sm:$0xff]   ;;  %v2018_v17 = vld [vmem:[%s2091_s27 + $0xa0] sm:$0xff]   ;;  %v2019_v19 = vld [vmem:[%s2091_s27 + $0xa8] sm:$0xff]  }
  0x14   : > { %1894 = vmatprep.subr.bf16.mxu0 %v1994_v5  ;;  %1970 = vmatprep.subr.bf16.mxu1 %v1994_v5  ;;  %v2004_v20 = vld [vmem:[%s2091_s27 + $0x30] sm:$0xff]   ;;  %v2005_v22 = vld [vmem:[%s2091_s27 + $0x38] sm:$0xff]   ;;  %v2006_v24 = vld [vmem:[%s2091_s27 + $0x40] sm:$0xff]  }
  0x15   : > { %v2020_v21 = vld [vmem:[%s2091_s27 + $0xb0] sm:$0xff]   ;;  %v2021_v23 = vld [vmem:[%s2091_s27 + $0xb8] sm:$0xff]   ;;  %v2022_v25 = vld [vmem:[%s2091_s27 + $0xc0] sm:$0xff]  }
  0x16   : > { %v2007_v26 = vld [vmem:[%s2091_s27 + $0x48] sm:$0xff]   ;;  %v2008_v28 = vld [vmem:[%s2091_s27 + $0x50] sm:$0xff]   ;;  %v2009_v30 = vld [vmem:[%s2091_s27 + $0x58] sm:$0xff]  }
  0x17   : > { %1895 = vmatpush3.bf16.msra.mxu0 %v1994_v5  ;;  %1978 = vmatpush3.bf16.msra.mxu1 %v1994_v5  ;;  %v2023_v27 = vld [vmem:[%s2091_s27 + $0xc8] sm:$0xff]   ;;  %v2024_v29 = vld [vmem:[%s2091_s27 + $0xd0] sm:$0xff]   ;;  %v2025_v31 = vld [vmem:[%s2091_s27 + $0xd8] sm:$0xff]  }
  0x18   : > { %1896 = vmatprep.subr.bf16.mxu0 %v1995_v6  ;;  %1971 = vmatprep.subr.bf16.mxu1 %v1995_v6  ;;  %v2010_v32 = vld [vmem:[%s2091_s27 + $0x60] sm:$0xff]   ;;  %v2011_v34 = vld [vmem:[%s2091_s27 + $0x68] sm:$0xff]   ;;  %v2012_v36 = vld [vmem:[%s2091_s27 + $0x70] sm:$0xff]  }
  0x19   : > { %v2026_v33 = vld [vmem:[%s2091_s27 + $0xe0] sm:$0xff]   ;;  %v2027_v35 = vld [vmem:[%s2091_s27 + $0xe8] sm:$0xff]   ;;  %v2028_v37 = vld [vmem:[%s2091_s27 + $0xf0] sm:$0xff]  }
  0x1a   : > { %v2013_v38 = vld [vmem:[%s2091_s27 + $0x78] sm:$0xff]  }
  0x1b   : > { %1897 = vmatpush3.bf16.msra.mxu0 %v1995_v6  ;;  %1979 = vmatpush3.bf16.msra.mxu1 %v1995_v6  ;;  %v2029_v39 = vld [vmem:[%s2091_s27 + $0xf8] sm:$0xff]  }
  0x1c   : > { %1898 = vmatprep.subr.bf16.mxu0 %v1996_v7  ;;  %1972 = vmatprep.subr.bf16.mxu1 %v1996_v7 }
  0x1f   : > { %1899 = vmatpush3.bf16.msra.mxu0 %v1996_v7  ;;  %1980 = vmatpush3.bf16.msra.mxu1 %v1996_v7 }
  0x20   : > { %1900 = vmatprep.subr.bf16.mxu0 %v1997_v8  ;;  %1973 = vmatprep.subr.bf16.mxu1 %v1997_v8 }
  0x23   : > { %1901 = vmatpush3.bf16.msra.mxu0 %v1997_v8  ;;  %1981 = vmatpush3.bf16.msra.mxu1 %v1997_v8 }
  0x26   : > { %1903 = vmatmul.mubr.bf16.vlgmr.msra.gmra.mrb[0].mxu0 %v1999_v10  ;;  %1935 = vmatmul.mubr.bf16.vlgmr.msra.gmra.mrb[0].mxu1 %v2015_v12 }
  0x27   : > { %1906 = vmatprep.mubr.bf16.mxu0 %v2000_v11  ;;  %1938 = vmatprep.mubr.bf16.mxu1 %v2016_v13 }
  0x2e   : > { %1907 = vmatmul.mubr.bf16.gmra.mrb[4].mxu0 %v2001_v14  ;;  %1939 = vmatmul.mubr.bf16.gmra.mrb[4].mxu1 %v2017_v16 }
  0x2f   : > { %1910 = vmatprep.mubr.bf16.mxu0 %v2002_v15  ;;  %1942 = vmatprep.mubr.bf16.mxu1 %v2018_v17 }
  0x36   : > { %1911 = vmatmul.mubr.bf16.gmra.mrb[8].mxu0 %v2003_v18  ;;  %1943 = vmatmul.mubr.bf16.gmra.mrb[8].mxu1 %v2019_v19 }
  0x37   : > { %1914 = vmatprep.mubr.bf16.mxu0 %v2004_v20  ;;  %1946 = vmatprep.mubr.bf16.mxu1 %v2020_v21 }
  0x3e   : > { %1915 = vmatmul.mubr.bf16.gmra.mrb[12].mxu0 %v2005_v22  ;;  %1947 = vmatmul.mubr.bf16.gmra.mrb[12].mxu1 %v2021_v23 }
  0x3f   : > { %1918 = vmatprep.mubr.bf16.mxu0 %v2006_v24  ;;  %1950 = vmatprep.mubr.bf16.mxu1 %v2022_v25 }
  0x46   : > { %1919 = vmatmul.mubr.bf16.gmra.mrb[16].mxu0 %v2007_v26  ;;  %1951 = vmatmul.mubr.bf16.gmra.mrb[16].mxu1 %v2023_v27 }
  0x47   : > { %1922 = vmatprep.mubr.bf16.mxu0 %v2008_v28  ;;  %1954 = vmatprep.mubr.bf16.mxu1 %v2024_v29 }
  0x4e   : > { %1923 = vmatmul.mubr.bf16.gmra.mrb[20].mxu0 %v2009_v30  ;;  %1955 = vmatmul.mubr.bf16.gmra.mrb[20].mxu1 %v2025_v31 }
  0x4f   : > { %1926 = vmatprep.mubr.bf16.mxu0 %v2010_v32  ;;  %1958 = vmatprep.mubr.bf16.mxu1 %v2026_v33 }
  0x56   : > { %1927 = vmatmul.mubr.bf16.gmra.mrb[24].mxu0 %v2011_v34  ;;  %1959 = vmatmul.mubr.bf16.gmra.mrb[24].mxu1 %v2027_v35 }
  0x57   : > { %1930 = vmatprep.mubr.bf16.mxu0 %v2012_v36  ;;  %1962 = vmatprep.mubr.bf16.mxu1 %v2028_v37 }
  0x5e   : > { %1931 = vmatmul.mubr.bf16.gmra.mrb[28].mxu0 %v2013_v38  ;;  %1963 = vmatmul.mubr.bf16.gmra.mrb[28].mxu1 %v2029_v39 }
  0xf9   : > { %v1904_v40 = vpop.f32.mrb[0].mxu0  ;;  %v2140_v41 = vpop.f32.mrb[0].mxu1 }
  0xfa   : > { %v577_v42 = vpop.f32.mrb[1].mxu0  ;;  %v2142_v43 = vpop.f32.mrb[1].mxu1  ;;  %v903_v55 = vmul.f32 %v1904_v40, %v1904_v40 }
  0xfb   : > { %v1905_v44 = vpop.f32.mrb[2].mxu0  ;;  %v2151_v45 = vpop.f32.mrb[2].mxu1  ;;  %v901_v50 = vmul.f32 %v577_v42, %v577_v42 }
  0xfc   : > { %v1663_v46 = vpack.c.bf16 %v1905_v44, %v1904_v40  ;;  %v580_v47 = vpop.f32.mrb[3].mxu0  ;;  %v1743_v48 = vpack.c.bf16 %v2151_v45, %v2140_v41  ;;  %v2155_v49 = vpop.f32.mrb[3].mxu1  ;;  %v904_v58 = vmul.f32 %v1905_v44, %v1905_v44 }
  0xfd   : > { %v832_v51 = vadd.f32 %v580_v47, %v577_v42  ;;  %v902_v52 = vmul.f32 %v580_v47, %v580_v47  ;;  %v1658_v53 = vpack.c.bf16 %v580_v47, %v577_v42  ;;  %v1738_v54 = vpack.c.bf16 %v2155_v49, %v2142_v43 }
  0xfe   : > { %1815 = vst [vmem:[%s2149_s14 + $0x8] sm:$0xff] %v1663_v46   ;;  %1831 = vst [vmem:[%s2149_s14 + $0x88] sm:$0xff] %v1743_v48  }
  0xff   : > { %v833_v56 = vadd.f32 %v1904_v40, %v832_v51  ;;  %v965_v57 = vadd.f32 %v902_v52, %v901_v50  ;;  %1659 = vst [vmem:[%s2149_s14] sm:$0xff] %v1658_v53   ;;  %1830 = vst [vmem:[%s2149_s14 + $0x80] sm:$0xff] %v1738_v54  }
 0x101   : > { %v966_v59 = vadd.f32 %v965_v57, %v903_v55  ;;  %v1908_v60 = vpop.f32.mrb[4].mxu0  ;;  %v834_v61 = vadd.f32 %v1905_v44, %v833_v56  ;;  %v2163_v62 = vpop.f32.mrb[4].mxu1 }
 0x102   : > { %v593_v63 = vpop.f32.mrb[5].mxu0  ;;  %v2165_v0 = vpop.f32.mrb[5].mxu1  ;;  %v907_v15 = vmul.f32 %v1908_v60, %v1908_v60 }
 0x103   : > { %v835_v1 = vadd.f32 %v834_v61, %v593_v63  ;;  %v905_v2 = vmul.f32 %v593_v63, %v593_v63  ;;  %v967_v3 = vadd.f32 %v966_v59, %v904_v58  ;;  %v1909_v4 = vpop.f32.mrb[6].mxu0  ;;  %v2167_v5 = vpop.f32.mrb[6].mxu1 }
 0x104   : > { %v1673_v6 = vpack.c.bf16 %v1909_v4, %v1908_v60  ;;  %v596_v7 = vpop.f32.mrb[7].mxu0  ;;  %v1753_v8 = vpack.c.bf16 %v2167_v5, %v2163_v62  ;;  %v2171_v9 = vpop.f32.mrb[7].mxu1  ;;  %v908_v18 = vmul.f32 %v1909_v4, %v1909_v4 }
 0x105   : > { %v968_v10 = vadd.f32 %v967_v3, %v905_v2  ;;  %v836_v11 = vadd.f32 %v835_v1, %v596_v7  ;;  %v906_v12 = vmul.f32 %v596_v7, %v596_v7  ;;  %v1668_v13 = vpack.c.bf16 %v596_v7, %v593_v63 }
 0x106   : > { %1817 = vst [vmem:[%s2149_s14 + $0x18] sm:$0xff] %v1673_v6   ;;  %1833 = vst [vmem:[%s2149_s14 + $0x98] sm:$0xff] %v1753_v8   ;;  %v1748_v14 = vpack.c.bf16 %v2171_v9, %v2165_v0 }
 0x107   : > { %v837_v16 = vadd.f32 %v1908_v60, %v836_v11  ;;  %v969_v17 = vadd.f32 %v968_v10, %v906_v12  ;;  %1816 = vst [vmem:[%s2149_s14 + $0x10] sm:$0xff] %v1668_v13  }
 0x108   : > { %1832 = vst [vmem:[%s2149_s14 + $0x90] sm:$0xff] %v1748_v14  }
 0x109   : > { %v970_v19 = vadd.f32 %v969_v17, %v907_v15  ;;  %v1912_v20 = vpop.f32.mrb[8].mxu0  ;;  %v838_v21 = vadd.f32 %v1909_v4, %v837_v16  ;;  %v2179_v22 = vpop.f32.mrb[8].mxu1 }
 0x10a   : > { %v609_v23 = vpop.f32.mrb[9].mxu0  ;;  %v2181_v24 = vpop.f32.mrb[9].mxu1  ;;  %v911_v39 = vmul.f32 %v1912_v20, %v1912_v20 }
 0x10b   : > { %v839_v25 = vadd.f32 %v838_v21, %v609_v23  ;;  %v909_v26 = vmul.f32 %v609_v23, %v609_v23  ;;  %v971_v27 = vadd.f32 %v970_v19, %v908_v18  ;;  %v1913_v28 = vpop.f32.mrb[10].mxu0  ;;  %v2183_v29 = vpop.f32.mrb[10].mxu1 }
 0x10c   : > { %v1683_v30 = vpack.c.bf16 %v1913_v28, %v1912_v20  ;;  %v612_v31 = vpop.f32.mrb[11].mxu0  ;;  %v1763_v32 = vpack.c.bf16 %v2183_v29, %v2179_v22  ;;  %v2187_v33 = vpop.f32.mrb[11].mxu1  ;;  %v912_v44 = vmul.f32 %v1913_v28, %v1913_v28 }
 0x10d   : > { %v972_v34 = vadd.f32 %v971_v27, %v909_v26  ;;  %v840_v35 = vadd.f32 %v839_v25, %v612_v31  ;;  %v910_v36 = vmul.f32 %v612_v31, %v612_v31  ;;  %v1678_v37 = vpack.c.bf16 %v612_v31, %v609_v23 }
 0x10e   : > { %1819 = vst [vmem:[%s2149_s14 + $0x28] sm:$0xff] %v1683_v30   ;;  %1835 = vst [vmem:[%s2149_s14 + $0xa8] sm:$0xff] %v1763_v32   ;;  %v1758_v38 = vpack.c.bf16 %v2187_v33, %v2181_v24 }
 0x10f   : > { %v841_v40 = vadd.f32 %v1912_v20, %v840_v35  ;;  %v973_v42 = vadd.f32 %v972_v34, %v910_v36  ;;  %1818 = vst [vmem:[%s2149_s14 + $0x20] sm:$0xff] %v1678_v37  }
 0x110   : > { %1834 = vst [vmem:[%s2149_s14 + $0xa0] sm:$0xff] %v1758_v38  }
 0x111   : > { %v974_v46 = vadd.f32 %v973_v42, %v911_v39  ;;  %v1916_v47 = vpop.f32.mrb[12].mxu0  ;;  %v842_v48 = vadd.f32 %v1913_v28, %v841_v40  ;;  %v2195_v50 = vpop.f32.mrb[12].mxu1 }
 0x112   : > { %v625_v51 = vpop.f32.mrb[13].mxu0  ;;  %v2197_v52 = vpop.f32.mrb[13].mxu1  ;;  %v915_v6 = vmul.f32 %v1916_v47, %v1916_v47 }
 0x113   : > { %v843_v53 = vadd.f32 %v842_v48, %v625_v51  ;;  %v913_v54 = vmul.f32 %v625_v51, %v625_v51  ;;  %v975_v55 = vadd.f32 %v974_v46, %v912_v44  ;;  %v1917_v56 = vpop.f32.mrb[14].mxu0  ;;  %v2199_v57 = vpop.f32.mrb[14].mxu1 }
 0x114   : > { %v1693_v58 = vpack.c.bf16 %v1917_v56, %v1916_v47  ;;  %v628_v59 = vpop.f32.mrb[15].mxu0  ;;  %v1773_v60 = vpack.c.bf16 %v2199_v57, %v2195_v50  ;;  %v2203_v61 = vpop.f32.mrb[15].mxu1  ;;  %v916_v10 = vmul.f32 %v1917_v56, %v1917_v56 }
 0x115   : > { %v976_v63 = vadd.f32 %v975_v55, %v913_v54  ;;  %v844_v1 = vadd.f32 %v843_v53, %v628_v59  ;;  %v914_v2 = vmul.f32 %v628_v59, %v628_v59  ;;  %v1688_v3 = vpack.c.bf16 %v628_v59, %v625_v51 }
 0x116   : > { %1821 = vst [vmem:[%s2149_s14 + $0x38] sm:$0xff] %v1693_v58   ;;  %1837 = vst [vmem:[%s2149_s14 + $0xb8] sm:$0xff] %v1773_v60   ;;  %v1768_v4 = vpack.c.bf16 %v2203_v61, %v2197_v52 }
 0x117   : > { %v845_v7 = vadd.f32 %v1916_v47, %v844_v1  ;;  %v977_v8 = vadd.f32 %v976_v63, %v914_v2  ;;  %1820 = vst [vmem:[%s2149_s14 + $0x30] sm:$0xff] %v1688_v3  }
 0x118   : > { %1836 = vst [vmem:[%s2149_s14 + $0xb0] sm:$0xff] %v1768_v4  }
 0x119   : > { %v978_v11 = vadd.f32 %v977_v8, %v915_v6  ;;  %v1920_v12 = vpop.f32.mrb[16].mxu0  ;;  %v846_v13 = vadd.f32 %v1917_v56, %v845_v7  ;;  %v2211_v14 = vpop.f32.mrb[16].mxu1 }
 0x11a   : > { %v641_v15 = vpop.f32.mrb[17].mxu0  ;;  %v2213_v16 = vpop.f32.mrb[17].mxu1  ;;  %v919_v35 = vmul.f32 %v1920_v12, %v1920_v12 }
 0x11b   : > { %v847_v17 = vadd.f32 %v846_v13, %v641_v15  ;;  %v917_v18 = vmul.f32 %v641_v15, %v641_v15  ;;  %v979_v19 = vadd.f32 %v978_v11, %v916_v10  ;;  %v1921_v20 = vpop.f32.mrb[18].mxu0  ;;  %v2215_v21 = vpop.f32.mrb[18].mxu1 }
 0x11c   : > { %v1703_v23 = vpack.c.bf16 %v1921_v20, %v1920_v12  ;;  %v644_v25 = vpop.f32.mrb[19].mxu0  ;;  %v1783_v26 = vpack.c.bf16 %v2215_v21, %v2211_v14  ;;  %v2219_v27 = vpop.f32.mrb[19].mxu1  ;;  %v920_v38 = vmul.f32 %v1921_v20, %v1921_v20 }
 0x11d   : > { %v980_v28 = vadd.f32 %v979_v19, %v917_v18  ;;  %v848_v30 = vadd.f32 %v847_v17, %v644_v25  ;;  %v918_v31 = vmul.f32 %v644_v25, %v644_v25  ;;  %v1698_v32 = vpack.c.bf16 %v644_v25, %v641_v15 }
 0x11e   : > { %1823 = vst [vmem:[%s2149_s14 + $0x48] sm:$0xff] %v1703_v23   ;;  %1839 = vst [vmem:[%s2149_s14 + $0xc8] sm:$0xff] %v1783_v26   ;;  %v1778_v34 = vpack.c.bf16 %v2219_v27, %v2213_v16 }
 0x11f   : > { %v849_v36 = vadd.f32 %v1920_v12, %v848_v30  ;;  %v981_v37 = vadd.f32 %v980_v28, %v918_v31  ;;  %1822 = vst [vmem:[%s2149_s14 + $0x40] sm:$0xff] %v1698_v32  }
 0x120   : > { %1838 = vst [vmem:[%s2149_s14 + $0xc0] sm:$0xff] %v1778_v34  }
 0x121   : > { %v982_v39 = vadd.f32 %v981_v37, %v919_v35  ;;  %v1924_v40 = vpop.f32.mrb[20].mxu0  ;;  %v850_v42 = vadd.f32 %v1921_v20, %v849_v36  ;;  %v2227_v44 = vpop.f32.mrb[20].mxu1 }
 0x122   : > { %v657_v46 = vpop.f32.mrb[21].mxu0  ;;  %v2229_v47 = vpop.f32.mrb[21].mxu1  ;;  %v923_v6 = vmul.f32 %v1924_v40, %v1924_v40 }
 0x123   : > { %v851_v48 = vadd.f32 %v850_v42, %v657_v46  ;;  %v921_v51 = vmul.f32 %v657_v46, %v657_v46  ;;  %v983_v53 = vadd.f32 %v982_v39, %v920_v38  ;;  %v1925_v54 = vpop.f32.mrb[22].mxu0  ;;  %v2231_v55 = vpop.f32.mrb[22].mxu1 }
 0x124   : > { %v1713_v56 = vpack.c.bf16 %v1925_v54, %v1924_v40  ;;  %v660_v58 = vpop.f32.mrb[23].mxu0  ;;  %v1793_v59 = vpack.c.bf16 %v2231_v55, %v2227_v44  ;;  %v2235_v60 = vpop.f32.mrb[23].mxu1  ;;  %v924_v10 = vmul.f32 %v1925_v54, %v1925_v54 }
 0x125   : > { %v984_v63 = vadd.f32 %v983_v53, %v921_v51  ;;  %v852_v1 = vadd.f32 %v851_v48, %v660_v58  ;;  %v922_v2 = vmul.f32 %v660_v58, %v660_v58  ;;  %v1708_v3 = vpack.c.bf16 %v660_v58, %v657_v46 }
 0x126   : > { %1825 = vst [vmem:[%s2149_s14 + $0x58] sm:$0xff] %v1713_v56   ;;  %1841 = vst [vmem:[%s2149_s14 + $0xd8] sm:$0xff] %v1793_v59   ;;  %v1788_v4 = vpack.c.bf16 %v2235_v60, %v2229_v47 }
 0x127   : > { %v853_v7 = vadd.f32 %v1924_v40, %v852_v1  ;;  %v985_v8 = vadd.f32 %v984_v63, %v922_v2  ;;  %1824 = vst [vmem:[%s2149_s14 + $0x50] sm:$0xff] %v1708_v3  }
 0x128   : > { %1840 = vst [vmem:[%s2149_s14 + $0xd0] sm:$0xff] %v1788_v4  }
 0x129   : > { %v986_v11 = vadd.f32 %v985_v8, %v923_v6  ;;  %v1928_v12 = vpop.f32.mrb[24].mxu0  ;;  %v854_v13 = vadd.f32 %v1925_v54, %v853_v7  ;;  %v2243_v15 = vpop.f32.mrb[24].mxu1 }
 0x12a   : > { %v673_v17 = vpop.f32.mrb[25].mxu0  ;;  %v2245_v18 = vpop.f32.mrb[25].mxu1  ;;  %v927_v39 = vmul.f32 %v1928_v12, %v1928_v12 }
 0x12b   : > { %v855_v19 = vadd.f32 %v854_v13, %v673_v17  ;;  %v925_v20 = vmul.f32 %v673_v17, %v673_v17  ;;  %v987_v23 = vadd.f32 %v986_v11, %v924_v10  ;;  %v1929_v25 = vpop.f32.mrb[26].mxu0  ;;  %v2247_v26 = vpop.f32.mrb[26].mxu1 }
 0x12c   : > { %v1723_v28 = vpack.c.bf16 %v1929_v25, %v1928_v12  ;;  %v676_v30 = vpop.f32.mrb[27].mxu0  ;;  %v1803_v31 = vpack.c.bf16 %v2247_v26, %v2243_v15  ;;  %v2251_v32 = vpop.f32.mrb[27].mxu1  ;;  %v928_v46 = vmul.f32 %v1929_v25, %v1929_v25 }
 0x12d   : > { %v988_v34 = vadd.f32 %v987_v23, %v925_v20  ;;  %v856_v35 = vadd.f32 %v855_v19, %v676_v30  ;;  %v926_v36 = vmul.f32 %v676_v30, %v676_v30  ;;  %v1718_v37 = vpack.c.bf16 %v676_v30, %v673_v17 }
 0x12e   : > { %1827 = vst [vmem:[%s2149_s14 + $0x68] sm:$0xff] %v1723_v28   ;;  %1843 = vst [vmem:[%s2149_s14 + $0xe8] sm:$0xff] %v1803_v31   ;;  %v1798_v38 = vpack.c.bf16 %v2251_v32, %v2245_v18  ;;  %v933_v31 = vmul.f32 %v2142_v43, %v2142_v43 }
 0x12f   : > { %v857_v40 = vadd.f32 %v1928_v12, %v856_v35  ;;  %v989_v42 = vadd.f32 %v988_v34, %v926_v36  ;;  %1826 = vst [vmem:[%s2149_s14 + $0x60] sm:$0xff] %v1718_v37  }
 0x130   : > { %1842 = vst [vmem:[%s2149_s14 + $0xe0] sm:$0xff] %v1798_v38   ;;  %v934_v38 = vmul.f32 %v2155_v49, %v2155_v49 }
 0x131   : > { %v990_v48 = vadd.f32 %v989_v42, %v927_v39  ;;  %v1932_v51 = vpop.f32.mrb[28].mxu0  ;;  %v858_v53 = vadd.f32 %v1929_v25, %v857_v40  ;;  %v2259_v54 = vpop.f32.mrb[28].mxu1  ;;  %v935_v39 = vmul.f32 %v2140_v41, %v2140_v41 }
 0x132   : > { %v689_v56 = vpop.f32.mrb[29].mxu0  ;;  %v2261_v58 = vpop.f32.mrb[29].mxu1  ;;  %v931_v19 = vmul.f32 %v1932_v51, %v1932_v51 }
 0x133   : > { %v859_v59 = vadd.f32 %v858_v53, %v689_v56  ;;  %v929_v63 = vmul.f32 %v689_v56, %v689_v56  ;;  %v991_v1 = vadd.f32 %v990_v48, %v928_v46  ;;  %v1933_v2 = vpop.f32.mrb[30].mxu0  ;;  %v2263_v3 = vpop.f32.mrb[30].mxu1  ;;  %v936_v46 = vmul.f32 %v2151_v45, %v2151_v45 }
 0x134   : > { %v1733_v4 = vpack.c.bf16 %v1933_v2, %v1932_v51  ;;  %v692_v6 = vpop.f32.mrb[31].mxu0  ;;  %v1813_v7 = vpack.c.bf16 %v2263_v3, %v2259_v54  ;;  %v2267_v8 = vpop.f32.mrb[31].mxu1  ;;  %v932_v25 = vmul.f32 %v1933_v2, %v1933_v2 }
 0x135   : > { %v992_v10 = vadd.f32 %v991_v1, %v929_v63  ;;  %v860_v11 = vadd.f32 %v859_v59, %v692_v6  ;;  %v930_v12 = vmul.f32 %v692_v6, %v692_v6  ;;  %v1728_v13 = vpack.c.bf16 %v692_v6, %v689_v56 }
 0x136   : > { %1829 = vst [vmem:[%s2149_s14 + $0x78] sm:$0xff] %v1733_v4   ;;  %1845 = vst [vmem:[%s2149_s14 + $0xf8] sm:$0xff] %v1813_v7   ;;  %v1808_v17 = vpack.c.bf16 %v2267_v8, %v2261_v58  ;;  %v938_v63 = vmul.f32 %v2171_v9, %v2171_v9 }
 0x137   : > { %v861_v20 = vadd.f32 %v1932_v51, %v860_v11  ;;  %v993_v23 = vadd.f32 %v992_v10, %v930_v12  ;;  %1828 = vst [vmem:[%s2149_s14 + $0x70] sm:$0xff] %v1728_v13   ;;  %v942_v12 = vmul.f32 %v2187_v33, %v2187_v33 }
 0x138   : > { %1844 = vst [vmem:[%s2149_s14 + $0xf0] sm:$0xff] %v1808_v17  }
 0x139   : > { %v994_v28 = vadd.f32 %v993_v23, %v931_v19  ;;  %v862_v30 = vadd.f32 %v1933_v2, %v861_v20 }
 0x13b   : > { %v863_v34 = vadd.f32 %v862_v30, %v2142_v43  ;;  %v995_v35 = vadd.f32 %v994_v28, %v932_v25  ;;  %v937_v43 = vmul.f32 %v2165_v0, %v2165_v0  ;;  %v946_v30 = vmul.f32 %v2203_v61, %v2203_v61 }
 0x13d   : > { %v996_v36 = vadd.f32 %v995_v35, %v933_v31  ;;  %v864_v37 = vadd.f32 %v863_v34, %v2155_v49 }
 0x13f   : > { %v865_v40 = vadd.f32 %v2140_v41, %v864_v37  ;;  %v997_v42 = vadd.f32 %v996_v36, %v934_v38  ;;  %v939_v41 = vmul.f32 %v2163_v62, %v2163_v62 }
 0x141   : > { %v998_v48 = vadd.f32 %v997_v42, %v935_v39  ;;  %v866_v51 = vadd.f32 %v2151_v45, %v865_v40  ;;  %v940_v45 = vmul.f32 %v2167_v5, %v2167_v5  ;;  %v950_v40 = vmul.f32 %v2219_v27, %v2219_v27 }
 0x143   : > { %v867_v53 = vadd.f32 %v866_v51, %v2165_v0  ;;  %v999_v56 = vadd.f32 %v998_v48, %v936_v46  ;;  %v941_v0 = vmul.f32 %v2181_v24, %v2181_v24 }
 0x145   : > { %v1000_v59 = vadd.f32 %v999_v56, %v937_v43  ;;  %v868_v49 = vadd.f32 %v867_v53, %v2171_v9 }
 0x147   : > { %v869_v1 = vadd.f32 %v2163_v62, %v868_v49  ;;  %v1001_v2 = vadd.f32 %v1000_v59, %v938_v63  ;;  %v943_v62 = vmul.f32 %v2179_v22, %v2179_v22  ;;  %v954_v59 = vmul.f32 %v2235_v60, %v2235_v60 }
 0x149   : > { %v1002_v4 = vadd.f32 %v1001_v2, %v939_v41  ;;  %v870_v6 = vadd.f32 %v2167_v5, %v869_v1  ;;  %v944_v5 = vmul.f32 %v2183_v29, %v2183_v29 }
 0x14b   : > { %v871_v7 = vadd.f32 %v870_v6, %v2181_v24  ;;  %v1003_v10 = vadd.f32 %v1002_v4, %v940_v45  ;;  %v945_v24 = vmul.f32 %v2197_v52, %v2197_v52  ;;  %v958_v6 = vmul.f32 %v2251_v32, %v2251_v32 }
 0x14d   : > { %v1004_v11 = vadd.f32 %v1003_v10, %v941_v0  ;;  %v872_v9 = vadd.f32 %v871_v7, %v2187_v33 }
 0x14f   : > { %v873_v13 = vadd.f32 %v2179_v22, %v872_v9  ;;  %v1005_v17 = vadd.f32 %v1004_v11, %v942_v12  ;;  %v947_v22 = vmul.f32 %v2195_v50, %v2195_v50  ;;  %v961_v11 = vmul.f32 %v2261_v58, %v2261_v58 }
 0x151   : > { %v1006_v19 = vadd.f32 %v1005_v17, %v943_v62  ;;  %v874_v20 = vadd.f32 %v2183_v29, %v873_v13  ;;  %v948_v29 = vmul.f32 %v2199_v57, %v2199_v57  ;;  %v963_v13 = vmul.f32 %v2259_v54, %v2259_v54 }
 0x153   : > { %v875_v23 = vadd.f32 %v874_v20, %v2197_v52  ;;  %v1007_v25 = vadd.f32 %v1006_v19, %v944_v5  ;;  %v949_v52 = vmul.f32 %v2213_v16, %v2213_v16 }
 0x155   : > { %v1008_v28 = vadd.f32 %v1007_v25, %v945_v24  ;;  %v876_v33 = vadd.f32 %v875_v23, %v2203_v61 }
 0x157   : > { %v877_v31 = vadd.f32 %v2195_v50, %v876_v33  ;;  %v1009_v34 = vadd.f32 %v1008_v28, %v946_v30  ;;  %v951_v50 = vmul.f32 %v2211_v14, %v2211_v14 }
 0x159   : > { %v1010_v35 = vadd.f32 %v1009_v34, %v947_v22  ;;  %v878_v36 = vadd.f32 %v2199_v57, %v877_v31  ;;  %v952_v57 = vmul.f32 %v2215_v21, %v2215_v21 }
 0x15b   : > { %v879_v37 = vadd.f32 %v878_v36, %v2213_v16  ;;  %v1011_v38 = vadd.f32 %v1010_v35, %v948_v29  ;;  %v953_v16 = vmul.f32 %v2229_v47, %v2229_v47 }
 0x15d   : > { %v1012_v39 = vadd.f32 %v1011_v38, %v949_v52  ;;  %v880_v61 = vadd.f32 %v879_v37, %v2219_v27 }
 0x15f   : > { %v881_v42 = vadd.f32 %v2211_v14, %v880_v61  ;;  %v1013_v46 = vadd.f32 %v1012_v39, %v950_v40  ;;  %v955_v14 = vmul.f32 %v2227_v44, %v2227_v44 }
 0x161   : > { %v1014_v48 = vadd.f32 %v1013_v46, %v951_v50  ;;  %v882_v51 = vadd.f32 %v2215_v21, %v881_v42  ;;  %v956_v21 = vmul.f32 %v2231_v55, %v2231_v55 }
 0x163   : > { %v883_v43 = vadd.f32 %v882_v51, %v2229_v47  ;;  %v1015_v53 = vadd.f32 %v1014_v48, %v952_v57  ;;  %v957_v47 = vmul.f32 %v2245_v18, %v2245_v18 }
 0x165   : > { %v1016_v56 = vadd.f32 %v1015_v53, %v953_v16  ;;  %v884_v27 = vadd.f32 %v883_v43, %v2235_v60 }
 0x167   : > { %v885_v49 = vadd.f32 %v2227_v44, %v884_v27  ;;  %v1017_v63 = vadd.f32 %v1016_v56, %v954_v59  ;;  %v959_v44 = vmul.f32 %v2243_v15, %v2243_v15 }
 0x169   : > { %v1018_v41 = vadd.f32 %v1017_v63, %v955_v14  ;;  %v886_v1 = vadd.f32 %v2231_v55, %v885_v49  ;;  %v960_v55 = vmul.f32 %v2247_v26, %v2247_v26 }
 0x16b   : > { %v887_v2 = vadd.f32 %v886_v1, %v2245_v18  ;;  %v1019_v45 = vadd.f32 %v1018_v41, %v956_v21 }
 0x16d   : > { %v1020_v4 = vadd.f32 %v1019_v45, %v957_v47  ;;  %v888_v60 = vadd.f32 %v887_v2, %v2251_v32 }
 0x16f   : > { %v889_v0 = vadd.f32 %v2243_v15, %v888_v60  ;;  %v1021_v7 = vadd.f32 %v1020_v4, %v958_v6  ;;  %v962_v15 = vmul.f32 %v2267_v8, %v2267_v8 }
 0x171   : > { %v1022_v10 = vadd.f32 %v1021_v7, %v959_v44  ;;  %v890_v18 = vadd.f32 %v2247_v26, %v889_v0  ;;  %v964_v26 = vmul.f32 %v2263_v3, %v2263_v3 }
 0x173   : > { %v891_v9 = vadd.f32 %v890_v18, %v2261_v58  ;;  %v1023_v32 = vadd.f32 %v1022_v10, %v960_v55 }
 0x175   : > { %v1024_v12 = vadd.f32 %v1023_v32, %v961_v11  ;;  %v892_v62 = vadd.f32 %v891_v9, %v2267_v8 }
 0x177   : > { %v893_v17 = vadd.f32 %v2259_v54, %v892_v62  ;;  %v1025_v5 = vadd.f32 %v1024_v12, %v962_v15 }
 0x179   : > { %v894_v19 = vadd.f32 %v2263_v3, %v893_v17  ;;  %v1026_v58 = vadd.f32 %v1025_v5, %v963_v13 }
 0x17b   : > { %v895_v20 = vrot.slane %v894_v19, 4  ;;  %v1027_v24 = vadd.f32 %v1026_v58, %v964_v26 }
 0x17d   : > { %v896_v23 = vadd.f32 %v895_v20, %v894_v19  ;;  %v1028_v25 = vrot.slane %v1027_v24, 4 }
 0x17f   : > { %v897_v28 = vrot.slane %v896_v23, 2  ;;  %v1029_v8 = vadd.f32 %v1028_v25, %v1027_v24 }
 0x181   : > { %v898_v33 = vadd.f32 %v897_v28, %v896_v23  ;;  %v1030_v30 = vrot.slane %v1029_v8, 2 }
 0x183   : > { %v899_v22 = vrot.slane %v898_v33, 1  ;;  %v1031_v54 = vadd.f32 %v1030_v30, %v1029_v8 }
 0x185   : > { %v900_v31 = vadd.f32 %v899_v22, %v898_v33  ;;  %v1032_v34 = vrot.slane %v1031_v54, 1 }
 0x187   : > { %v1033_v3 = vadd.f32 %v1032_v34, %v1031_v54  ;;  %1354 = vst [vmem:[%s217_s20] sm:$0xff] %v900_v31 }
 0x189   : > { %1355 = vst [vmem:[%s221_s23] sm:$0xff] %v1033_v3 }
 0x18a PF: > { %s15_s15 = sadd.s32 1, %s2036_s15  }
 0x18b   : > { %p12_p5 = scmp.ge.s32.totalorder %s15_s15, 4  }
 0x18d   :  { %14 = sbr.rel (!%p12_p5) target bundleno = 1 (0x1), region = 82 }

// kernel: _forward_impl.27
= control target key start
LH: loop header
LB: loop body
LE: loop exit
PB: predicated region body
PF: predicated region fallthrough
CT: control target
= control target key end

     0   :  { %s1670_s12 = smov 0   ;;  %s1959_s0 = inlined_call_operand.vmem [shape: bf16[1024,128], index: 0, kind: input, shape index: {}]   ;;  %s1960_s1 = inlined_call_operand.vmem [shape: f32[1,128], index: 1, kind: input, shape index: {}]   ;;  %s1961_s2 = inlined_call_operand.vmem [shape: f32[1,128], index: 2, kind: input, shape index: {}]   ;;  %s1962_s3 = inlined_call_operand.vmem [shape: f32[1024,128], index: 3, kind: output, shape index: {}]  }
   0x1 LB: > { %s1140_s13 = sadd.s32 4294967295, %s1648_s12   ;;  %p1144_p0 = scmp.ge.s32.totalorder %s1648_s12, 1  ;;  %s1648_s12 = sphi %s1670_s12, %s13_s12  }
   0x2   : > { %p138_p1 = scmp.lt.s32.totalorder %s1648_s12, 3 }
   0x4   : > { %p139_p2 = pnand %p1144_p0, %p138_p1 }
   0x5   : > { %s1145_s14 = sshll.u32 (!%p139_p2), %s1140_s13, 6  ;;  %v1689_v0 = vld [vmem:[%s1960_s1] ss:$0 sm:$0xff] (!%p139_p2) }
   0x6   : > { %142 = sbr.rel (%p139_p2) target bundleno = 203 (0xcb), region = 32  ;;  %p163_p3 = scmp.lt.s32.totalorder (!%p139_p2), %s1145_s14, 127  ;;  %v1698_v9 = vld [vmem:[%s1961_s2] ss:$0 sm:$0xff] (!%p139_p2) }
   0xd   : > { %s1964_s14 = smov (!%p163_p3, %s1145_s14), 127 }
   0xe   : > { %s1146_s15 = sshll.u32 %s1964_s14, 2  ;;  %s1148_s23 = sshll.u32 %s1964_s14, 3 }
   0xf   : > { %s1684_s18 = scalar_lea.vmem %s1959_s0, %s1146_s15  ;;  %s1744_s26 = scalar_lea.vmem %s1962_s3, %s1148_s23 }
  0x10   : > { %v1218_v1 = vld [vmem:[%s1684_s18] sm:$0xff]   ;;  %v1345_v2 = vld [vmem:[%s1684_s18 + $0x8] sm:$0xff]   ;;  %v1346_v3 = vld [vmem:[%s1684_s18 + $0x10] sm:$0xff]  }
  0x11   : > { %v1219_v4 = vunpack.c.l.bf16 %v1218_v1  ;;  %v1220_v5 = vunpack.c.h.bf16 %v1218_v1  ;;  %v1223_v6 = vunpack.c.l.bf16 %v1345_v2  ;;  %v1224_v7 = vunpack.c.h.bf16 %v1345_v2  ;;  %v1347_v8 = vld [vmem:[%s1684_s18 + $0x18] sm:$0xff]   ;;  %v1348_v44 = vld [vmem:[%s1684_s18 + $0x20] sm:$0xff]   ;;  %v1349_v52 = vld [vmem:[%s1684_s18 + $0x28] sm:$0xff]  }
  0x12   : > { %v1227_v10 = vunpack.c.l.bf16 %v1346_v3  ;;  %v1228_v11 = vunpack.c.h.bf16 %v1346_v3  ;;  %v1231_v12 = vunpack.c.l.bf16 %v1347_v8  ;;  %v1232_v13 = vunpack.c.h.bf16 %v1347_v8  ;;  %v1350_v56 = vld [vmem:[%s1684_s18 + $0x30] sm:$0xff]  }
  0x13   : > { %v309_v14 = vmul.f32 %v1219_v4, %v1689_v0  ;;  %v310_v15 = vmul.f32 %v1220_v5, %v1689_v0  ;;  %v311_v16 = vmul.f32 %v1223_v6, %v1689_v0  ;;  %v312_v17 = vmul.f32 %v1224_v7, %v1689_v0  ;;  %v1726_v6 = vld [vmem:[%s1684_s18 + $0x38] sm:$0xff]  }
  0x14   : > { %v313_v18 = vmul.f32 %v1227_v10, %v1689_v0  ;;  %v314_v19 = vmul.f32 %v1228_v11, %v1689_v0  ;;  %v315_v20 = vmul.f32 %v1231_v12, %v1689_v0  ;;  %v316_v21 = vmul.f32 %v1232_v13, %v1689_v0 }
  0x15   : > { %v380_v22 = vadd.f32 %v1698_v9, %v309_v14  ;;  %v381_v23 = vadd.f32 %v1698_v9, %v310_v15  ;;  %v382_v24 = vadd.f32 %v1698_v9, %v311_v16  ;;  %v383_v25 = vadd.f32 %v1698_v9, %v312_v17 }
  0x16   : > { %v384_v26 = vadd.f32 %v1698_v9, %v313_v18  ;;  %v385_v27 = vadd.f32 %v1698_v9, %v314_v19  ;;  %v386_v28 = vadd.f32 %v1698_v9, %v315_v20  ;;  %v387_v29 = vadd.f32 %v1698_v9, %v316_v21 }
  0x17   : > { %vm444_vm0 = vcmp.ge.f32.partialorder %v380_v22, 0.0  ;;  %v508_v30 = vmul.f32 0.2, %v380_v22  ;;  %vm445_vm1 = vcmp.ge.f32.partialorder %v381_v23, 0.0  ;;  %v509_v31 = vmul.f32 0.2, %v381_v23 }
  0x18   : > { %vm446_vm2 = vcmp.ge.f32.partialorder %v382_v24, 0.0  ;;  %v510_v32 = vmul.f32 0.2, %v382_v24  ;;  %vm447_vm3 = vcmp.ge.f32.partialorder %v383_v25, 0.0  ;;  %v511_v33 = vmul.f32 0.2, %v383_v25 }
  0x19   : > { %v572_v34 = vsel %vm444_vm0, %v380_v22, %v508_v30  ;;  %v573_v35 = vsel %vm445_vm1, %v381_v23, %v509_v31  ;;  %vm448_vm4 = vcmp.ge.f32.partialorder %v384_v26, 0.0  ;;  %v512_v36 = vmul.f32 0.2, %v384_v26 }
  0x1a   : > { %v1151_v37 = vmul.f32 -1.442695, %v572_v34  ;;  %v1152_v38 = vmul.f32 -1.442695, %v573_v35  ;;  %v574_v39 = vsel %vm446_vm2, %v382_v24, %v510_v32  ;;  %v575_v40 = vsel %vm447_vm3, %v383_v25, %v511_v33 }
  0x1b   : > { %v1153_v41 = vmul.f32 -1.442695, %v574_v39  ;;  %v1154_v42 = vmul.f32 -1.442695, %v575_v40  ;;  %v576_v43 = vsel %vm448_vm4, %v384_v26, %v512_v36  ;;  %vm449_vm5 = vcmp.ge.f32.partialorder %v385_v27, 0.0 }
  0x1c   : > { %1384 = vpow2.f32 %v1151_v37  ;;  %v1155_v45 = vmul.f32 -1.442695, %v576_v43  ;;  %v513_v46 = vmul.f32 0.2, %v385_v27  ;;  %vm450_vm6 = vcmp.ge.f32.partialorder %v386_v28, 0.0 }
  0x1d   : > { %1386 = vpow2.f32 %v1152_v38  ;;  %v514_v47 = vmul.f32 0.2, %v386_v28  ;;  %vm451_vm7 = vcmp.ge.f32.partialorder %v387_v29, 0.0  ;;  %v515_v48 = vmul.f32 0.2, %v387_v29 }
  0x1e   : > { %1388 = vpow2.f32 %v1153_v41  ;;  %v577_v49 = vsel %vm449_vm5, %v385_v27, %v513_v46  ;;  %v1235_v50 = vunpack.c.l.bf16 %v1348_v44  ;;  %v1236_v51 = vunpack.c.h.bf16 %v1348_v44  ;;  %v1353_v46 = vld [vmem:[%s1684_s18 + $0x48] sm:$0xff]  }
  0x1f   : > { %1390 = vpow2.f32 %v1154_v42  ;;  %v1156_v53 = vmul.f32 -1.442695, %v577_v49  ;;  %v578_v54 = vsel %vm450_vm6, %v386_v28, %v514_v47  ;;  %v579_v55 = vsel %vm451_vm7, %v387_v29, %v515_v48  ;;  %v1352_v42 = vld [vmem:[%s1684_s18 + $0x40] sm:$0xff]  }
  0x20   : > { %1392 = vpow2.f32 %v1155_v45  ;;  %v1157_v57 = vmul.f32 -1.442695, %v578_v54  ;;  %v1158_v58 = vmul.f32 -1.442695, %v579_v55  ;;  %v317_v59 = vmul.f32 %v1235_v50, %v1689_v0 }
  0x21   : > { %1394 = vpow2.f32 %v1156_v53  ;;  %v318_v60 = vmul.f32 %v1236_v51, %v1689_v0  ;;  %v1239_v61 = vunpack.c.l.bf16 %v1349_v52  ;;  %v1240_v62 = vunpack.c.h.bf16 %v1349_v52 }
  0x22   : > { %1396 = vpow2.f32 %v1157_v57  ;;  %v388_v63 = vadd.f32 %v1698_v9, %v317_v59  ;;  %v1243_v1 = vunpack.c.l.bf16 %v1350_v56  ;;  %v1244_v2 = vunpack.c.h.bf16 %v1350_v56 }
  0x23   : > { %1398 = vpow2.f32 %v1158_v58  ;;  %v389_v3 = vadd.f32 %v1698_v9, %v318_v60  ;;  %v319_v4 = vmul.f32 %v1239_v61, %v1689_v0  ;;  %v320_v5 = vmul.f32 %v1240_v62, %v1689_v0 }
  0x24   : > { %vm452_vm8 = vcmp.ge.f32.partialorder %v388_v63, 0.0  ;;  %v516_v7 = vmul.f32 0.2, %v388_v63  ;;  %v321_v8 = vmul.f32 %v1243_v1, %v1689_v0  ;;  %v322_v10 = vmul.f32 %v1244_v2, %v1689_v0 }
  0x25   : > { %vm453_vm9 = vcmp.ge.f32.partialorder %v389_v3, 0.0  ;;  %v517_v11 = vmul.f32 0.2, %v389_v3  ;;  %v390_v12 = vadd.f32 %v1698_v9, %v319_v4  ;;  %v391_v13 = vadd.f32 %v1698_v9, %v320_v5 }
  0x26   : > { %v1385_v14 = vpop.eup %1384  ;;  %v580_v15 = vsel %vm452_vm8, %v388_v63, %v516_v7  ;;  %v392_v16 = vadd.f32 %v1698_v9, %v321_v8  ;;  %v393_v17 = vadd.f32 %v1698_v9, %v322_v10  ;;  %v1247_v18 = vunpack.c.l.bf16 %v1726_v6  ;;  %v1354_v10 = vld [vmem:[%s1684_s18 + $0x50] sm:$0xff]  }
  0x27   : > { %v1387_v19 = vpop.eup %1386  ;;  %v828_v20 = vadd.f32 1.0, %v1385_v14  ;;  %v1159_v21 = vmul.f32 -1.442695, %v580_v15  ;;  %v581_v22 = vsel %vm453_vm9, %v389_v3, %v517_v11  ;;  %vm454_vm10 = vcmp.ge.f32.partialorder %v390_v12, 0.0 }
  0x28   : > { %v1389_v23 = vpop.eup %1388  ;;  %v829_v24 = vadd.f32 1.0, %v1387_v19  ;;  %v1160_v25 = vmul.f32 -1.442695, %v581_v22  ;;  %v518_v26 = vmul.f32 0.2, %v390_v12  ;;  %vm455_vm11 = vcmp.ge.f32.partialorder %v391_v13, 0.0 }
  0x29   : > { %v1391_v27 = vpop.eup %1390  ;;  %1400 = vrcp.f32 %v828_v20  ;;  %v830_v28 = vadd.f32 1.0, %v1389_v23  ;;  %v519_v29 = vmul.f32 0.2, %v391_v13  ;;  %vm456_vm12 = vcmp.ge.f32.partialorder %v392_v16, 0.0  ;;  %v1355_v22 = vld [vmem:[%s1684_s18 + $0x58] sm:$0xff]  }
  0x2a   : > { %v1393_v30 = vpop.eup %1392  ;;  %1402 = vrcp.f32 %v829_v24  ;;  %v831_v31 = vadd.f32 1.0, %v1391_v27  ;;  %v582_v32 = vsel %vm454_vm10, %v390_v12, %v518_v26  ;;  %v520_v33 = vmul.f32 0.2, %v392_v16 }
  0x2b   : > { %v1395_v34 = vpop.eup %1394  ;;  %1404 = vrcp.f32 %v830_v28  ;;  %v832_v35 = vadd.f32 1.0, %v1393_v30  ;;  %v1161_v36 = vmul.f32 -1.442695, %v582_v32  ;;  %v583_v37 = vsel %vm455_vm11, %v391_v13, %v519_v29 }
  0x2c   : > { %v1397_v38 = vpop.eup %1396  ;;  %1406 = vrcp.f32 %v831_v31  ;;  %v833_v39 = vadd.f32 1.0, %v1395_v34  ;;  %v1162_v40 = vmul.f32 -1.442695, %v583_v37  ;;  %v584_v41 = vsel %vm456_vm12, %v392_v16, %v520_v33 }
  0x2d   : > { %v1399_v43 = vpop.eup %1398  ;;  %1408 = vrcp.f32 %v832_v35  ;;  %v834_v44 = vadd.f32 1.0, %v1397_v38  ;;  %v1163_v45 = vmul.f32 -1.442695, %v584_v41  ;;  %vm457_vm13 = vcmp.ge.f32.partialorder %v393_v17, 0.0 }
  0x2e   : > { %1410 = vrcp.f32 %v833_v39  ;;  %v835_v47 = vadd.f32 1.0, %v1399_v43  ;;  %v521_v48 = vmul.f32 0.2, %v393_v17  ;;  %v323_v49 = vmul.f32 %v1247_v18, %v1689_v0 }
  0x2f   : > { %1412 = vrcp.f32 %v834_v44  ;;  %v1248_v50 = vunpack.c.h.bf16 %v1726_v6  ;;  %v1251_v51 = vunpack.c.l.bf16 %v1352_v42  ;;  %v1252_v52 = vunpack.c.h.bf16 %v1352_v42 }
  0x30   : > { %1414 = vrcp.f32 %v835_v47  ;;  %v585_v53 = vsel %vm457_vm13, %v393_v17, %v521_v48  ;;  %v394_v54 = vadd.f32 %v1698_v9, %v323_v49  ;;  %v1255_v55 = vunpack.c.l.bf16 %v1353_v46 }
  0x31   : > { %1416 = vpow2.f32 %v1159_v21  ;;  %v1164_v56 = vmul.f32 -1.442695, %v585_v53  ;;  %v324_v57 = vmul.f32 %v1248_v50, %v1689_v0  ;;  %v325_v58 = vmul.f32 %v1251_v51, %v1689_v0 }
  0x32   : > { %1418 = vpow2.f32 %v1160_v25  ;;  %vm458_vm14 = vcmp.ge.f32.partialorder %v394_v54, 0.0  ;;  %v522_v59 = vmul.f32 0.2, %v394_v54  ;;  %v326_v60 = vmul.f32 %v1252_v52, %v1689_v0 }
  0x33   : > { %v1401_v61 = vpop.eup %1400  ;;  %1420 = vpow2.f32 %v1161_v36  ;;  %v395_v62 = vadd.f32 %v1698_v9, %v324_v57  ;;  %v396_v63 = vadd.f32 %v1698_v9, %v325_v58  ;;  %v327_v1 = vmul.f32 %v1255_v55, %v1689_v0 }
  0x34   : > { %v1403_v2 = vpop.eup %1402  ;;  %1020 = vst [vmem:[%s1744_s26] sm:$0xff] %v1401_v61  ;;  %1422 = vpow2.f32 %v1162_v40  ;;  %v586_v3 = vsel %vm458_vm14, %v394_v54, %v522_v59  ;;  %v397_v4 = vadd.f32 %v1698_v9, %v326_v60  ;;  %v1256_v5 = vunpack.c.h.bf16 %v1353_v46  ;;  %v1356_v61 = vld [vmem:[%s1684_s18 + $0x60] sm:$0xff]  }
  0x35   : > { %v1405_v6 = vpop.eup %1404  ;;  %1021 = vst [vmem:[%s1744_s26 + $0x8] sm:$0xff] %v1403_v2  ;;  %1424 = vpow2.f32 %v1163_v45  ;;  %v1165_v7 = vmul.f32 -1.442695, %v586_v3  ;;  %vm459_vm15 = vcmp.ge.f32.partialorder %v395_v62, 0.0  ;;  %v523_v8 = vmul.f32 0.2, %v395_v62 }
  0x36   : > { %v1407_v11 = vpop.eup %1406  ;;  %1022 = vst [vmem:[%s1744_s26 + $0x10] sm:$0xff] %v1405_v6  ;;  %1426 = vpow2.f32 %v1164_v56  ;;  %vm460_vm0 = vcmp.ge.f32.partialorder %v396_v63, 0.0  ;;  %v524_v12 = vmul.f32 0.2, %v396_v63  ;;  %vm461_vm1 = vcmp.ge.f32.partialorder %v397_v4, 0.0 }
  0x37   : > { %v1409_v13 = vpop.eup %1408  ;;  %1023 = vst [vmem:[%s1744_s26 + $0x18] sm:$0xff] %v1407_v11  ;;  %1428 = vpow2.f32 %v1165_v7  ;;  %v587_v14 = vsel %vm459_vm15, %v395_v62, %v523_v8  ;;  %v525_v15 = vmul.f32 0.2, %v397_v4  ;;  %v398_v16 = vadd.f32 %v1698_v9, %v327_v1 }
  0x38   : > { %v1411_v17 = vpop.eup %1410  ;;  %1024 = vst [vmem:[%s1744_s26 + $0x20] sm:$0xff] %v1409_v13  ;;  %v1166_v18 = vmul.f32 -1.442695, %v587_v14  ;;  %v588_v19 = vsel %vm460_vm0, %v396_v63, %v524_v12  ;;  %v328_v20 = vmul.f32 %v1256_v5, %v1689_v0  ;;  %v1259_v21 = vunpack.c.l.bf16 %v1354_v10  ;;  %v1357_v13 = vld [vmem:[%s1684_s18 + $0x68] sm:$0xff]   ;;  %v1778_v14 = vld [vmem:[%s1684_s18 + $0x70] sm:$0xff]  }
  0x39   : > { %v1413_v23 = vpop.eup %1412  ;;  %1025 = vst [vmem:[%s1744_s26 + $0x28] sm:$0xff] %v1411_v17  ;;  %v1167_v24 = vmul.f32 -1.442695, %v588_v19  ;;  %v589_v25 = vsel %vm461_vm1, %v397_v4, %v525_v15  ;;  %vm462_vm2 = vcmp.ge.f32.partialorder %v398_v16, 0.0  ;;  %v526_v26 = vmul.f32 0.2, %v398_v16 }
  0x3a   : > { %v1415_v27 = vpop.eup %1414  ;;  %1026 = vst [vmem:[%s1744_s26 + $0x30] sm:$0xff] %v1413_v23  ;;  %1430 = vpow2.f32 %v1166_v18  ;;  %v1168_v28 = vmul.f32 -1.442695, %v589_v25  ;;  %v399_v29 = vadd.f32 %v1698_v9, %v328_v20  ;;  %v329_v30 = vmul.f32 %v1259_v21, %v1689_v0 }
  0x3b   : > { %v1417_v31 = vpop.eup %1416  ;;  %1027 = vst [vmem:[%s1744_s26 + $0x38] sm:$0xff] %v1415_v27  ;;  %1432 = vpow2.f32 %v1167_v24  ;;  %v590_v32 = vsel %vm462_vm2, %v398_v16, %v526_v26  ;;  %v1260_v33 = vunpack.c.h.bf16 %v1354_v10  ;;  %v1263_v34 = vunpack.c.l.bf16 %v1355_v22 }
  0x3c   : > { %v1419_v35 = vpop.eup %1418  ;;  %v836_v36 = vadd.f32 1.0, %v1417_v31  ;;  %1434 = vpow2.f32 %v1168_v28  ;;  %v1169_v37 = vmul.f32 -1.442695, %v590_v32  ;;  %vm463_vm3 = vcmp.ge.f32.partialorder %v399_v29, 0.0 }
  0x3d   : > { %v1421_v38 = vpop.eup %1420  ;;  %v837_v39 = vadd.f32 1.0, %v1419_v35  ;;  %v527_v40 = vmul.f32 0.2, %v399_v29  ;;  %v400_v41 = vadd.f32 %v1698_v9, %v329_v30  ;;  %v330_v42 = vmul.f32 %v1260_v33, %v1689_v0 }
  0x3e   : > { %v1423_v43 = vpop.eup %1422  ;;  %1436 = vrcp.f32 %v836_v36  ;;  %v838_v44 = vadd.f32 1.0, %v1421_v38  ;;  %v331_v45 = vmul.f32 %v1263_v34, %v1689_v0  ;;  %v1264_v46 = vunpack.c.h.bf16 %v1355_v22 }
  0x3f   : > { %v1425_v47 = vpop.eup %1424  ;;  %1438 = vrcp.f32 %v837_v39  ;;  %v839_v48 = vadd.f32 1.0, %v1423_v43  ;;  %v591_v49 = vsel %vm463_vm3, %v399_v29, %v527_v40  ;;  %vm464_vm4 = vcmp.ge.f32.partialorder %v400_v41, 0.0 }
  0x40   : > { %v1427_v50 = vpop.eup %1426  ;;  %1440 = vrcp.f32 %v838_v44  ;;  %v840_v51 = vadd.f32 1.0, %v1425_v47  ;;  %v1170_v52 = vmul.f32 -1.442695, %v591_v49  ;;  %v528_v53 = vmul.f32 0.2, %v400_v41 }
  0x41   : > { %v1429_v54 = vpop.eup %1428  ;;  %1442 = vrcp.f32 %v839_v48  ;;  %v841_v55 = vadd.f32 1.0, %v1427_v50  ;;  %v401_v56 = vadd.f32 %v1698_v9, %v330_v42  ;;  %v402_v57 = vadd.f32 %v1698_v9, %v331_v45 }
  0x42   : > { %1444 = vrcp.f32 %v840_v51  ;;  %v842_v58 = vadd.f32 1.0, %v1429_v54  ;;  %v592_v59 = vsel %vm464_vm4, %v400_v41, %v528_v53  ;;  %v332_v60 = vmul.f32 %v1264_v46, %v1689_v0 }
  0x43   : > { %1446 = vrcp.f32 %v841_v55  ;;  %v1171_v62 = vmul.f32 -1.442695, %v592_v59  ;;  %vm465_vm5 = vcmp.ge.f32.partialorder %v401_v56, 0.0  ;;  %v529_v63 = vmul.f32 0.2, %v401_v56 }
  0x44   : > { %v1431_v1 = vpop.eup %1430  ;;  %1448 = vrcp.f32 %v842_v58  ;;  %vm466_vm6 = vcmp.ge.f32.partialorder %v402_v57, 0.0  ;;  %v530_v2 = vmul.f32 0.2, %v402_v57  ;;  %v403_v3 = vadd.f32 %v1698_v9, %v332_v60 }
  0x45   : > { %v1433_v4 = vpop.eup %1432  ;;  %v843_v5 = vadd.f32 1.0, %v1431_v1  ;;  %1450 = vpow2.f32 %v1169_v37  ;;  %v593_v6 = vsel %vm465_vm5, %v401_v56, %v529_v63  ;;  %v1267_v7 = vunpack.c.l.bf16 %v1356_v61  ;;  %v1359_v56 = vld [vmem:[%s1684_s18 + $0x78] sm:$0xff]  }
  0x46   : > { %v1435_v8 = vpop.eup %1434  ;;  %v844_v10 = vadd.f32 1.0, %v1433_v4  ;;  %1452 = vpow2.f32 %v1170_v52  ;;  %v1172_v11 = vmul.f32 -1.442695, %v593_v6  ;;  %v594_v12 = vsel %vm466_vm6, %v402_v57, %v530_v2  ;;  %v1360_v57 = vld [vmem:[%s1684_s18 + $0x80] sm:$0xff]  }
  0x47   : > { %1454 = vrcp.f32 %v843_v5  ;;  %v845_v15 = vadd.f32 1.0, %v1435_v8  ;;  %v1173_v16 = vmul.f32 -1.442695, %v594_v12  ;;  %vm467_vm7 = vcmp.ge.f32.partialorder %v403_v3, 0.0 }
  0x48   : > { %v1437_v17 = vpop.eup %1436  ;;  %1456 = vrcp.f32 %v844_v10  ;;  %v531_v18 = vmul.f32 0.2, %v403_v3  ;;  %v333_v19 = vmul.f32 %v1267_v7, %v1689_v0  ;;  %v1268_v20 = vunpack.c.h.bf16 %v1356_v61 }
  0x49   : > { %v1439_v21 = vpop.eup %1438  ;;  %1028 = vst [vmem:[%s1744_s26 + $0x40] sm:$0xff] %v1437_v17  ;;  %1458 = vrcp.f32 %v845_v15  ;;  %v1271_v22 = vunpack.c.l.bf16 %v1357_v13  ;;  %v1272_v23 = vunpack.c.h.bf16 %v1357_v13  ;;  %v1275_v24 = vunpack.c.l.bf16 %v1778_v14 }
  0x4a   : > { %v1441_v25 = vpop.eup %1440  ;;  %1029 = vst [vmem:[%s1744_s26 + $0x48] sm:$0xff] %v1439_v21  ;;  %1460 = vpow2.f32 %v1171_v62  ;;  %v595_v26 = vsel %vm467_vm7, %v403_v3, %v531_v18  ;;  %v404_v27 = vadd.f32 %v1698_v9, %v333_v19  ;;  %v334_v28 = vmul.f32 %v1268_v20, %v1689_v0 }
  0x4b   : > { %v1443_v29 = vpop.eup %1442  ;;  %1030 = vst [vmem:[%s1744_s26 + $0x50] sm:$0xff] %v1441_v25  ;;  %1462 = vpow2.f32 %v1172_v11  ;;  %v1174_v30 = vmul.f32 -1.442695, %v595_v26  ;;  %v335_v31 = vmul.f32 %v1271_v22, %v1689_v0  ;;  %v336_v32 = vmul.f32 %v1272_v23, %v1689_v0 }
  0x4c   : > { %v1445_v33 = vpop.eup %1444  ;;  %1031 = vst [vmem:[%s1744_s26 + $0x58] sm:$0xff] %v1443_v29  ;;  %1464 = vpow2.f32 %v1173_v16  ;;  %vm468_vm8 = vcmp.ge.f32.partialorder %v404_v27, 0.0  ;;  %v532_v34 = vmul.f32 0.2, %v404_v27  ;;  %v405_v35 = vadd.f32 %v1698_v9, %v334_v28 }
  0x4d   : > { %v1447_v36 = vpop.eup %1446  ;;  %1032 = vst [vmem:[%s1744_s26 + $0x60] sm:$0xff] %v1445_v33  ;;  %1466 = vpow2.f32 %v1174_v30  ;;  %v406_v37 = vadd.f32 %v1698_v9, %v335_v31  ;;  %v407_v38 = vadd.f32 %v1698_v9, %v336_v32  ;;  %v337_v39 = vmul.f32 %v1275_v24, %v1689_v0  ;;  %v1361_v24 = vld [vmem:[%s1684_s18 + $0x88] sm:$0xff]  }
  0x4e   : > { %v1449_v40 = vpop.eup %1448  ;;  %1033 = vst [vmem:[%s1744_s26 + $0x68] sm:$0xff] %v1447_v36  ;;  %v596_v41 = vsel %vm468_vm8, %v404_v27, %v532_v34  ;;  %vm469_vm9 = vcmp.ge.f32.partialorder %v405_v35, 0.0  ;;  %v533_v42 = vmul.f32 0.2, %v405_v35  ;;  %v1276_v43 = vunpack.c.h.bf16 %v1778_v14 }
  0x4f   : > { %v1451_v44 = vpop.eup %1450  ;;  %1034 = vst [vmem:[%s1744_s26 + $0x70] sm:$0xff] %v1449_v40  ;;  %v1175_v45 = vmul.f32 -1.442695, %v596_v41  ;;  %vm470_vm10 = vcmp.ge.f32.partialorder %v406_v37, 0.0  ;;  %v534_v46 = vmul.f32 0.2, %v406_v37  ;;  %v408_v51 = vadd.f32 %v1698_v9, %v337_v39 }
  0x50   : > { %vm471_vm11 = vcmp.ge.f32.partialorder %v407_v38, 0.0  ;;  %v1453_v47 = vpop.eup %1452  ;;  %v846_v48 = vadd.f32 1.0, %v1451_v44  ;;  %v597_v49 = vsel %vm469_vm9, %v405_v35, %v533_v42  ;;  %v535_v50 = vmul.f32 0.2, %v407_v38 }
  0x51   : > { %v1455_v52 = vpop.eup %1454  ;;  %v847_v53 = vadd.f32 1.0, %v1453_v47  ;;  %1468 = vpow2.f32 %v1175_v45  ;;  %v1176_v54 = vmul.f32 -1.442695, %v597_v49  ;;  %v598_v55 = vsel %vm470_vm10, %v406_v37, %v534_v46  ;;  %v1362_v46 = vld [vmem:[%s1684_s18 + $0x90] sm:$0xff]  }
  0x52   : > { %v1457_v58 = vpop.eup %1456  ;;  %1035 = vst [vmem:[%s1744_s26 + $0x78] sm:$0xff] %v1455_v52  ;;  %1470 = vrcp.f32 %v846_v48  ;;  %v1177_v59 = vmul.f32 -1.442695, %v598_v55  ;;  %v599_v60 = vsel %vm471_vm11, %v407_v38, %v535_v50  ;;  %vm472_vm12 = vcmp.ge.f32.partialorder %v408_v51, 0.0 }
  0x53   : > { %v1459_v61 = vpop.eup %1458  ;;  %1036 = vst [vmem:[%s1744_s26 + $0x80] sm:$0xff] %v1457_v58  ;;  %1472 = vrcp.f32 %v847_v53  ;;  %v1178_v62 = vmul.f32 -1.442695, %v599_v60  ;;  %v536_v63 = vmul.f32 0.2, %v408_v51  ;;  %v338_v1 = vmul.f32 %v1276_v43, %v1689_v0 }
  0x54   : > { %v1461_v2 = vpop.eup %1460  ;;  %1037 = vst [vmem:[%s1744_s26 + $0x88] sm:$0xff] %v1459_v61  ;;  %1474 = vpow2.f32 %v1176_v54  ;;  %v1279_v3 = vunpack.c.l.bf16 %v1359_v56  ;;  %v1280_v4 = vunpack.c.h.bf16 %v1359_v56  ;;  %v1283_v5 = vunpack.c.l.bf16 %v1360_v57 }
  0x55   : > { %v1463_v6 = vpop.eup %1462  ;;  %v848_v7 = vadd.f32 1.0, %v1461_v2  ;;  %1476 = vpow2.f32 %v1177_v59  ;;  %v600_v8 = vsel %vm472_vm12, %v408_v51, %v536_v63  ;;  %v409_v10 = vadd.f32 %v1698_v9, %v338_v1  ;;  %v1823_v51 = vld [vmem:[%s1684_s18 + $0x98] sm:$0xff]  }
  0x56   : > { %v1465_v11 = vpop.eup %1464  ;;  %v849_v12 = vadd.f32 1.0, %v1463_v6  ;;  %1478 = vpow2.f32 %v1178_v62  ;;  %v1179_v13 = vmul.f32 -1.442695, %v600_v8  ;;  %v339_v14 = vmul.f32 %v1279_v3, %v1689_v0 }
  0x57   : > { %v1467_v15 = vpop.eup %1466  ;;  %1480 = vrcp.f32 %v848_v7  ;;  %v850_v16 = vadd.f32 1.0, %v1465_v11  ;;  %vm473_vm13 = vcmp.ge.f32.partialorder %v409_v10, 0.0  ;;  %v537_v17 = vmul.f32 0.2, %v409_v10 }
  0x58   : > { %1482 = vrcp.f32 %v849_v12  ;;  %v851_v18 = vadd.f32 1.0, %v1467_v15  ;;  %v410_v19 = vadd.f32 %v1698_v9, %v339_v14  ;;  %v340_v20 = vmul.f32 %v1280_v4, %v1689_v0 }
  0x59   : > { %1484 = vrcp.f32 %v850_v16  ;;  %v601_v21 = vsel %vm473_vm13, %v409_v10, %v537_v17  ;;  %v341_v22 = vmul.f32 %v1283_v5, %v1689_v0  ;;  %v1284_v23 = vunpack.c.h.bf16 %v1360_v57 }
  0x5a   : > { %1486 = vrcp.f32 %v851_v18  ;;  %v1180_v25 = vmul.f32 -1.442695, %v601_v21  ;;  %vm474_vm14 = vcmp.ge.f32.partialorder %v410_v19, 0.0  ;;  %v538_v26 = vmul.f32 0.2, %v410_v19 }
  0x5b   : > { %v1469_v27 = vpop.eup %1468  ;;  %1488 = vpow2.f32 %v1179_v13  ;;  %v411_v28 = vadd.f32 %v1698_v9, %v340_v20  ;;  %v412_v29 = vadd.f32 %v1698_v9, %v341_v22  ;;  %v342_v30 = vmul.f32 %v1284_v23, %v1689_v0  ;;  %v1364_v13 = vld [vmem:[%s1684_s18 + $0xa0] sm:$0xff]  }
  0x5c   : > { %v1471_v31 = vpop.eup %1470  ;;  %v852_v32 = vadd.f32 1.0, %v1469_v27  ;;  %1490 = vpow2.f32 %v1180_v25  ;;  %v602_v33 = vsel %vm474_vm14, %v410_v19, %v538_v26  ;;  %v1287_v34 = vunpack.c.l.bf16 %v1361_v24 }
  0x5d   : > { %v1473_v35 = vpop.eup %1472  ;;  %1038 = vst [vmem:[%s1744_s26 + $0x90] sm:$0xff] %v1471_v31  ;;  %v1181_v36 = vmul.f32 -1.442695, %v602_v33  ;;  %vm475_vm15 = vcmp.ge.f32.partialorder %v411_v28, 0.0  ;;  %v539_v37 = vmul.f32 0.2, %v411_v28  ;;  %v413_v40 = vadd.f32 %v1698_v9, %v342_v30 }
  0x5e   : > { %vm476_vm0 = vcmp.ge.f32.partialorder %v412_v29, 0.0  ;;  %v1475_v38 = vpop.eup %1474  ;;  %1039 = vst [vmem:[%s1744_s26 + $0x98] sm:$0xff] %v1473_v35  ;;  %1492 = vrcp.f32 %v852_v32  ;;  %v540_v39 = vmul.f32 0.2, %v412_v29  ;;  %v343_v41 = vmul.f32 %v1287_v34, %v1689_v0 }
  0x5f   : > { %v1477_v42 = vpop.eup %1476  ;;  %v853_v43 = vadd.f32 1.0, %v1475_v38  ;;  %1494 = vpow2.f32 %v1181_v36  ;;  %v603_v44 = vsel %vm475_vm15, %v411_v28, %v539_v37  ;;  %v1288_v45 = vunpack.c.h.bf16 %v1361_v24 }
  0x60   : > { %v1479_v47 = vpop.eup %1478  ;;  %v854_v48 = vadd.f32 1.0, %v1477_v42  ;;  %v1182_v49 = vmul.f32 -1.442695, %v603_v44  ;;  %v604_v50 = vsel %vm476_vm0, %v412_v29, %v540_v39  ;;  %vm477_vm1 = vcmp.ge.f32.partialorder %v413_v40, 0.0 }
  0x61   : > { %v1481_v52 = vpop.eup %1480  ;;  %1496 = vrcp.f32 %v853_v43  ;;  %v855_v53 = vadd.f32 1.0, %v1479_v47  ;;  %v1183_v54 = vmul.f32 -1.442695, %v604_v50  ;;  %v541_v55 = vmul.f32 0.2, %v413_v40 }
  0x62   : > { %v1483_v56 = vpop.eup %1482  ;;  %1040 = vst [vmem:[%s1744_s26 + $0xa0] sm:$0xff] %v1481_v52  ;;  %1498 = vrcp.f32 %v854_v48  ;;  %v414_v57 = vadd.f32 %v1698_v9, %v343_v41  ;;  %v344_v58 = vmul.f32 %v1288_v45, %v1689_v0  ;;  %v1291_v59 = vunpack.c.l.bf16 %v1362_v46  ;;  %v1365_v48 = vld [vmem:[%s1684_s18 + $0xa8] sm:$0xff]  }
  0x63   : > { %v1485_v60 = vpop.eup %1484  ;;  %1041 = vst [vmem:[%s1744_s26 + $0xa8] sm:$0xff] %v1483_v56  ;;  %1500 = vrcp.f32 %v855_v53  ;;  %v605_v61 = vsel %vm477_vm1, %v413_v40, %v541_v55  ;;  %v1292_v62 = vunpack.c.h.bf16 %v1362_v46  ;;  %v1295_v63 = vunpack.c.l.bf16 %v1823_v51 }
  0x64   : > { %v1487_v1 = vpop.eup %1486  ;;  %1042 = vst [vmem:[%s1744_s26 + $0xb0] sm:$0xff] %v1485_v60  ;;  %1502 = vpow2.f32 %v1182_v49  ;;  %v1184_v2 = vmul.f32 -1.442695, %v605_v61  ;;  %vm478_vm2 = vcmp.ge.f32.partialorder %v414_v57, 0.0  ;;  %v542_v3 = vmul.f32 0.2, %v414_v57 }
  0x65   : > { %v1489_v4 = vpop.eup %1488  ;;  %1043 = vst [vmem:[%s1744_s26 + $0xb8] sm:$0xff] %v1487_v1  ;;  %1504 = vpow2.f32 %v1183_v54  ;;  %v415_v5 = vadd.f32 %v1698_v9, %v344_v58  ;;  %v345_v6 = vmul.f32 %v1291_v59, %v1689_v0  ;;  %v346_v7 = vmul.f32 %v1292_v62, %v1689_v0  ;;  %v1366_v61 = vld [vmem:[%s1684_s18 + $0xb0] sm:$0xff]  }
  0x66   : > { %v1491_v8 = vpop.eup %1490  ;;  %v856_v10 = vadd.f32 1.0, %v1489_v4  ;;  %1506 = vpow2.f32 %v1184_v2  ;;  %v606_v11 = vsel %vm478_vm2, %v414_v57, %v542_v3  ;;  %v347_v12 = vmul.f32 %v1295_v63, %v1689_v0 }
  0x67   : > { %v857_v14 = vadd.f32 1.0, %v1491_v8  ;;  %v1185_v15 = vmul.f32 -1.442695, %v606_v11  ;;  %vm479_vm3 = vcmp.ge.f32.partialorder %v415_v5, 0.0  ;;  %v543_v16 = vmul.f32 0.2, %v415_v5 }
  0x68   : > { %v1493_v17 = vpop.eup %1492  ;;  %1508 = vrcp.f32 %v856_v10  ;;  %v416_v18 = vadd.f32 %v1698_v9, %v345_v6  ;;  %v417_v19 = vadd.f32 %v1698_v9, %v346_v7  ;;  %v418_v20 = vadd.f32 %v1698_v9, %v347_v12  ;;  %v1868_v12 = vld [vmem:[%s1961_s2] ss:$0 sm:$0xff] }
  0x69   : > { %v1495_v21 = vpop.eup %1494  ;;  %1044 = vst [vmem:[%s1744_s26 + $0xc0] sm:$0xff] %v1493_v17  ;;  %1510 = vrcp.f32 %v857_v14  ;;  %v607_v22 = vsel %vm479_vm3, %v415_v5, %v543_v16  ;;  %v1296_v23 = vunpack.c.h.bf16 %v1823_v51  ;;  %v1299_v24 = vunpack.c.l.bf16 %v1364_v13 }
  0x6a   : > { %v858_v25 = vadd.f32 1.0, %v1495_v21  ;;  %1512 = vpow2.f32 %v1185_v15  ;;  %v1186_v26 = vmul.f32 -1.442695, %v607_v22  ;;  %vm480_vm4 = vcmp.ge.f32.partialorder %v416_v18, 0.0 }
  0x6b   : > { %v1497_v27 = vpop.eup %1496  ;;  %v544_v28 = vmul.f32 0.2, %v416_v18  ;;  %vm481_vm5 = vcmp.ge.f32.partialorder %v417_v19, 0.0  ;;  %v545_v29 = vmul.f32 0.2, %v417_v19  ;;  %vm482_vm6 = vcmp.ge.f32.partialorder %v418_v20, 0.0 }
  0x6c   : > { %v1499_v30 = vpop.eup %1498  ;;  %1045 = vst [vmem:[%s1744_s26 + $0xc8] sm:$0xff] %v1497_v27  ;;  %1514 = vrcp.f32 %v858_v25  ;;  %v546_v31 = vmul.f32 0.2, %v418_v20  ;;  %v348_v32 = vmul.f32 %v1296_v23, %v1689_v0  ;;  %v349_v33 = vmul.f32 %v1299_v24, %v1689_v0 }
  0x6d   : > { %v1501_v34 = vpop.eup %1500  ;;  %1046 = vst [vmem:[%s1744_s26 + $0xd0] sm:$0xff] %v1499_v30  ;;  %1516 = vpow2.f32 %v1186_v26  ;;  %v608_v35 = vsel %vm480_vm4, %v416_v18, %v544_v28  ;;  %v609_v36 = vsel %vm481_vm5, %v417_v19, %v545_v29  ;;  %v1300_v37 = vunpack.c.h.bf16 %v1364_v13  ;;  %v1367_v18 = vld [vmem:[%s1684_s18 + $0xb8] sm:$0xff]  }
  0x6e   : > { %v1503_v38 = vpop.eup %1502  ;;  %1047 = vst [vmem:[%s1744_s26 + $0xd8] sm:$0xff] %v1501_v34  ;;  %v1187_v39 = vmul.f32 -1.442695, %v608_v35  ;;  %v1188_v40 = vmul.f32 -1.442695, %v609_v36  ;;  %v610_v41 = vsel %vm482_vm6, %v418_v20, %v546_v31  ;;  %v419_v42 = vadd.f32 %v1698_v9, %v348_v32 }
  0x6f   : > { %v1505_v43 = vpop.eup %1504  ;;  %v859_v44 = vadd.f32 1.0, %v1503_v38  ;;  %v1189_v45 = vmul.f32 -1.442695, %v610_v41  ;;  %v420_v46 = vadd.f32 %v1698_v9, %v349_v33  ;;  %v350_v47 = vmul.f32 %v1300_v37, %v1689_v0 }
  0x70   : > { %v1507_v49 = vpop.eup %1506  ;;  %v860_v50 = vadd.f32 1.0, %v1505_v43  ;;  %1518 = vpow2.f32 %v1187_v39  ;;  %vm483_vm7 = vcmp.ge.f32.partialorder %v419_v42, 0.0  ;;  %v547_v51 = vmul.f32 0.2, %v419_v42 }
  0x71   : > { %1520 = vrcp.f32 %v859_v44  ;;  %v861_v52 = vadd.f32 1.0, %v1507_v49  ;;  %vm484_vm8 = vcmp.ge.f32.partialorder %v420_v46, 0.0  ;;  %v548_v53 = vmul.f32 0.2, %v420_v46 }
  0x72   : > { %v1509_v54 = vpop.eup %1508  ;;  %1522 = vrcp.f32 %v860_v50  ;;  %v611_v55 = vsel %vm483_vm7, %v419_v42, %v547_v51  ;;  %v421_v56 = vadd.f32 %v1698_v9, %v350_v47  ;;  %v1303_v57 = vunpack.c.l.bf16 %v1365_v48  ;;  %v1860_v9 = vld [vmem:[%s1960_s1] ss:$0 sm:$0xff] }
  0x73   : > { %v1511_v0 = vpop.eup %1510  ;;  %1048 = vst [vmem:[%s1744_s26 + $0xe0] sm:$0xff] %v1509_v54  ;;  %1524 = vrcp.f32 %v861_v52  ;;  %v1190_v58 = vmul.f32 -1.442695, %v611_v55  ;;  %v612_v59 = vsel %vm484_vm8, %v420_v46, %v548_v53  ;;  %v1304_v60 = vunpack.c.h.bf16 %v1365_v48 }
  0x74   : > { %v1513_v62 = vpop.eup %1512  ;;  %1049 = vst [vmem:[%s1744_s26 + $0xe8] sm:$0xff] %v1511_v0  ;;  %1526 = vpow2.f32 %v1188_v40  ;;  %v1191_v63 = vmul.f32 -1.442695, %v612_v59  ;;  %vm485_vm9 = vcmp.ge.f32.partialorder %v421_v56, 0.0  ;;  %v549_v1 = vmul.f32 0.2, %v421_v56 }
  0x75   : > { %v862_v2 = vadd.f32 1.0, %v1513_v62  ;;  %1528 = vpow2.f32 %v1189_v45  ;;  %v351_v3 = vmul.f32 %v1860_v9, %v1303_v57  ;;  %v352_v4 = vmul.f32 %v1860_v9, %v1304_v60  ;;  %v1368_v40 = vld [vmem:[%s1684_s18 + $0xc0] sm:$0xff]   ;;  %v1369_v59 = vld [vmem:[%s1684_s18 + $0xc8] sm:$0xff]  }
  0x76   : > { %v1515_v5 = vpop.eup %1514  ;;  %1530 = vpow2.f32 %v1190_v58  ;;  %v613_v6 = vsel %vm485_vm9, %v421_v56, %v549_v1  ;;  %v1307_v7 = vunpack.c.l.bf16 %v1366_v61  ;;  %v1308_v8 = vunpack.c.h.bf16 %v1366_v61 }
  0x77   : > { %v1517_v10 = vpop.eup %1516  ;;  %1050 = vst [vmem:[%s1744_s26 + $0xf0] sm:$0xff] %v1515_v5  ;;  %1532 = vrcp.f32 %v862_v2  ;;  %v1192_v11 = vmul.f32 -1.442695, %v613_v6  ;;  %v422_v13 = vadd.f32 %v1868_v12, %v351_v3  ;;  %v423_v14 = vadd.f32 %v1868_v12, %v352_v4 }
  0x78   : > { %v863_v15 = vadd.f32 1.0, %v1517_v10  ;;  %1534 = vpow2.f32 %v1191_v63  ;;  %v353_v16 = vmul.f32 %v1860_v9, %v1307_v7  ;;  %v354_v17 = vmul.f32 %v1860_v9, %v1308_v8 }
  0x79   : > { %1536 = vpow2.f32 %v1192_v11  ;;  %vm486_vm10 = vcmp.ge.f32.partialorder %v422_v13, 0.0  ;;  %v550_v19 = vmul.f32 0.2, %v422_v13  ;;  %vm487_vm11 = vcmp.ge.f32.partialorder %v423_v14, 0.0 }
  0x7a   : > { %v1519_v20 = vpop.eup %1518  ;;  %1538 = vrcp.f32 %v863_v15  ;;  %v551_v21 = vmul.f32 0.2, %v423_v14  ;;  %v424_v22 = vadd.f32 %v1868_v12, %v353_v16  ;;  %v425_v23 = vadd.f32 %v1868_v12, %v354_v17  ;;  %v1370_v15 = vld [vmem:[%s1684_s18 + $0xd0] sm:$0xff]  }
  0x7b   : > { %v1521_v24 = vpop.eup %1520  ;;  %v864_v25 = vadd.f32 1.0, %v1519_v20  ;;  %v614_v26 = vsel %vm486_vm10, %v422_v13, %v550_v19  ;;  %v1311_v27 = vunpack.c.l.bf16 %v1367_v18  ;;  %v1312_v28 = vunpack.c.h.bf16 %v1367_v18 }
  0x7c   : > { %v1523_v29 = vpop.eup %1522  ;;  %1051 = vst [vmem:[%s1744_s26 + $0xf8] sm:$0xff] %v1521_v24  ;;  %v1193_v30 = vmul.f32 -1.442695, %v614_v26  ;;  %v615_v31 = vsel %vm487_vm11, %v423_v14, %v551_v21  ;;  %vm488_vm12 = vcmp.ge.f32.partialorder %v424_v22, 0.0  ;;  %v552_v32 = vmul.f32 0.2, %v424_v22 }
  0x7d   : > { %v1525_v33 = vpop.eup %1524  ;;  %1052 = vst [vmem:[%s1744_s26 + $0x100] sm:$0xff] %v1523_v29  ;;  %1540 = vrcp.f32 %v864_v25  ;;  %v1194_v34 = vmul.f32 -1.442695, %v615_v31  ;;  %vm489_vm13 = vcmp.ge.f32.partialorder %v425_v23, 0.0  ;;  %v553_v35 = vmul.f32 0.2, %v425_v23 }
  0x7e   : > { %v1527_v36 = vpop.eup %1526  ;;  %1053 = vst [vmem:[%s1744_s26 + $0x108] sm:$0xff] %v1525_v33  ;;  %1542 = vpow2.f32 %v1193_v30  ;;  %v616_v37 = vsel %vm488_vm12, %v424_v22, %v552_v32  ;;  %v355_v38 = vmul.f32 %v1860_v9, %v1311_v27  ;;  %v356_v39 = vmul.f32 %v1860_v9, %v1312_v28  ;;  %v1371_v28 = vld [vmem:[%s1684_s18 + $0xd8] sm:$0xff]  }
  0x7f   : > { %v1529_v41 = vpop.eup %1528  ;;  %v865_v42 = vadd.f32 1.0, %v1527_v36  ;;  %1544 = vpow2.f32 %v1194_v34  ;;  %v1195_v43 = vmul.f32 -1.442695, %v616_v37  ;;  %v617_v44 = vsel %vm489_vm13, %v425_v23, %v553_v35 }
  0x80   : > { %v1531_v45 = vpop.eup %1530  ;;  %v866_v46 = vadd.f32 1.0, %v1529_v41  ;;  %v1196_v47 = vmul.f32 -1.442695, %v617_v44  ;;  %v426_v48 = vadd.f32 %v1868_v12, %v355_v38  ;;  %v427_v49 = vadd.f32 %v1868_v12, %v356_v39  ;;  %v1372_v39 = vld [vmem:[%s1684_s18 + $0xe0] sm:$0xff]  }
  0x81   : > { %v1533_v50 = vpop.eup %1532  ;;  %1546 = vrcp.f32 %v865_v42  ;;  %v867_v51 = vadd.f32 1.0, %v1531_v45  ;;  %v1315_v52 = vunpack.c.l.bf16 %v1368_v40  ;;  %v1316_v53 = vunpack.c.h.bf16 %v1368_v40 }
  0x82   : > { %v1535_v54 = vpop.eup %1534  ;;  %1054 = vst [vmem:[%s1744_s26 + $0x110] sm:$0xff] %v1533_v50  ;;  %1548 = vrcp.f32 %v866_v46  ;;  %vm490_vm14 = vcmp.ge.f32.partialorder %v426_v48, 0.0  ;;  %v554_v55 = vmul.f32 0.2, %v426_v48  ;;  %vm491_vm15 = vcmp.ge.f32.partialorder %v427_v49, 0.0 }
  0x83   : > { %v1537_v56 = vpop.eup %1536  ;;  %1550 = vrcp.f32 %v867_v51  ;;  %v868_v57 = vadd.f32 1.0, %v1535_v54  ;;  %v555_v0 = vmul.f32 0.2, %v427_v49  ;;  %v357_v58 = vmul.f32 %v1860_v9, %v1315_v52 }
  0x84   : > { %v1539_v60 = vpop.eup %1538  ;;  %v869_v61 = vadd.f32 1.0, %v1537_v56  ;;  %1552 = vpow2.f32 %v1195_v43  ;;  %v618_v62 = vsel %vm490_vm14, %v426_v48, %v554_v55  ;;  %v358_v63 = vmul.f32 %v1860_v9, %v1316_v53 }
  0x85   : > { %1055 = vst [vmem:[%s1744_s26 + $0x118] sm:$0xff] %v1539_v60  ;;  %1554 = vrcp.f32 %v868_v57  ;;  %v1197_v1 = vmul.f32 -1.442695, %v618_v62  ;;  %v619_v2 = vsel %vm491_vm15, %v427_v49, %v555_v0  ;;  %v428_v3 = vadd.f32 %v1868_v12, %v357_v58  ;;  %v1373_v62 = vld [vmem:[%s1684_s18 + $0xe8] sm:$0xff]  }
  0x86   : > { %1556 = vrcp.f32 %v869_v61  ;;  %v1198_v4 = vmul.f32 -1.442695, %v619_v2  ;;  %v429_v5 = vadd.f32 %v1868_v12, %v358_v63  ;;  %v1319_v6 = vunpack.c.l.bf16 %v1369_v59 }
  0x87   : > { %v1541_v7 = vpop.eup %1540  ;;  %1558 = vpow2.f32 %v1196_v47  ;;  %vm492_vm0 = vcmp.ge.f32.partialorder %v428_v3, 0.0  ;;  %v556_v8 = vmul.f32 0.2, %v428_v3  ;;  %v1320_v10 = vunpack.c.h.bf16 %v1369_v59 }
  0x88   : > { %v1543_v11 = vpop.eup %1542  ;;  %1056 = vst [vmem:[%s1744_s26 + $0x120] sm:$0xff] %v1541_v7  ;;  %1560 = vpow2.f32 %v1197_v1  ;;  %vm493_vm1 = vcmp.ge.f32.partialorder %v429_v5, 0.0  ;;  %v557_v13 = vmul.f32 0.2, %v429_v5  ;;  %v359_v14 = vmul.f32 %v1860_v9, %v1319_v6 }
  0x89   : > { %v1545_v16 = vpop.eup %1544  ;;  %v870_v17 = vadd.f32 1.0, %v1543_v11  ;;  %1562 = vpow2.f32 %v1198_v4  ;;  %v620_v18 = vsel %vm492_vm0, %v428_v3, %v556_v8  ;;  %v360_v19 = vmul.f32 %v1860_v9, %v1320_v10 }
  0x8a   : > { %v871_v20 = vadd.f32 1.0, %v1545_v16  ;;  %v1199_v21 = vmul.f32 -1.442695, %v620_v18  ;;  %v621_v22 = vsel %vm493_vm1, %v429_v5, %v557_v13  ;;  %v430_v23 = vadd.f32 %v1868_v12, %v359_v14 }
  0x8b   : > { %v1547_v24 = vpop.eup %1546  ;;  %1564 = vrcp.f32 %v870_v17  ;;  %v1200_v25 = vmul.f32 -1.442695, %v621_v22  ;;  %v431_v26 = vadd.f32 %v1868_v12, %v360_v19  ;;  %v1323_v27 = vunpack.c.l.bf16 %v1370_v15 }
  0x8c   : > { %v1549_v29 = vpop.eup %1548  ;;  %1057 = vst [vmem:[%s1744_s26 + $0x128] sm:$0xff] %v1547_v24  ;;  %1566 = vrcp.f32 %v871_v20  ;;  %vm494_vm2 = vcmp.ge.f32.partialorder %v430_v23, 0.0  ;;  %v558_v30 = vmul.f32 0.2, %v430_v23  ;;  %v1324_v31 = vunpack.c.h.bf16 %v1370_v15 }
  0x8d   : > { %v1551_v32 = vpop.eup %1550  ;;  %1058 = vst [vmem:[%s1744_s26 + $0x130] sm:$0xff] %v1549_v29  ;;  %1568 = vpow2.f32 %v1199_v21  ;;  %vm495_vm3 = vcmp.ge.f32.partialorder %v431_v26, 0.0  ;;  %v559_v33 = vmul.f32 0.2, %v431_v26  ;;  %v361_v34 = vmul.f32 %v1860_v9, %v1323_v27 }
  0x8e   : > { %v1553_v35 = vpop.eup %1552  ;;  %1059 = vst [vmem:[%s1744_s26 + $0x138] sm:$0xff] %v1551_v32  ;;  %1570 = vpow2.f32 %v1200_v25  ;;  %v622_v36 = vsel %vm494_vm2, %v430_v23, %v558_v30  ;;  %v362_v37 = vmul.f32 %v1860_v9, %v1324_v31  ;;  %v1327_v38 = vunpack.c.l.bf16 %v1371_v28 }
  0x8f   : > { %v1555_v40 = vpop.eup %1554  ;;  %v872_v41 = vadd.f32 1.0, %v1553_v35  ;;  %v1201_v42 = vmul.f32 -1.442695, %v622_v36  ;;  %v623_v43 = vsel %vm495_vm3, %v431_v26, %v559_v33  ;;  %v432_v44 = vadd.f32 %v1868_v12, %v361_v34  ;;  %v1374_v34 = vld [vmem:[%s1684_s18 + $0xf0] sm:$0xff]  }
  0x90   : > { %v1557_v45 = vpop.eup %1556  ;;  %1060 = vst [vmem:[%s1744_s26 + $0x140] sm:$0xff] %v1555_v40  ;;  %v1202_v46 = vmul.f32 -1.442695, %v623_v43  ;;  %v433_v47 = vadd.f32 %v1868_v12, %v362_v37  ;;  %v363_v48 = vmul.f32 %v1860_v9, %v1327_v38  ;;  %v1328_v49 = vunpack.c.h.bf16 %v1371_v28 }
  0x91   : > { %v1559_v50 = vpop.eup %1558  ;;  %1061 = vst [vmem:[%s1744_s26 + $0x148] sm:$0xff] %v1557_v45  ;;  %1572 = vrcp.f32 %v872_v41  ;;  %vm496_vm4 = vcmp.ge.f32.partialorder %v432_v44, 0.0  ;;  %v560_v51 = vmul.f32 0.2, %v432_v44  ;;  %v1331_v52 = vunpack.c.l.bf16 %v1372_v39 }
  0x92   : > { %v1561_v53 = vpop.eup %1560  ;;  %v873_v54 = vadd.f32 1.0, %v1559_v50  ;;  %1574 = vpow2.f32 %v1201_v42  ;;  %vm497_vm5 = vcmp.ge.f32.partialorder %v433_v47, 0.0  ;;  %v561_v55 = vmul.f32 0.2, %v433_v47  ;;  %v1375_v50 = vld [vmem:[%s1684_s18 + $0xf8] sm:$0xff]  }
  0x93   : > { %v1563_v56 = vpop.eup %1562  ;;  %v874_v57 = vadd.f32 1.0, %v1561_v53  ;;  %1576 = vpow2.f32 %v1202_v46  ;;  %v624_v0 = vsel %vm496_vm4, %v432_v44, %v560_v51  ;;  %v434_v58 = vadd.f32 %v1868_v12, %v363_v48 }
  0x94   : > { %1578 = vrcp.f32 %v873_v54  ;;  %v875_v59 = vadd.f32 1.0, %v1563_v56  ;;  %v1203_v60 = vmul.f32 -1.442695, %v624_v0  ;;  %v625_v61 = vsel %vm497_vm5, %v433_v47, %v561_v55 }
  0x95   : > { %v1565_v63 = vpop.eup %1564  ;;  %1580 = vrcp.f32 %v874_v57  ;;  %v1204_v1 = vmul.f32 -1.442695, %v625_v61  ;;  %vm498_vm6 = vcmp.ge.f32.partialorder %v434_v58, 0.0  ;;  %v562_v2 = vmul.f32 0.2, %v434_v58 }
  0x96   : > { %v1567_v3 = vpop.eup %1566  ;;  %1062 = vst [vmem:[%s1744_s26 + $0x150] sm:$0xff] %v1565_v63  ;;  %1582 = vrcp.f32 %v875_v59  ;;  %v364_v4 = vmul.f32 %v1860_v9, %v1328_v49  ;;  %v365_v5 = vmul.f32 %v1860_v9, %v1331_v52  ;;  %v1332_v6 = vunpack.c.h.bf16 %v1372_v39 }
  0x97   : > { %v1569_v7 = vpop.eup %1568  ;;  %1063 = vst [vmem:[%s1744_s26 + $0x158] sm:$0xff] %v1567_v3  ;;  %1584 = vpow2.f32 %v1203_v60  ;;  %v626_v8 = vsel %vm498_vm6, %v434_v58, %v562_v2  ;;  %v1335_v10 = vunpack.c.l.bf16 %v1373_v62  ;;  %v1336_v11 = vunpack.c.h.bf16 %v1373_v62 }
  0x98   : > { %v1571_v13 = vpop.eup %1570  ;;  %v876_v14 = vadd.f32 1.0, %v1569_v7  ;;  %1586 = vpow2.f32 %v1204_v1  ;;  %v1205_v15 = vmul.f32 -1.442695, %v626_v8  ;;  %v435_v16 = vadd.f32 %v1868_v12, %v364_v4 }
  0x99   : > { %v877_v17 = vadd.f32 1.0, %v1571_v13  ;;  %v436_v18 = vadd.f32 %v1868_v12, %v365_v5  ;;  %v366_v19 = vmul.f32 %v1860_v9, %v1332_v6  ;;  %v367_v20 = vmul.f32 %v1860_v9, %v1335_v10 }
  0x9a   : > { %1588 = vrcp.f32 %v876_v14  ;;  %vm499_vm7 = vcmp.ge.f32.partialorder %v435_v16, 0.0  ;;  %v563_v21 = vmul.f32 0.2, %v435_v16  ;;  %v368_v22 = vmul.f32 %v1860_v9, %v1336_v11 }
  0x9b   : > { %v1573_v23 = vpop.eup %1572  ;;  %1590 = vrcp.f32 %v877_v17  ;;  %vm500_vm8 = vcmp.ge.f32.partialorder %v436_v18, 0.0  ;;  %v564_v24 = vmul.f32 0.2, %v436_v18  ;;  %v437_v25 = vadd.f32 %v1868_v12, %v366_v19 }
  0x9c   : > { %v1575_v26 = vpop.eup %1574  ;;  %1064 = vst [vmem:[%s1744_s26 + $0x160] sm:$0xff] %v1573_v23  ;;  %1592 = vpow2.f32 %v1205_v15  ;;  %v627_v27 = vsel %vm499_vm7, %v435_v16, %v563_v21  ;;  %v438_v28 = vadd.f32 %v1868_v12, %v367_v20  ;;  %v439_v29 = vadd.f32 %v1868_v12, %v368_v22 }
  0x9d   : > { %v1577_v30 = vpop.eup %1576  ;;  %v878_v31 = vadd.f32 1.0, %v1575_v26  ;;  %v1206_v32 = vmul.f32 -1.442695, %v627_v27  ;;  %v628_v33 = vsel %vm500_vm8, %v436_v18, %v564_v24  ;;  %vm501_vm9 = vcmp.ge.f32.partialorder %v437_v25, 0.0 }
  0x9e   : > { %v1579_v35 = vpop.eup %1578  ;;  %v879_v36 = vadd.f32 1.0, %v1577_v30  ;;  %v1207_v37 = vmul.f32 -1.442695, %v628_v33  ;;  %v565_v38 = vmul.f32 0.2, %v437_v25  ;;  %vm502_vm10 = vcmp.ge.f32.partialorder %v438_v28, 0.0 }
  0x9f   : > { %v1581_v39 = vpop.eup %1580  ;;  %1065 = vst [vmem:[%s1744_s26 + $0x168] sm:$0xff] %v1579_v35  ;;  %1594 = vrcp.f32 %v878_v31  ;;  %v566_v40 = vmul.f32 0.2, %v438_v28  ;;  %vm503_vm11 = vcmp.ge.f32.partialorder %v439_v29, 0.0  ;;  %v567_v41 = vmul.f32 0.2, %v439_v29 }
  0xa0   : > { %v1583_v42 = vpop.eup %1582  ;;  %1066 = vst [vmem:[%s1744_s26 + $0x170] sm:$0xff] %v1581_v39  ;;  %1596 = vrcp.f32 %v879_v36  ;;  %v629_v43 = vsel %vm501_vm9, %v437_v25, %v565_v38  ;;  %v1339_v44 = vunpack.c.l.bf16 %v1374_v34  ;;  %v1340_v45 = vunpack.c.h.bf16 %v1374_v34 }
  0xa1   : > { %v1585_v46 = vpop.eup %1584  ;;  %1067 = vst [vmem:[%s1744_s26 + $0x178] sm:$0xff] %v1583_v42  ;;  %1598 = vpow2.f32 %v1206_v32  ;;  %v1208_v47 = vmul.f32 -1.442695, %v629_v43  ;;  %v630_v48 = vsel %vm502_vm10, %v438_v28, %v566_v40  ;;  %v631_v49 = vsel %vm503_vm11, %v439_v29, %v567_v41 }
  0xa2   : > { %v1587_v51 = vpop.eup %1586  ;;  %v880_v52 = vadd.f32 1.0, %v1585_v46  ;;  %1600 = vpow2.f32 %v1207_v37  ;;  %v1209_v53 = vmul.f32 -1.442695, %v630_v48  ;;  %v1210_v54 = vmul.f32 -1.442695, %v631_v49 }
  0xa3   : > { %v881_v55 = vadd.f32 1.0, %v1587_v51  ;;  %1602 = vpow2.f32 %v1208_v47  ;;  %v369_v56 = vmul.f32 %v1860_v9, %v1339_v44  ;;  %v370_v57 = vmul.f32 %v1860_v9, %v1340_v45 }
  0xa4   : > { %v1589_v0 = vpop.eup %1588  ;;  %1604 = vrcp.f32 %v880_v52  ;;  %v1343_v58 = vunpack.c.l.bf16 %v1375_v50  ;;  %v1344_v59 = vunpack.c.h.bf16 %v1375_v50 }
  0xa5   : > { %v1591_v60 = vpop.eup %1590  ;;  %1068 = vst [vmem:[%s1744_s26 + $0x180] sm:$0xff] %v1589_v0  ;;  %1606 = vrcp.f32 %v881_v55  ;;  %v440_v61 = vadd.f32 %v1868_v12, %v369_v56  ;;  %v441_v62 = vadd.f32 %v1868_v12, %v370_v57 }
  0xa6   : > { %v1593_v63 = vpop.eup %1592  ;;  %1069 = vst [vmem:[%s1744_s26 + $0x188] sm:$0xff] %v1591_v60  ;;  %1608 = vpow2.f32 %v1209_v53  ;;  %v371_v1 = vmul.f32 %v1860_v9, %v1343_v58  ;;  %v372_v2 = vmul.f32 %v1860_v9, %v1344_v59 }
  0xa7   : > { %v882_v3 = vadd.f32 1.0, %v1593_v63  ;;  %1610 = vpow2.f32 %v1210_v54  ;;  %vm504_vm12 = vcmp.ge.f32.partialorder %v440_v61, 0.0  ;;  %v568_v4 = vmul.f32 0.2, %v440_v61 }
  0xa8   : > { %vm505_vm13 = vcmp.ge.f32.partialorder %v441_v62, 0.0  ;;  %v569_v5 = vmul.f32 0.2, %v441_v62  ;;  %v442_v6 = vadd.f32 %v1868_v12, %v371_v1  ;;  %v443_v7 = vadd.f32 %v1868_v12, %v372_v2 }
  0xa9   : > { %v1595_v8 = vpop.eup %1594  ;;  %1612 = vrcp.f32 %v882_v3  ;;  %v632_v10 = vsel %vm504_vm12, %v440_v61, %v568_v4 }
  0xaa   : > { %v1597_v11 = vpop.eup %1596  ;;  %1070 = vst [vmem:[%s1744_s26 + $0x190] sm:$0xff] %v1595_v8  ;;  %v1211_v13 = vmul.f32 -1.442695, %v632_v10  ;;  %v633_v14 = vsel %vm505_vm13, %v441_v62, %v569_v5  ;;  %vm506_vm14 = vcmp.ge.f32.partialorder %v442_v6, 0.0  ;;  %v570_v9 = vmul.f32 0.2, %v442_v6 }
  0xab   : > { %v1599_v15 = vpop.eup %1598  ;;  %1071 = vst [vmem:[%s1744_s26 + $0x198] sm:$0xff] %v1597_v11  ;;  %v1212_v16 = vmul.f32 -1.442695, %v633_v14  ;;  %vm507_vm15 = vcmp.ge.f32.partialorder %v443_v7, 0.0  ;;  %v571_v17 = vmul.f32 0.2, %v443_v7 }
  0xac   : > { %v1601_v18 = vpop.eup %1600  ;;  %v883_v19 = vadd.f32 1.0, %v1599_v15  ;;  %1614 = vpow2.f32 %v1211_v13  ;;  %v634_v12 = vsel %vm506_vm14, %v442_v6, %v570_v9 }
  0xad   : > { %v1603_v20 = vpop.eup %1602  ;;  %v884_v21 = vadd.f32 1.0, %v1601_v18  ;;  %1616 = vpow2.f32 %v1212_v16  ;;  %v1213_v22 = vmul.f32 -1.442695, %v634_v12  ;;  %v635_v23 = vsel %vm507_vm15, %v443_v7, %v571_v17 }
  0xae   : > { %v1605_v24 = vpop.eup %1604  ;;  %1618 = vrcp.f32 %v883_v19  ;;  %v885_v25 = vadd.f32 1.0, %v1603_v20  ;;  %v1214_v26 = vmul.f32 -1.442695, %v635_v23 }
  0xaf   : > { %v1607_v27 = vpop.eup %1606  ;;  %1072 = vst [vmem:[%s1744_s26 + $0x1a0] sm:$0xff] %v1605_v24  ;;  %1620 = vrcp.f32 %v884_v21 }
  0xb0   : > { %v1609_v28 = vpop.eup %1608  ;;  %1073 = vst [vmem:[%s1744_s26 + $0x1a8] sm:$0xff] %v1607_v27  ;;  %1622 = vrcp.f32 %v885_v25 }
  0xb1   : > { %v1611_v29 = vpop.eup %1610  ;;  %v886_v30 = vadd.f32 1.0, %v1609_v28  ;;  %1624 = vpow2.f32 %v1213_v22 }
  0xb2   : > { %v887_v31 = vadd.f32 1.0, %v1611_v29  ;;  %1626 = vpow2.f32 %v1214_v26 }
  0xb3   : > { %v1613_v32 = vpop.eup %1612  ;;  %1628 = vrcp.f32 %v886_v30 }
  0xb4   : > { %1074 = vst [vmem:[%s1744_s26 + $0x1b0] sm:$0xff] %v1613_v32  ;;  %1630 = vrcp.f32 %v887_v31 }
  0xb6   : > { %v1615_v33 = vpop.eup %1614 }
  0xb7   : > { %v1617_v34 = vpop.eup %1616  ;;  %v888_v35 = vadd.f32 1.0, %v1615_v33 }
  0xb8   : > { %v1619_v36 = vpop.eup %1618  ;;  %v889_v37 = vadd.f32 1.0, %v1617_v34 }
  0xb9   : > { %v1621_v38 = vpop.eup %1620  ;;  %1075 = vst [vmem:[%s1744_s26 + $0x1b8] sm:$0xff] %v1619_v36  ;;  %1632 = vrcp.f32 %v888_v35 }
  0xba   : > { %v1623_v39 = vpop.eup %1622  ;;  %1076 = vst [vmem:[%s1744_s26 + $0x1c0] sm:$0xff] %v1621_v38  ;;  %1634 = vrcp.f32 %v889_v37 }
  0xbb   : > { %v1625_v40 = vpop.eup %1624  ;;  %1077 = vst [vmem:[%s1744_s26 + $0x1c8] sm:$0xff] %v1623_v39 }
  0xbc   : > { %v1627_v41 = vpop.eup %1626  ;;  %v890_v42 = vadd.f32 1.0, %v1625_v40 }
  0xbd   : > { %v1629_v43 = vpop.eup %1628  ;;  %v891_v44 = vadd.f32 1.0, %v1627_v41 }
  0xbe   : > { %v1631_v45 = vpop.eup %1630  ;;  %1078 = vst [vmem:[%s1744_s26 + $0x1d0] sm:$0xff] %v1629_v43  ;;  %1636 = vrcp.f32 %v890_v42 }
  0xbf   : > { %1079 = vst [vmem:[%s1744_s26 + $0x1d8] sm:$0xff] %v1631_v45  ;;  %1638 = vrcp.f32 %v891_v44 }
  0xc3   : > { %v1633_v46 = vpop.eup %1632 }
  0xc4   : > { %v1635_v47 = vpop.eup %1634  ;;  %1080 = vst [vmem:[%s1744_s26 + $0x1e0] sm:$0xff] %v1633_v46 }
  0xc5   : > { %1081 = vst [vmem:[%s1744_s26 + $0x1e8] sm:$0xff] %v1635_v47 }
  0xc8   : > { %v1637_v48 = vpop.eup %1636 }
  0xc9   : > { %v1639_v49 = vpop.eup %1638  ;;  %1082 = vst [vmem:[%s1744_s26 + $0x1f0] sm:$0xff] %v1637_v48 }
  0xca   : > { %1083 = vst [vmem:[%s1744_s26 + $0x1f8] sm:$0xff] %v1639_v49 }
  0xcb PF: > { %s13_s12 = sadd.s32 1, %s1648_s12  }
  0xcc   : > { %p10_p4 = scmp.ge.s32.totalorder %s13_s12, 4  }
  0xce   :  { %12 = sbr.rel (!%p10_p4) target bundleno = 1 (0x1), region = 62 }

</bundles_post_ra>
